<compile_context>
chip_gen: v5e
topology: v5e:2x2
jax: 0.10.0
libtpu: 0.0.40
codegen_flags: <defaults>
</compile_context>

<pallas_src>
import functools
import math

import jax
import jax.numpy as jnp
from jax.experimental import pallas as pl
from jax.experimental.pallas import tpu as pltpu


# ----------------------------------------------------------------------------
# Fused Pallas kernel: one grid step == Bt batch elements.
# ----------------------------------------------------------------------------
def _encoder_layer_kernel(*refs, n_head, d_k, d_v, g_n_head, d_g,
                          max_diff_step, with_graph, block_b, n_nodes):
    if with_graph:
        (x_ref, adj_ref, wqkv_ref, bqkv_ref, wo_ref, bo_ref, g_ref, be_ref,
         wg_ref, bg_ref, theta_ref, x_out_ref, adj_out_ref, ctx_ref) = refs
    else:
        (x_ref, adj_ref, wqkv_ref, bqkv_ref, wo_ref, bo_ref, g_ref, be_ref,
         theta_ref, x_out_ref, ctx_ref) = refs

    Bt = block_b
    N = n_nodes
    d_in = x_ref.shape[-1]
    BN = Bt * N

    # ---- fused Q|K|V projection on all Bt*N rows (fills MXU M dim) ----------
    x2 = x_ref[...].reshape(BN, d_in)                            # (Bt*N, Din)
    qkv = jnp.dot(x2, wqkv_ref[...],
                  preferred_element_type=jnp.float32) + bqkv_ref[...]

    h_dk = n_head * d_k
    inv_sqrt_dk = 1.0 / math.sqrt(d_k)

    # ---- DiffAtten: per-(batch, head) scaled-dot-product attention ----------
    # Head contexts go straight into the packed (Bt*N, H*d_v) VMEM scratch
    # (no jnp.concatenate, short live ranges).
    for b in range(Bt):
        r0 = b * N
        for h in range(n_head):
            q = qkv[r0:r0 + N, h * d_k:(h + 1) * d_k]                  # (N,dk)
            k = qkv[r0:r0 + N, h_dk + h * d_k: h_dk + (h + 1) * d_k]   # (N,dk)
            v = qkv[r0:r0 + N,
                    2 * h_dk + h * d_v: 2 * h_dk + (h + 1) * d_v]      # (N,dv)
            # q @ k^T without an explicit transpose copy.
            s = jax.lax.dot_general(q, k, (((1,), (1,)), ((), ())),
                                    preferred_element_type=jnp.float32)
            s = s * inv_sqrt_dk
            s = s - jnp.max(s, axis=-1, keepdims=True)
            p = jnp.exp(s)
            a = p * pl.reciprocal(jnp.sum(p, axis=-1, keepdims=True),
                                  approx=True)
            ctx_ref[r0:r0 + N, h * d_v:(h + 1) * d_v] = jnp.dot(
                a, v, preferred_element_type=jnp.float32)

    # ---- graph diffusion: sum_s theta_s * adj^s @ ctx (per batch element) ---
    # adj@ commutes with the head concatenation, so diffusion runs once on the
    # packed (N, H*d_v) context.
    for b in range(Bt):
        r0 = b * N
        adj_b = adj_ref[b]                                       # (N, N)
        ctx_b = ctx_ref[r0:r0 + N, :]                            # (N, H*d_v)
        acc = theta_ref[0] * ctx_b
        cur = ctx_b
        for step in range(1, max_diff_step + 1):
            cur = jnp.dot(adj_b, cur, preferred_element_type=jnp.float32)
            acc = acc + theta_ref[step] * cur
        ctx_ref[r0:r0 + N, :] = acc

    # ---- output projection + residual + LayerNorm (dropout == identity) ----
    y = jnp.dot(ctx_ref[...], wo_ref[...],
                preferred_element_type=jnp.float32) + bo_ref[...]
    y = y + x2                                                   # residual
    mu = jnp.mean(y, axis=-1, keepdims=True)
    var = jnp.mean(jnp.square(y - mu), axis=-1, keepdims=True)
    x_new = (y - mu) * jax.lax.rsqrt(var + 1e-5) * g_ref[...] + be_ref[...]
    x_out_ref[...] = x_new.reshape(Bt, N, -1)

    # ---- GraphAtten: new row-stochastic adjacency (only when requested) -----
    if with_graph:
        qk_g = jnp.dot(x_new, wg_ref[...],
                       preferred_element_type=jnp.float32) + bg_ref[...]
        g_dg = g_n_head * d_g
        inv_sqrt_dg = 1.0 / math.sqrt(d_g)
        for b in range(Bt):
            r0 = b * N
            adj_b = adj_ref[b]
            adj_acc = jnp.zeros_like(adj_b)
            for h in range(g_n_head):
                qg = qk_g[r0:r0 + N, h * d_g:(h + 1) * d_g]
                kg = qk_g[r0:r0 + N, g_dg + h * d_g: g_dg + (h + 1) * d_g]
                s = jax.lax.dot_general(qg, kg, (((1,), (1,)), ((), ())),
                                        preferred_element_type=jnp.float32)
                s = s * inv_sqrt_dg + adj_b          # old adjacency as bias
                s = s - jnp.max(s, axis=-1, keepdims=True)
                p = jnp.exp(s)
                # exact normalization: adj_out is the next layer's diffusion
                # operator, so approximation error would compound over adj^s.
                adj_acc = adj_acc + p / jnp.sum(p, axis=-1, keepdims=True)
            adj_out_ref[b] = adj_acc * (1.0 / g_n_head)          # mean of heads


# ----------------------------------------------------------------------------
# Parameter init (deterministic, PyTorch-nn.Linear-style uniform)
# ----------------------------------------------------------------------------
def init_params(key, *, d_in, g_n_head, d_n_head, d_k, d_v, d_out,
                max_diff_step):
    assert d_out == d_in, "residual + LayerNorm requires d_out == d_in"
    assert d_out % g_n_head == 0
    d_g = d_out // g_n_head

    def lin(k, fan_in, fan_out):
        kw, kb = jax.random.split(k)
        bound = 1.0 / math.sqrt(fan_in)
        w = jax.random.uniform(kw, (fan_in, fan_out), jnp.float32, -bound, bound)
        b = jax.random.uniform(kb, (fan_out,), jnp.float32, -bound, bound)
        return w, b

    ks = jax.random.split(key, 6)
    wq, bq = lin(ks[0], d_in, d_n_head * d_k)
    wk, bk = lin(ks[1], d_in, d_n_head * d_k)
    wv, bv = lin(ks[2], d_in, d_n_head * d_v)
    wo, bo = lin(ks[3], d_n_head * d_v, d_out)
    wgq, bgq = lin(ks[4], d_out, g_n_head * d_g)
    wgk, bgk = lin(ks[5], d_out, g_n_head * d_g)

    theta = 0.5 ** jnp.arange(max_diff_step + 1, dtype=jnp.float32)

    return dict(
        # packed Q|K|V projection
        wqkv=jnp.concatenate([wq, wk, wv], axis=1),
        bqkv=jnp.concatenate([bq, bk, bv], axis=0),
        wo=wo, bo=bo,
        ln_g=jnp.ones((d_out,), jnp.float32),
        ln_b=jnp.zeros((d_out,), jnp.float32),
        theta=theta,
        # packed Qg|Kg projection for GraphAtten
        wg=jnp.concatenate([wgq, wgk], axis=1),
        bg=jnp.concatenate([bgq, bgk], axis=0),
    )


def _pick_block_b(B, N, target_rows=128):
    """Largest divisor Bt of B such that Bt*N <= target_rows.

    target_rows=128 matches the v5e/v6e MXU M dim; pass 256 for v7x."""
    best = 1
    for cand in range(1, B + 1):
        if B % cand == 0 and cand * N <= target_rows:
            best = cand
    return best


# ----------------------------------------------------------------------------
# EncoderLayer.forward
# ----------------------------------------------------------------------------
def encoder_layer_forward(params, x, adj, *, d_n_head, d_k, d_v, g_n_head,
                          max_diff_step, adj_type="D", block_b=None):
    B, N, d_in = x.shape
    d_out = params["wo"].shape[1]
    d_g = d_out // g_n_head
    with_graph = (adj_type == "D")

    h_qkv = params["wqkv"].shape[1]
    g_dim = params["wg"].shape[1]

    if block_b is None:
        block_b = _pick_block_b(B, N, target_rows=128)
    Bt = block_b
    assert B % Bt == 0, "B must be divisible by the batch tile"
    grid = (B // Bt,)

    kernel = functools.partial(
        _encoder_layer_kernel, n_head=d_n_head, d_k=d_k, d_v=d_v,
        g_n_head=g_n_head, d_g=d_g, max_diff_step=max_diff_step,
        with_graph=with_graph, block_b=Bt, n_nodes=N)

    in_specs = [
        pl.BlockSpec((Bt, N, d_in), lambda g: (g, 0, 0)),         # x
        pl.BlockSpec((Bt, N, N), lambda g: (g, 0, 0)),            # adj
        pl.BlockSpec((d_in, h_qkv), lambda g: (0, 0)),            # wqkv
        pl.BlockSpec((1, h_qkv), lambda g: (0, 0)),               # bqkv
        pl.BlockSpec((d_n_head * d_v, d_out), lambda g: (0, 0)),  # wo
        pl.BlockSpec((1, d_out), lambda g: (0, 0)),               # bo
        pl.BlockSpec((1, d_out), lambda g: (0, 0)),               # ln gamma
        pl.BlockSpec((1, d_out), lambda g: (0, 0)),               # ln beta
    ]
    operands = [x, adj,
                params["wqkv"], params["bqkv"].reshape(1, -1),
                params["wo"], params["bo"].reshape(1, -1),
                params["ln_g"].reshape(1, -1), params["ln_b"].reshape(1, -1)]
    if with_graph:
        in_specs += [pl.BlockSpec((d_out, g_dim), lambda g: (0, 0)),  # wg
                     pl.BlockSpec((1, g_dim), lambda g: (0, 0))]      # bg
        operands += [params["wg"], params["bg"].reshape(1, -1)]
    in_specs.append(pl.BlockSpec(memory_space=pltpu.MemorySpace.SMEM))  # theta
    operands.append(params["theta"])

    if with_graph:
        out_shape = (jax.ShapeDtypeStruct((B, N, d_out), jnp.float32),
                     jax.ShapeDtypeStruct((B, N, N), jnp.float32))
        out_specs = (pl.BlockSpec((Bt, N, d_out), lambda g: (g, 0, 0)),
                     pl.BlockSpec((Bt, N, N), lambda g: (g, 0, 0)))
    else:
        # No adjacency output at all: saves the B*N*N HBM write + its VMEM
        # double-buffer (the wrapper returns the input adj unchanged).
        out_shape = jax.ShapeDtypeStruct((B, N, d_out), jnp.float32)
        out_specs = pl.BlockSpec((Bt, N, d_out), lambda g: (g, 0, 0))

    result = pl.pallas_call(
        kernel,
        out_shape=out_shape,
        grid=grid,
        in_specs=in_specs,
        out_specs=out_specs,
        scratch_shapes=[pltpu.VMEM((Bt * N, d_n_head * d_v), jnp.float32)],
        compiler_params=pltpu.CompilerParams(
            dimension_semantics=("parallel",)),
    )(*operands)

    if with_graph:
        x_out, adj_out = result
    else:
        x_out, adj_out = result, adj
    return x_out, adj_out


# ----------------------------------------------------------------------------
# Pure-JAX reference (same reconstructed equations) for a correctness check.
# ----------------------------------------------------------------------------
def _reference_forward(params, x, adj, *, d_n_head, d_k, d_v, g_n_head,
                       max_diff_step):
    B, N, d_in = x.shape
    d_out = params["wo"].shape[1]
    d_g = d_out // g_n_head

    qkv = jnp.einsum("bnd,de->bne", x, params["wqkv"]) + params["bqkv"]
    h_dk = d_n_head * d_k
    q = qkv[..., :h_dk].reshape(B, N, d_n_head, d_k).transpose(0, 2, 1, 3)
    k = qkv[..., h_dk:2 * h_dk].reshape(B, N, d_n_head, d_k).transpose(0, 2, 1, 3)
    v = qkv[..., 2 * h_dk:].reshape(B, N, d_n_head, d_v).transpose(0, 2, 1, 3)

    s = jnp.einsum("bhqd,bhkd->bhqk", q, k) / math.sqrt(d_k)
    a = jax.nn.softmax(s, axis=-1)
    ctx = jnp.einsum("bhqk,bhkd->bhqd", a, v)

    acc = params["theta"][0] * ctx
    cur = ctx
    for step in range(1, max_diff_step + 1):
        cur = jnp.einsum("bnm,bhmd->bhnd", adj, cur)
        acc = acc + params["theta"][step] * cur
    ctx = acc.transpose(0, 2, 1, 3).reshape(B, N, d_n_head * d_v)

    y = jnp.einsum("bnd,de->bne", ctx, params["wo"]) + params["bo"] + x
    mu = jnp.mean(y, axis=-1, keepdims=True)
    var = jnp.mean(jnp.square(y - mu), axis=-1, keepdims=True)
    x_new = (y - mu) * jax.lax.rsqrt(var + 1e-5) * params["ln_g"] + params["ln_b"]

    qk_g = jnp.einsum("bnd,de->bne", x_new, params["wg"]) + params["bg"]
    g_dg = g_n_head * d_g
    qg = qk_g[..., :g_dg].reshape(B, N, g_n_head, d_g).transpose(0, 2, 1, 3)
    kg = qk_g[..., g_dg:].reshape(B, N, g_n_head, d_g).transpose(0, 2, 1, 3)
    sg = jnp.einsum("bhqd,bhkd->bhqk", qg, kg) / math.sqrt(d_g) + adj[:, None]
    adj_new = jnp.mean(jax.nn.softmax(sg, axis=-1), axis=1)
    return x_new, adj_new


# ----------------------------------------------------------------------------
if __name__ == "__main__":
    B, N, d_in = 4, 8, 32
    d_n_head, d_k, d_v, d_out = 4, 16, 16, 32
    g_n_head, max_diff_step = 2, 3

    key = jax.random.PRNGKey(0)
    kx, ka, kp = jax.random.split(key, 3)
    x = jax.random.normal(kx, (B, N, d_in), jnp.float32)
    adj = jax.nn.softmax(jax.random.normal(ka, (B, N, N), jnp.float32), axis=-1)

    params = init_params(kp, d_in=d_in, g_n_head=g_n_head, d_n_head=d_n_head,
                         d_k=d_k, d_v=d_v, d_out=d_out,
                         max_diff_step=max_diff_step)

    fwd = jax.jit(functools.partial(
        encoder_layer_forward, d_n_head=d_n_head, d_k=d_k, d_v=d_v,
        g_n_head=g_n_head, max_diff_step=max_diff_step, adj_type="D"))

    x_out, adj_out = fwd(params, x, adj)
    jax.block_until_ready((x_out, adj_out))

    assert x_out.shape == (B, N, d_out)
    assert adj_out.shape == (B, N, N)

    # correctness check vs. pure-JAX reference (approx-reciprocal tolerance on
    # the DiffAtten path; adjacency softmax is exactly normalized in-kernel)
    x_ref, adj_ref = _reference_forward(
        params, x, adj, d_n_head=d_n_head, d_k=d_k, d_v=d_v,
        g_n_head=g_n_head, max_diff_step=max_diff_step)
    assert jnp.allclose(x_out, x_ref, rtol=2e-2, atol=2e-2)
    assert jnp.allclose(adj_out, adj_ref, rtol=2e-2, atol=2e-2)

    # adj_type != 'D' path: no GraphAtten, no adjacency output from the kernel
    fwd_ng = jax.jit(functools.partial(
        encoder_layer_forward, d_n_head=d_n_head, d_k=d_k, d_v=d_v,
        g_n_head=g_n_head, max_diff_step=max_diff_step, adj_type="S"))
    x_out2, adj_out2 = fwd_ng(params, x, adj)
    jax.block_until_ready((x_out2, adj_out2))
    assert jnp.allclose(x_out2, x_ref, rtol=2e-2, atol=2e-2)
    assert jnp.allclose(adj_out2, adj, rtol=0, atol=0)

    print("KERNEL_OK")
</pallas_src>

<mosaic_0001>
module attributes {stable_mosaic.version = 11 : i64} {
  func.func @_encoder_layer_kernel(%arg0: i32, %arg1: memref<4x8x32xf32, #tpu.memory_space<vmem>>, %arg2: memref<4x8x8xf32, #tpu.memory_space<vmem>>, %arg3: memref<32x192xf32, #tpu.memory_space<vmem>>, %arg4: memref<1x192xf32, #tpu.memory_space<vmem>>, %arg5: memref<64x32xf32, #tpu.memory_space<vmem>>, %arg6: memref<1x32xf32, #tpu.memory_space<vmem>>, %arg7: memref<1x32xf32, #tpu.memory_space<vmem>>, %arg8: memref<1x32xf32, #tpu.memory_space<vmem>>, %arg9: memref<32x64xf32, #tpu.memory_space<vmem>>, %arg10: memref<1x64xf32, #tpu.memory_space<vmem>>, %arg11: memref<4xf32, #tpu.memory_space<smem>>, %arg12: memref<4x8x32xf32, #tpu.memory_space<vmem>>, %arg13: memref<4x8x8xf32, #tpu.memory_space<vmem>>, %arg14: memref<32x64xf32, #tpu.memory_space<vmem>>) attributes {dimension_semantics = [#tpu.dimension_semantics<parallel>], iteration_bounds = array<i64: 1>, scalar_prefetch = 0 : i64, scratch_operands = 1 : i64, tpu.core_type = #tpu.core_type<tc>, window_params = [{transform_indices = @transform_0, window_bounds = array<i64: 4, 8, 32>}, {transform_indices = @transform_1, window_bounds = array<i64: 4, 8, 8>}, {pipeline_mode = #tpu.pipeline_mode<synchronous>, transform_indices = @transform_2, window_bounds = array<i64: 32, 192>}, {pipeline_mode = #tpu.pipeline_mode<synchronous>, transform_indices = @transform_3, window_bounds = array<i64: 1, 192>}, {pipeline_mode = #tpu.pipeline_mode<synchronous>, transform_indices = @transform_4, window_bounds = array<i64: 64, 32>}, {pipeline_mode = #tpu.pipeline_mode<synchronous>, transform_indices = @transform_5, window_bounds = array<i64: 1, 32>}, {pipeline_mode = #tpu.pipeline_mode<synchronous>, transform_indices = @transform_6, window_bounds = array<i64: 1, 32>}, {pipeline_mode = #tpu.pipeline_mode<synchronous>, transform_indices = @transform_7, window_bounds = array<i64: 1, 32>}, {pipeline_mode = #tpu.pipeline_mode<synchronous>, transform_indices = @transform_8, window_bounds = array<i64: 32, 64>}, {pipeline_mode = #tpu.pipeline_mode<synchronous>, transform_indices = @transform_9, window_bounds = array<i64: 1, 64>}, {transform_indices = @transform_10, window_bounds = array<i64: 4>}, {transform_indices = @transform_11, window_bounds = array<i64: 4, 8, 32>}, {transform_indices = @transform_12, window_bounds = array<i64: 4, 8, 8>}]} {
    %c0 = arith.constant 0 : index
    %c0_0 = arith.constant 0 : index
    %c0_1 = arith.constant 0 : index
    %0 = vector.load %arg1[%c0, %c0_0, %c0_1] : memref<4x8x32xf32, #tpu.memory_space<vmem>>, vector<4x8x32xf32>
    %1 = vector.shape_cast %0 : vector<4x8x32xf32> to vector<32x32xf32>
    %c0_2 = arith.constant 0 : index
    %c0_3 = arith.constant 0 : index
    %2 = vector.load %arg3[%c0_2, %c0_3] : memref<32x192xf32, #tpu.memory_space<vmem>>, vector<32x192xf32>
    %cst = arith.constant dense<0.000000e+00> : vector<32x192xf32>
    %3 = tpu.matmul %1, %2, %cst {dimension_numbers = #tpu.dot_dimension_numbers<[1], [0], [0], [1], [0, 0, 1, 1], [], []>} : vector<32x32xf32>, vector<32x192xf32>, vector<32x192xf32> -> vector<32x192xf32>
    %c0_4 = arith.constant 0 : index
    %c0_5 = arith.constant 0 : index
    %4 = vector.load %arg4[%c0_4, %c0_5] : memref<1x192xf32, #tpu.memory_space<vmem>>, vector<1x192xf32>
    %5 = vector.broadcast %4 : vector<1x192xf32> to vector<32x192xf32>
    %6 = arith.addf %3, %5 : vector<32x192xf32>
    %7 = vector.extract_strided_slice %6 {offsets = [0, 0], sizes = [8, 16], strides = [1, 1]} : vector<32x192xf32> to vector<8x16xf32>
    %8 = vector.extract_strided_slice %6 {offsets = [0, 64], sizes = [8, 16], strides = [1, 1]} : vector<32x192xf32> to vector<8x16xf32>
    %9 = vector.extract_strided_slice %6 {offsets = [0, 128], sizes = [8, 16], strides = [1, 1]} : vector<32x192xf32> to vector<8x16xf32>
    %cst_6 = arith.constant dense<0.000000e+00> : vector<8x8xf32>
    %10 = tpu.matmul %7, %8, %cst_6 {dimension_numbers = #tpu.dot_dimension_numbers<[1], [1], [0], [0], [0, 0, 1, 0], [], []>} : vector<8x16xf32>, vector<8x16xf32>, vector<8x8xf32> -> vector<8x8xf32>
    %cst_7 = arith.constant 2.500000e-01 : f32
    %11 = vector.broadcast %cst_7 : f32 to vector<8x8xf32>
    %12 = arith.mulf %10, %11 : vector<8x8xf32>
    %cst_8 = arith.constant dense<0xFF800000> : vector<8xf32>
    %13 = vector.multi_reduction <maximumf>, %12, %cst_8 [1] : vector<8x8xf32> to vector<8xf32>
    %14 = vector.shape_cast %13 : vector<8xf32> to vector<8x1xf32>
    %15 = vector.broadcast %14 : vector<8x1xf32> to vector<8x8xf32>
    %16 = arith.subf %12, %15 : vector<8x8xf32>
    %17 = math.exp %16 : vector<8x8xf32>
    %cst_9 = arith.constant dense<0.000000e+00> : vector<8xf32>
    %18 = vector.multi_reduction <add>, %17, %cst_9 [1] : vector<8x8xf32> to vector<8xf32>
    %19 = vector.shape_cast %18 : vector<8xf32> to vector<8x1xf32>
    %20 = tpu.reciprocal %19 {approx = true} : vector<8x1xf32> -> vector<8x1xf32>
    %21 = vector.broadcast %20 : vector<8x1xf32> to vector<8x8xf32>
    %22 = arith.mulf %17, %21 : vector<8x8xf32>
    %cst_10 = arith.constant dense<0.000000e+00> : vector<8x16xf32>
    %23 = tpu.matmul %22, %9, %cst_10 {dimension_numbers = #tpu.dot_dimension_numbers<[1], [0], [0], [1], [0, 0, 1, 1], [], []>} : vector<8x8xf32>, vector<8x16xf32>, vector<8x16xf32> -> vector<8x16xf32>
    %c0_11 = arith.constant 0 : index
    %c0_12 = arith.constant 0 : index
    %24 = vector.load %arg14[%c0_11, %c0_12] : memref<32x64xf32, #tpu.memory_space<vmem>>, vector<8x16xf32>
    tpu.vector_store %arg14[%c0_11, %c0_12], %23 {strides = array<i32>} : memref<32x64xf32, #tpu.memory_space<vmem>>, vector<8x16xf32>,
    %25 = vector.extract_strided_slice %6 {offsets = [0, 16], sizes = [8, 16], strides = [1, 1]} : vector<32x192xf32> to vector<8x16xf32>
    %26 = vector.extract_strided_slice %6 {offsets = [0, 80], sizes = [8, 16], strides = [1, 1]} : vector<32x192xf32> to vector<8x16xf32>
    %27 = vector.extract_strided_slice %6 {offsets = [0, 144], sizes = [8, 16], strides = [1, 1]} : vector<32x192xf32> to vector<8x16xf32>
    %cst_13 = arith.constant dense<0.000000e+00> : vector<8x8xf32>
    %28 = tpu.matmul %25, %26, %cst_13 {dimension_numbers = #tpu.dot_dimension_numbers<[1], [1], [0], [0], [0, 0, 1, 0], [], []>} : vector<8x16xf32>, vector<8x16xf32>, vector<8x8xf32> -> vector<8x8xf32>
    %cst_14 = arith.constant 2.500000e-01 : f32
    %29 = vector.broadcast %cst_14 : f32 to vector<8x8xf32>
    %30 = arith.mulf %28, %29 : vector<8x8xf32>
    %cst_15 = arith.constant dense<0xFF800000> : vector<8xf32>
    %31 = vector.multi_reduction <maximumf>, %30, %cst_15 [1] : vector<8x8xf32> to vector<8xf32>
    %32 = vector.shape_cast %31 : vector<8xf32> to vector<8x1xf32>
    %33 = vector.broadcast %32 : vector<8x1xf32> to vector<8x8xf32>
    %34 = arith.subf %30, %33 : vector<8x8xf32>
    %35 = math.exp %34 : vector<8x8xf32>
    %cst_16 = arith.constant dense<0.000000e+00> : vector<8xf32>
    %36 = vector.multi_reduction <add>, %35, %cst_16 [1] : vector<8x8xf32> to vector<8xf32>
    %37 = vector.shape_cast %36 : vector<8xf32> to vector<8x1xf32>
    %38 = tpu.reciprocal %37 {approx = true} : vector<8x1xf32> -> vector<8x1xf32>
    %39 = vector.broadcast %38 : vector<8x1xf32> to vector<8x8xf32>
    %40 = arith.mulf %35, %39 : vector<8x8xf32>
    %cst_17 = arith.constant dense<0.000000e+00> : vector<8x16xf32>
    %41 = tpu.matmul %40, %27, %cst_17 {dimension_numbers = #tpu.dot_dimension_numbers<[1], [0], [0], [1], [0, 0, 1, 1], [], []>} : vector<8x8xf32>, vector<8x16xf32>, vector<8x16xf32> -> vector<8x16xf32>
    %c0_18 = arith.constant 0 : index
    %c16 = arith.constant 16 : index
    %42 = vector.load %arg14[%c0_18, %c16] : memref<32x64xf32, #tpu.memory_space<vmem>>, vector<8x16xf32>
    tpu.vector_store %arg14[%c0_18, %c16], %41 {strides = array<i32>} : memref<32x64xf32, #tpu.memory_space<vmem>>, vector<8x16xf32>,
    %43 = vector.extract_strided_slice %6 {offsets = [0, 32], sizes = [8, 16], strides = [1, 1]} : vector<32x192xf32> to vector<8x16xf32>
    %44 = vector.extract_strided_slice %6 {offsets = [0, 96], sizes = [8, 16], strides = [1, 1]} : vector<32x192xf32> to vector<8x16xf32>
    %45 = vector.extract_strided_slice %6 {offsets = [0, 160], sizes = [8, 16], strides = [1, 1]} : vector<32x192xf32> to vector<8x16xf32>
    %cst_19 = arith.constant dense<0.000000e+00> : vector<8x8xf32>
    %46 = tpu.matmul %43, %44, %cst_19 {dimension_numbers = #tpu.dot_dimension_numbers<[1], [1], [0], [0], [0, 0, 1, 0], [], []>} : vector<8x16xf32>, vector<8x16xf32>, vector<8x8xf32> -> vector<8x8xf32>
    %cst_20 = arith.constant 2.500000e-01 : f32
    %47 = vector.broadcast %cst_20 : f32 to vector<8x8xf32>
    %48 = arith.mulf %46, %47 : vector<8x8xf32>
    %cst_21 = arith.constant dense<0xFF800000> : vector<8xf32>
    %49 = vector.multi_reduction <maximumf>, %48, %cst_21 [1] : vector<8x8xf32> to vector<8xf32>
    %50 = vector.shape_cast %49 : vector<8xf32> to vector<8x1xf32>
    %51 = vector.broadcast %50 : vector<8x1xf32> to vector<8x8xf32>
    %52 = arith.subf %48, %51 : vector<8x8xf32>
    %53 = math.exp %52 : vector<8x8xf32>
    %cst_22 = arith.constant dense<0.000000e+00> : vector<8xf32>
    %54 = vector.multi_reduction <add>, %53, %cst_22 [1] : vector<8x8xf32> to vector<8xf32>
    %55 = vector.shape_cast %54 : vector<8xf32> to vector<8x1xf32>
    %56 = tpu.reciprocal %55 {approx = true} : vector<8x1xf32> -> vector<8x1xf32>
    %57 = vector.broadcast %56 : vector<8x1xf32> to vector<8x8xf32>
    %58 = arith.mulf %53, %57 : vector<8x8xf32>
    %cst_23 = arith.constant dense<0.000000e+00> : vector<8x16xf32>
    %59 = tpu.matmul %58, %45, %cst_23 {dimension_numbers = #tpu.dot_dimension_numbers<[1], [0], [0], [1], [0, 0, 1, 1], [], []>} : vector<8x8xf32>, vector<8x16xf32>, vector<8x16xf32> -> vector<8x16xf32>
    %c0_24 = arith.constant 0 : index
    %c32 = arith.constant 32 : index
    %60 = vector.load %arg14[%c0_24, %c32] : memref<32x64xf32, #tpu.memory_space<vmem>>, vector<8x16xf32>
    tpu.vector_store %arg14[%c0_24, %c32], %59 {strides = array<i32>} : memref<32x64xf32, #tpu.memory_space<vmem>>, vector<8x16xf32>,
    %61 = vector.extract_strided_slice %6 {offsets = [0, 48], sizes = [8, 16], strides = [1, 1]} : vector<32x192xf32> to vector<8x16xf32>
    %62 = vector.extract_strided_slice %6 {offsets = [0, 112], sizes = [8, 16], strides = [1, 1]} : vector<32x192xf32> to vector<8x16xf32>
    %63 = vector.extract_strided_slice %6 {offsets = [0, 176], sizes = [8, 16], strides = [1, 1]} : vector<32x192xf32> to vector<8x16xf32>
    %cst_25 = arith.constant dense<0.000000e+00> : vector<8x8xf32>
    %64 = tpu.matmul %61, %62, %cst_25 {dimension_numbers = #tpu.dot_dimension_numbers<[1], [1], [0], [0], [0, 0, 1, 0], [], []>} : vector<8x16xf32>, vector<8x16xf32>, vector<8x8xf32> -> vector<8x8xf32>
    %cst_26 = arith.constant 2.500000e-01 : f32
    %65 = vector.broadcast %cst_26 : f32 to vector<8x8xf32>
    %66 = arith.mulf %64, %65 : vector<8x8xf32>
    %cst_27 = arith.constant dense<0xFF800000> : vector<8xf32>
    %67 = vector.multi_reduction <maximumf>, %66, %cst_27 [1] : vector<8x8xf32> to vector<8xf32>
    %68 = vector.shape_cast %67 : vector<8xf32> to vector<8x1xf32>
    %69 = vector.broadcast %68 : vector<8x1xf32> to vector<8x8xf32>
    %70 = arith.subf %66, %69 : vector<8x8xf32>
    %71 = math.exp %70 : vector<8x8xf32>
    %cst_28 = arith.constant dense<0.000000e+00> : vector<8xf32>
    %72 = vector.multi_reduction <add>, %71, %cst_28 [1] : vector<8x8xf32> to vector<8xf32>
    %73 = vector.shape_cast %72 : vector<8xf32> to vector<8x1xf32>
    %74 = tpu.reciprocal %73 {approx = true} : vector<8x1xf32> -> vector<8x1xf32>
    %75 = vector.broadcast %74 : vector<8x1xf32> to vector<8x8xf32>
    %76 = arith.mulf %71, %75 : vector<8x8xf32>
    %cst_29 = arith.constant dense<0.000000e+00> : vector<8x16xf32>
    %77 = tpu.matmul %76, %63, %cst_29 {dimension_numbers = #tpu.dot_dimension_numbers<[1], [0], [0], [1], [0, 0, 1, 1], [], []>} : vector<8x8xf32>, vector<8x16xf32>, vector<8x16xf32> -> vector<8x16xf32>
    %c0_30 = arith.constant 0 : index
    %c48 = arith.constant 48 : index
    %78 = vector.load %arg14[%c0_30, %c48] : memref<32x64xf32, #tpu.memory_space<vmem>>, vector<8x16xf32>
    tpu.vector_store %arg14[%c0_30, %c48], %77 {strides = array<i32>} : memref<32x64xf32, #tpu.memory_space<vmem>>, vector<8x16xf32>,
    %79 = vector.extract_strided_slice %6 {offsets = [8, 0], sizes = [8, 16], strides = [1, 1]} : vector<32x192xf32> to vector<8x16xf32>
    %80 = vector.extract_strided_slice %6 {offsets = [8, 64], sizes = [8, 16], strides = [1, 1]} : vector<32x192xf32> to vector<8x16xf32>
    %81 = vector.extract_strided_slice %6 {offsets = [8, 128], sizes = [8, 16], strides = [1, 1]} : vector<32x192xf32> to vector<8x16xf32>
    %cst_31 = arith.constant dense<0.000000e+00> : vector<8x8xf32>
    %82 = tpu.matmul %79, %80, %cst_31 {dimension_numbers = #tpu.dot_dimension_numbers<[1], [1], [0], [0], [0, 0, 1, 0], [], []>} : vector<8x16xf32>, vector<8x16xf32>, vector<8x8xf32> -> vector<8x8xf32>
    %cst_32 = arith.constant 2.500000e-01 : f32
    %83 = vector.broadcast %cst_32 : f32 to vector<8x8xf32>
    %84 = arith.mulf %82, %83 : vector<8x8xf32>
    %cst_33 = arith.constant dense<0xFF800000> : vector<8xf32>
    %85 = vector.multi_reduction <maximumf>, %84, %cst_33 [1] : vector<8x8xf32> to vector<8xf32>
    %86 = vector.shape_cast %85 : vector<8xf32> to vector<8x1xf32>
    %87 = vector.broadcast %86 : vector<8x1xf32> to vector<8x8xf32>
    %88 = arith.subf %84, %87 : vector<8x8xf32>
    %89 = math.exp %88 : vector<8x8xf32>
    %cst_34 = arith.constant dense<0.000000e+00> : vector<8xf32>
    %90 = vector.multi_reduction <add>, %89, %cst_34 [1] : vector<8x8xf32> to vector<8xf32>
    %91 = vector.shape_cast %90 : vector<8xf32> to vector<8x1xf32>
    %92 = tpu.reciprocal %91 {approx = true} : vector<8x1xf32> -> vector<8x1xf32>
    %93 = vector.broadcast %92 : vector<8x1xf32> to vector<8x8xf32>
    %94 = arith.mulf %89, %93 : vector<8x8xf32>
    %cst_35 = arith.constant dense<0.000000e+00> : vector<8x16xf32>
    %95 = tpu.matmul %94, %81, %cst_35 {dimension_numbers = #tpu.dot_dimension_numbers<[1], [0], [0], [1], [0, 0, 1, 1], [], []>} : vector<8x8xf32>, vector<8x16xf32>, vector<8x16xf32> -> vector<8x16xf32>
    %c8 = arith.constant 8 : index
    %c0_36 = arith.constant 0 : index
    %96 = vector.load %arg14[%c8, %c0_36] : memref<32x64xf32, #tpu.memory_space<vmem>>, vector<8x16xf32>
    tpu.vector_store %arg14[%c8, %c0_36], %95 {strides = array<i32>} : memref<32x64xf32, #tpu.memory_space<vmem>>, vector<8x16xf32>,
    %97 = vector.extract_strided_slice %6 {offsets = [8, 16], sizes = [8, 16], strides = [1, 1]} : vector<32x192xf32> to vector<8x16xf32>
    %98 = vector.extract_strided_slice %6 {offsets = [8, 80], sizes = [8, 16], strides = [1, 1]} : vector<32x192xf32> to vector<8x16xf32>
    %99 = vector.extract_strided_slice %6 {offsets = [8, 144], sizes = [8, 16], strides = [1, 1]} : vector<32x192xf32> to vector<8x16xf32>
    %cst_37 = arith.constant dense<0.000000e+00> : vector<8x8xf32>
    %100 = tpu.matmul %97, %98, %cst_37 {dimension_numbers = #tpu.dot_dimension_numbers<[1], [1], [0], [0], [0, 0, 1, 0], [], []>} : vector<8x16xf32>, vector<8x16xf32>, vector<8x8xf32> -> vector<8x8xf32>
    %cst_38 = arith.constant 2.500000e-01 : f32
    %101 = vector.broadcast %cst_38 : f32 to vector<8x8xf32>
    %102 = arith.mulf %100, %101 : vector<8x8xf32>
    %cst_39 = arith.constant dense<0xFF800000> : vector<8xf32>
    %103 = vector.multi_reduction <maximumf>, %102, %cst_39 [1] : vector<8x8xf32> to vector<8xf32>
    %104 = vector.shape_cast %103 : vector<8xf32> to vector<8x1xf32>
    %105 = vector.broadcast %104 : vector<8x1xf32> to vector<8x8xf32>
    %106 = arith.subf %102, %105 : vector<8x8xf32>
    %107 = math.exp %106 : vector<8x8xf32>
    %cst_40 = arith.constant dense<0.000000e+00> : vector<8xf32>
    %108 = vector.multi_reduction <add>, %107, %cst_40 [1] : vector<8x8xf32> to vector<8xf32>
    %109 = vector.shape_cast %108 : vector<8xf32> to vector<8x1xf32>
    %110 = tpu.reciprocal %109 {approx = true} : vector<8x1xf32> -> vector<8x1xf32>
    %111 = vector.broadcast %110 : vector<8x1xf32> to vector<8x8xf32>
    %112 = arith.mulf %107, %111 : vector<8x8xf32>
    %cst_41 = arith.constant dense<0.000000e+00> : vector<8x16xf32>
    %113 = tpu.matmul %112, %99, %cst_41 {dimension_numbers = #tpu.dot_dimension_numbers<[1], [0], [0], [1], [0, 0, 1, 1], [], []>} : vector<8x8xf32>, vector<8x16xf32>, vector<8x16xf32> -> vector<8x16xf32>
    %c8_42 = arith.constant 8 : index
    %c16_43 = arith.constant 16 : index
    %114 = vector.load %arg14[%c8_42, %c16_43] : memref<32x64xf32, #tpu.memory_space<vmem>>, vector<8x16xf32>
    tpu.vector_store %arg14[%c8_42, %c16_43], %113 {strides = array<i32>} : memref<32x64xf32, #tpu.memory_space<vmem>>, vector<8x16xf32>,
    %115 = vector.extract_strided_slice %6 {offsets = [8, 32], sizes = [8, 16], strides = [1, 1]} : vector<32x192xf32> to vector<8x16xf32>
    %116 = vector.extract_strided_slice %6 {offsets = [8, 96], sizes = [8, 16], strides = [1, 1]} : vector<32x192xf32> to vector<8x16xf32>
    %117 = vector.extract_strided_slice %6 {offsets = [8, 160], sizes = [8, 16], strides = [1, 1]} : vector<32x192xf32> to vector<8x16xf32>
    %cst_44 = arith.constant dense<0.000000e+00> : vector<8x8xf32>
    %118 = tpu.matmul %115, %116, %cst_44 {dimension_numbers = #tpu.dot_dimension_numbers<[1], [1], [0], [0], [0, 0, 1, 0], [], []>} : vector<8x16xf32>, vector<8x16xf32>, vector<8x8xf32> -> vector<8x8xf32>
    %cst_45 = arith.constant 2.500000e-01 : f32
    %119 = vector.broadcast %cst_45 : f32 to vector<8x8xf32>
    %120 = arith.mulf %118, %119 : vector<8x8xf32>
    %cst_46 = arith.constant dense<0xFF800000> : vector<8xf32>
    %121 = vector.multi_reduction <maximumf>, %120, %cst_46 [1] : vector<8x8xf32> to vector<8xf32>
    %122 = vector.shape_cast %121 : vector<8xf32> to vector<8x1xf32>
    %123 = vector.broadcast %122 : vector<8x1xf32> to vector<8x8xf32>
    %124 = arith.subf %120, %123 : vector<8x8xf32>
    %125 = math.exp %124 : vector<8x8xf32>
    %cst_47 = arith.constant dense<0.000000e+00> : vector<8xf32>
    %126 = vector.multi_reduction <add>, %125, %cst_47 [1] : vector<8x8xf32> to vector<8xf32>
    %127 = vector.shape_cast %126 : vector<8xf32> to vector<8x1xf32>
    %128 = tpu.reciprocal %127 {approx = true} : vector<8x1xf32> -> vector<8x1xf32>
    %129 = vector.broadcast %128 : vector<8x1xf32> to vector<8x8xf32>
    %130 = arith.mulf %125, %129 : vector<8x8xf32>
    %cst_48 = arith.constant dense<0.000000e+00> : vector<8x16xf32>
    %131 = tpu.matmul %130, %117, %cst_48 {dimension_numbers = #tpu.dot_dimension_numbers<[1], [0], [0], [1], [0, 0, 1, 1], [], []>} : vector<8x8xf32>, vector<8x16xf32>, vector<8x16xf32> -> vector<8x16xf32>
    %c8_49 = arith.constant 8 : index
    %c32_50 = arith.constant 32 : index
    %132 = vector.load %arg14[%c8_49, %c32_50] : memref<32x64xf32, #tpu.memory_space<vmem>>, vector<8x16xf32>
    tpu.vector_store %arg14[%c8_49, %c32_50], %131 {strides = array<i32>} : memref<32x64xf32, #tpu.memory_space<vmem>>, vector<8x16xf32>,
    %133 = vector.extract_strided_slice %6 {offsets = [8, 48], sizes = [8, 16], strides = [1, 1]} : vector<32x192xf32> to vector<8x16xf32>
    %134 = vector.extract_strided_slice %6 {offsets = [8, 112], sizes = [8, 16], strides = [1, 1]} : vector<32x192xf32> to vector<8x16xf32>
    %135 = vector.extract_strided_slice %6 {offsets = [8, 176], sizes = [8, 16], strides = [1, 1]} : vector<32x192xf32> to vector<8x16xf32>
    %cst_51 = arith.constant dense<0.000000e+00> : vector<8x8xf32>
    %136 = tpu.matmul %133, %134, %cst_51 {dimension_numbers = #tpu.dot_dimension_numbers<[1], [1], [0], [0], [0, 0, 1, 0], [], []>} : vector<8x16xf32>, vector<8x16xf32>, vector<8x8xf32> -> vector<8x8xf32>
    %cst_52 = arith.constant 2.500000e-01 : f32
    %137 = vector.broadcast %cst_52 : f32 to vector<8x8xf32>
    %138 = arith.mulf %136, %137 : vector<8x8xf32>
    %cst_53 = arith.constant dense<0xFF800000> : vector<8xf32>
    %139 = vector.multi_reduction <maximumf>, %138, %cst_53 [1] : vector<8x8xf32> to vector<8xf32>
    %140 = vector.shape_cast %139 : vector<8xf32> to vector<8x1xf32>
    %141 = vector.broadcast %140 : vector<8x1xf32> to vector<8x8xf32>
    %142 = arith.subf %138, %141 : vector<8x8xf32>
    %143 = math.exp %142 : vector<8x8xf32>
    %cst_54 = arith.constant dense<0.000000e+00> : vector<8xf32>
    %144 = vector.multi_reduction <add>, %143, %cst_54 [1] : vector<8x8xf32> to vector<8xf32>
    %145 = vector.shape_cast %144 : vector<8xf32> to vector<8x1xf32>
    %146 = tpu.reciprocal %145 {approx = true} : vector<8x1xf32> -> vector<8x1xf32>
    %147 = vector.broadcast %146 : vector<8x1xf32> to vector<8x8xf32>
    %148 = arith.mulf %143, %147 : vector<8x8xf32>
    %cst_55 = arith.constant dense<0.000000e+00> : vector<8x16xf32>
    %149 = tpu.matmul %148, %135, %cst_55 {dimension_numbers = #tpu.dot_dimension_numbers<[1], [0], [0], [1], [0, 0, 1, 1], [], []>} : vector<8x8xf32>, vector<8x16xf32>, vector<8x16xf32> -> vector<8x16xf32>
    %c8_56 = arith.constant 8 : index
    %c48_57 = arith.constant 48 : index
    %150 = vector.load %arg14[%c8_56, %c48_57] : memref<32x64xf32, #tpu.memory_space<vmem>>, vector<8x16xf32>
    tpu.vector_store %arg14[%c8_56, %c48_57], %149 {strides = array<i32>} : memref<32x64xf32, #tpu.memory_space<vmem>>, vector<8x16xf32>,
    %151 = vector.extract_strided_slice %6 {offsets = [16, 0], sizes = [8, 16], strides = [1, 1]} : vector<32x192xf32> to vector<8x16xf32>
    %152 = vector.extract_strided_slice %6 {offsets = [16, 64], sizes = [8, 16], strides = [1, 1]} : vector<32x192xf32> to vector<8x16xf32>
    %153 = vector.extract_strided_slice %6 {offsets = [16, 128], sizes = [8, 16], strides = [1, 1]} : vector<32x192xf32> to vector<8x16xf32>
    %cst_58 = arith.constant dense<0.000000e+00> : vector<8x8xf32>
    %154 = tpu.matmul %151, %152, %cst_58 {dimension_numbers = #tpu.dot_dimension_numbers<[1], [1], [0], [0], [0, 0, 1, 0], [], []>} : vector<8x16xf32>, vector<8x16xf32>, vector<8x8xf32> -> vector<8x8xf32>
    %cst_59 = arith.constant 2.500000e-01 : f32
    %155 = vector.broadcast %cst_59 : f32 to vector<8x8xf32>
    %156 = arith.mulf %154, %155 : vector<8x8xf32>
    %cst_60 = arith.constant dense<0xFF800000> : vector<8xf32>
    %157 = vector.multi_reduction <maximumf>, %156, %cst_60 [1] : vector<8x8xf32> to vector<8xf32>
    %158 = vector.shape_cast %157 : vector<8xf32> to vector<8x1xf32>
    %159 = vector.broadcast %158 : vector<8x1xf32> to vector<8x8xf32>
    %160 = arith.subf %156, %159 : vector<8x8xf32>
    %161 = math.exp %160 : vector<8x8xf32>
    %cst_61 = arith.constant dense<0.000000e+00> : vector<8xf32>
    %162 = vector.multi_reduction <add>, %161, %cst_61 [1] : vector<8x8xf32> to vector<8xf32>
    %163 = vector.shape_cast %162 : vector<8xf32> to vector<8x1xf32>
    %164 = tpu.reciprocal %163 {approx = true} : vector<8x1xf32> -> vector<8x1xf32>
    %165 = vector.broadcast %164 : vector<8x1xf32> to vector<8x8xf32>
    %166 = arith.mulf %161, %165 : vector<8x8xf32>
    %cst_62 = arith.constant dense<0.000000e+00> : vector<8x16xf32>
    %167 = tpu.matmul %166, %153, %cst_62 {dimension_numbers = #tpu.dot_dimension_numbers<[1], [0], [0], [1], [0, 0, 1, 1], [], []>} : vector<8x8xf32>, vector<8x16xf32>, vector<8x16xf32> -> vector<8x16xf32>
    %c16_63 = arith.constant 16 : index
    %c0_64 = arith.constant 0 : index
    %168 = vector.load %arg14[%c16_63, %c0_64] : memref<32x64xf32, #tpu.memory_space<vmem>>, vector<8x16xf32>
    tpu.vector_store %arg14[%c16_63, %c0_64], %167 {strides = array<i32>} : memref<32x64xf32, #tpu.memory_space<vmem>>, vector<8x16xf32>,
    %169 = vector.extract_strided_slice %6 {offsets = [16, 16], sizes = [8, 16], strides = [1, 1]} : vector<32x192xf32> to vector<8x16xf32>
    %170 = vector.extract_strided_slice %6 {offsets = [16, 80], sizes = [8, 16], strides = [1, 1]} : vector<32x192xf32> to vector<8x16xf32>
    %171 = vector.extract_strided_slice %6 {offsets = [16, 144], sizes = [8, 16], strides = [1, 1]} : vector<32x192xf32> to vector<8x16xf32>
    %cst_65 = arith.constant dense<0.000000e+00> : vector<8x8xf32>
    %172 = tpu.matmul %169, %170, %cst_65 {dimension_numbers = #tpu.dot_dimension_numbers<[1], [1], [0], [0], [0, 0, 1, 0], [], []>} : vector<8x16xf32>, vector<8x16xf32>, vector<8x8xf32> -> vector<8x8xf32>
    %cst_66 = arith.constant 2.500000e-01 : f32
    %173 = vector.broadcast %cst_66 : f32 to vector<8x8xf32>
    %174 = arith.mulf %172, %173 : vector<8x8xf32>
    %cst_67 = arith.constant dense<0xFF800000> : vector<8xf32>
    %175 = vector.multi_reduction <maximumf>, %174, %cst_67 [1] : vector<8x8xf32> to vector<8xf32>
    %176 = vector.shape_cast %175 : vector<8xf32> to vector<8x1xf32>
    %177 = vector.broadcast %176 : vector<8x1xf32> to vector<8x8xf32>
    %178 = arith.subf %174, %177 : vector<8x8xf32>
    %179 = math.exp %178 : vector<8x8xf32>
    %cst_68 = arith.constant dense<0.000000e+00> : vector<8xf32>
    %180 = vector.multi_reduction <add>, %179, %cst_68 [1] : vector<8x8xf32> to vector<8xf32>
    %181 = vector.shape_cast %180 : vector<8xf32> to vector<8x1xf32>
    %182 = tpu.reciprocal %181 {approx = true} : vector<8x1xf32> -> vector<8x1xf32>
    %183 = vector.broadcast %182 : vector<8x1xf32> to vector<8x8xf32>
    %184 = arith.mulf %179, %183 : vector<8x8xf32>
    %cst_69 = arith.constant dense<0.000000e+00> : vector<8x16xf32>
    %185 = tpu.matmul %184, %171, %cst_69 {dimension_numbers = #tpu.dot_dimension_numbers<[1], [0], [0], [1], [0, 0, 1, 1], [], []>} : vector<8x8xf32>, vector<8x16xf32>, vector<8x16xf32> -> vector<8x16xf32>
    %c16_70 = arith.constant 16 : index
    %c16_71 = arith.constant 16 : index
    %186 = vector.load %arg14[%c16_70, %c16_71] : memref<32x64xf32, #tpu.memory_space<vmem>>, vector<8x16xf32>
    tpu.vector_store %arg14[%c16_70, %c16_71], %185 {strides = array<i32>} : memref<32x64xf32, #tpu.memory_space<vmem>>, vector<8x16xf32>,
    %187 = vector.extract_strided_slice %6 {offsets = [16, 32], sizes = [8, 16], strides = [1, 1]} : vector<32x192xf32> to vector<8x16xf32>
    %188 = vector.extract_strided_slice %6 {offsets = [16, 96], sizes = [8, 16], strides = [1, 1]} : vector<32x192xf32> to vector<8x16xf32>
    %189 = vector.extract_strided_slice %6 {offsets = [16, 160], sizes = [8, 16], strides = [1, 1]} : vector<32x192xf32> to vector<8x16xf32>
    %cst_72 = arith.constant dense<0.000000e+00> : vector<8x8xf32>
    %190 = tpu.matmul %187, %188, %cst_72 {dimension_numbers = #tpu.dot_dimension_numbers<[1], [1], [0], [0], [0, 0, 1, 0], [], []>} : vector<8x16xf32>, vector<8x16xf32>, vector<8x8xf32> -> vector<8x8xf32>
    %cst_73 = arith.constant 2.500000e-01 : f32
    %191 = vector.broadcast %cst_73 : f32 to vector<8x8xf32>
    %192 = arith.mulf %190, %191 : vector<8x8xf32>
    %cst_74 = arith.constant dense<0xFF800000> : vector<8xf32>
    %193 = vector.multi_reduction <maximumf>, %192, %cst_74 [1] : vector<8x8xf32> to vector<8xf32>
    %194 = vector.shape_cast %193 : vector<8xf32> to vector<8x1xf32>
    %195 = vector.broadcast %194 : vector<8x1xf32> to vector<8x8xf32>
    %196 = arith.subf %192, %195 : vector<8x8xf32>
    %197 = math.exp %196 : vector<8x8xf32>
    %cst_75 = arith.constant dense<0.000000e+00> : vector<8xf32>
    %198 = vector.multi_reduction <add>, %197, %cst_75 [1] : vector<8x8xf32> to vector<8xf32>
    %199 = vector.shape_cast %198 : vector<8xf32> to vector<8x1xf32>
    %200 = tpu.reciprocal %199 {approx = true} : vector<8x1xf32> -> vector<8x1xf32>
    %201 = vector.broadcast %200 : vector<8x1xf32> to vector<8x8xf32>
    %202 = arith.mulf %197, %201 : vector<8x8xf32>
    %cst_76 = arith.constant dense<0.000000e+00> : vector<8x16xf32>
    %203 = tpu.matmul %202, %189, %cst_76 {dimension_numbers = #tpu.dot_dimension_numbers<[1], [0], [0], [1], [0, 0, 1, 1], [], []>} : vector<8x8xf32>, vector<8x16xf32>, vector<8x16xf32> -> vector<8x16xf32>
    %c16_77 = arith.constant 16 : index
    %c32_78 = arith.constant 32 : index
    %204 = vector.load %arg14[%c16_77, %c32_78] : memref<32x64xf32, #tpu.memory_space<vmem>>, vector<8x16xf32>
    tpu.vector_store %arg14[%c16_77, %c32_78], %203 {strides = array<i32>} : memref<32x64xf32, #tpu.memory_space<vmem>>, vector<8x16xf32>,
    %205 = vector.extract_strided_slice %6 {offsets = [16, 48], sizes = [8, 16], strides = [1, 1]} : vector<32x192xf32> to vector<8x16xf32>
    %206 = vector.extract_strided_slice %6 {offsets = [16, 112], sizes = [8, 16], strides = [1, 1]} : vector<32x192xf32> to vector<8x16xf32>
    %207 = vector.extract_strided_slice %6 {offsets = [16, 176], sizes = [8, 16], strides = [1, 1]} : vector<32x192xf32> to vector<8x16xf32>
    %cst_79 = arith.constant dense<0.000000e+00> : vector<8x8xf32>
    %208 = tpu.matmul %205, %206, %cst_79 {dimension_numbers = #tpu.dot_dimension_numbers<[1], [1], [0], [0], [0, 0, 1, 0], [], []>} : vector<8x16xf32>, vector<8x16xf32>, vector<8x8xf32> -> vector<8x8xf32>
    %cst_80 = arith.constant 2.500000e-01 : f32
    %209 = vector.broadcast %cst_80 : f32 to vector<8x8xf32>
    %210 = arith.mulf %208, %209 : vector<8x8xf32>
    %cst_81 = arith.constant dense<0xFF800000> : vector<8xf32>
    %211 = vector.multi_reduction <maximumf>, %210, %cst_81 [1] : vector<8x8xf32> to vector<8xf32>
    %212 = vector.shape_cast %211 : vector<8xf32> to vector<8x1xf32>
    %213 = vector.broadcast %212 : vector<8x1xf32> to vector<8x8xf32>
    %214 = arith.subf %210, %213 : vector<8x8xf32>
    %215 = math.exp %214 : vector<8x8xf32>
    %cst_82 = arith.constant dense<0.000000e+00> : vector<8xf32>
    %216 = vector.multi_reduction <add>, %215, %cst_82 [1] : vector<8x8xf32> to vector<8xf32>
    %217 = vector.shape_cast %216 : vector<8xf32> to vector<8x1xf32>
    %218 = tpu.reciprocal %217 {approx = true} : vector<8x1xf32> -> vector<8x1xf32>
    %219 = vector.broadcast %218 : vector<8x1xf32> to vector<8x8xf32>
    %220 = arith.mulf %215, %219 : vector<8x8xf32>
    %cst_83 = arith.constant dense<0.000000e+00> : vector<8x16xf32>
    %221 = tpu.matmul %220, %207, %cst_83 {dimension_numbers = #tpu.dot_dimension_numbers<[1], [0], [0], [1], [0, 0, 1, 1], [], []>} : vector<8x8xf32>, vector<8x16xf32>, vector<8x16xf32> -> vector<8x16xf32>
    %c16_84 = arith.constant 16 : index
    %c48_85 = arith.constant 48 : index
    %222 = vector.load %arg14[%c16_84, %c48_85] : memref<32x64xf32, #tpu.memory_space<vmem>>, vector<8x16xf32>
    tpu.vector_store %arg14[%c16_84, %c48_85], %221 {strides = array<i32>} : memref<32x64xf32, #tpu.memory_space<vmem>>, vector<8x16xf32>,
    %223 = vector.extract_strided_slice %6 {offsets = [24, 0], sizes = [8, 16], strides = [1, 1]} : vector<32x192xf32> to vector<8x16xf32>
    %224 = vector.extract_strided_slice %6 {offsets = [24, 64], sizes = [8, 16], strides = [1, 1]} : vector<32x192xf32> to vector<8x16xf32>
    %225 = vector.extract_strided_slice %6 {offsets = [24, 128], sizes = [8, 16], strides = [1, 1]} : vector<32x192xf32> to vector<8x16xf32>
    %cst_86 = arith.constant dense<0.000000e+00> : vector<8x8xf32>
    %226 = tpu.matmul %223, %224, %cst_86 {dimension_numbers = #tpu.dot_dimension_numbers<[1], [1], [0], [0], [0, 0, 1, 0], [], []>} : vector<8x16xf32>, vector<8x16xf32>, vector<8x8xf32> -> vector<8x8xf32>
    %cst_87 = arith.constant 2.500000e-01 : f32
    %227 = vector.broadcast %cst_87 : f32 to vector<8x8xf32>
    %228 = arith.mulf %226, %227 : vector<8x8xf32>
    %cst_88 = arith.constant dense<0xFF800000> : vector<8xf32>
    %229 = vector.multi_reduction <maximumf>, %228, %cst_88 [1] : vector<8x8xf32> to vector<8xf32>
    %230 = vector.shape_cast %229 : vector<8xf32> to vector<8x1xf32>
    %231 = vector.broadcast %230 : vector<8x1xf32> to vector<8x8xf32>
    %232 = arith.subf %228, %231 : vector<8x8xf32>
    %233 = math.exp %232 : vector<8x8xf32>
    %cst_89 = arith.constant dense<0.000000e+00> : vector<8xf32>
    %234 = vector.multi_reduction <add>, %233, %cst_89 [1] : vector<8x8xf32> to vector<8xf32>
    %235 = vector.shape_cast %234 : vector<8xf32> to vector<8x1xf32>
    %236 = tpu.reciprocal %235 {approx = true} : vector<8x1xf32> -> vector<8x1xf32>
    %237 = vector.broadcast %236 : vector<8x1xf32> to vector<8x8xf32>
    %238 = arith.mulf %233, %237 : vector<8x8xf32>
    %cst_90 = arith.constant dense<0.000000e+00> : vector<8x16xf32>
    %239 = tpu.matmul %238, %225, %cst_90 {dimension_numbers = #tpu.dot_dimension_numbers<[1], [0], [0], [1], [0, 0, 1, 1], [], []>} : vector<8x8xf32>, vector<8x16xf32>, vector<8x16xf32> -> vector<8x16xf32>
    %c24 = arith.constant 24 : index
    %c0_91 = arith.constant 0 : index
    %240 = vector.load %arg14[%c24, %c0_91] : memref<32x64xf32, #tpu.memory_space<vmem>>, vector<8x16xf32>
    tpu.vector_store %arg14[%c24, %c0_91], %239 {strides = array<i32>} : memref<32x64xf32, #tpu.memory_space<vmem>>, vector<8x16xf32>,
    %241 = vector.extract_strided_slice %6 {offsets = [24, 16], sizes = [8, 16], strides = [1, 1]} : vector<32x192xf32> to vector<8x16xf32>
    %242 = vector.extract_strided_slice %6 {offsets = [24, 80], sizes = [8, 16], strides = [1, 1]} : vector<32x192xf32> to vector<8x16xf32>
    %243 = vector.extract_strided_slice %6 {offsets = [24, 144], sizes = [8, 16], strides = [1, 1]} : vector<32x192xf32> to vector<8x16xf32>
    %cst_92 = arith.constant dense<0.000000e+00> : vector<8x8xf32>
    %244 = tpu.matmul %241, %242, %cst_92 {dimension_numbers = #tpu.dot_dimension_numbers<[1], [1], [0], [0], [0, 0, 1, 0], [], []>} : vector<8x16xf32>, vector<8x16xf32>, vector<8x8xf32> -> vector<8x8xf32>
    %cst_93 = arith.constant 2.500000e-01 : f32
    %245 = vector.broadcast %cst_93 : f32 to vector<8x8xf32>
    %246 = arith.mulf %244, %245 : vector<8x8xf32>
    %cst_94 = arith.constant dense<0xFF800000> : vector<8xf32>
    %247 = vector.multi_reduction <maximumf>, %246, %cst_94 [1] : vector<8x8xf32> to vector<8xf32>
    %248 = vector.shape_cast %247 : vector<8xf32> to vector<8x1xf32>
    %249 = vector.broadcast %248 : vector<8x1xf32> to vector<8x8xf32>
    %250 = arith.subf %246, %249 : vector<8x8xf32>
    %251 = math.exp %250 : vector<8x8xf32>
    %cst_95 = arith.constant dense<0.000000e+00> : vector<8xf32>
    %252 = vector.multi_reduction <add>, %251, %cst_95 [1] : vector<8x8xf32> to vector<8xf32>
    %253 = vector.shape_cast %252 : vector<8xf32> to vector<8x1xf32>
    %254 = tpu.reciprocal %253 {approx = true} : vector<8x1xf32> -> vector<8x1xf32>
    %255 = vector.broadcast %254 : vector<8x1xf32> to vector<8x8xf32>
    %256 = arith.mulf %251, %255 : vector<8x8xf32>
    %cst_96 = arith.constant dense<0.000000e+00> : vector<8x16xf32>
    %257 = tpu.matmul %256, %243, %cst_96 {dimension_numbers = #tpu.dot_dimension_numbers<[1], [0], [0], [1], [0, 0, 1, 1], [], []>} : vector<8x8xf32>, vector<8x16xf32>, vector<8x16xf32> -> vector<8x16xf32>
    %c24_97 = arith.constant 24 : index
    %c16_98 = arith.constant 16 : index
    %258 = vector.load %arg14[%c24_97, %c16_98] : memref<32x64xf32, #tpu.memory_space<vmem>>, vector<8x16xf32>
    tpu.vector_store %arg14[%c24_97, %c16_98], %257 {strides = array<i32>} : memref<32x64xf32, #tpu.memory_space<vmem>>, vector<8x16xf32>,
    %259 = vector.extract_strided_slice %6 {offsets = [24, 32], sizes = [8, 16], strides = [1, 1]} : vector<32x192xf32> to vector<8x16xf32>
    %260 = vector.extract_strided_slice %6 {offsets = [24, 96], sizes = [8, 16], strides = [1, 1]} : vector<32x192xf32> to vector<8x16xf32>
    %261 = vector.extract_strided_slice %6 {offsets = [24, 160], sizes = [8, 16], strides = [1, 1]} : vector<32x192xf32> to vector<8x16xf32>
    %cst_99 = arith.constant dense<0.000000e+00> : vector<8x8xf32>
    %262 = tpu.matmul %259, %260, %cst_99 {dimension_numbers = #tpu.dot_dimension_numbers<[1], [1], [0], [0], [0, 0, 1, 0], [], []>} : vector<8x16xf32>, vector<8x16xf32>, vector<8x8xf32> -> vector<8x8xf32>
    %cst_100 = arith.constant 2.500000e-01 : f32
    %263 = vector.broadcast %cst_100 : f32 to vector<8x8xf32>
    %264 = arith.mulf %262, %263 : vector<8x8xf32>
    %cst_101 = arith.constant dense<0xFF800000> : vector<8xf32>
    %265 = vector.multi_reduction <maximumf>, %264, %cst_101 [1] : vector<8x8xf32> to vector<8xf32>
    %266 = vector.shape_cast %265 : vector<8xf32> to vector<8x1xf32>
    %267 = vector.broadcast %266 : vector<8x1xf32> to vector<8x8xf32>
    %268 = arith.subf %264, %267 : vector<8x8xf32>
    %269 = math.exp %268 : vector<8x8xf32>
    %cst_102 = arith.constant dense<0.000000e+00> : vector<8xf32>
    %270 = vector.multi_reduction <add>, %269, %cst_102 [1] : vector<8x8xf32> to vector<8xf32>
    %271 = vector.shape_cast %270 : vector<8xf32> to vector<8x1xf32>
    %272 = tpu.reciprocal %271 {approx = true} : vector<8x1xf32> -> vector<8x1xf32>
    %273 = vector.broadcast %272 : vector<8x1xf32> to vector<8x8xf32>
    %274 = arith.mulf %269, %273 : vector<8x8xf32>
    %cst_103 = arith.constant dense<0.000000e+00> : vector<8x16xf32>
    %275 = tpu.matmul %274, %261, %cst_103 {dimension_numbers = #tpu.dot_dimension_numbers<[1], [0], [0], [1], [0, 0, 1, 1], [], []>} : vector<8x8xf32>, vector<8x16xf32>, vector<8x16xf32> -> vector<8x16xf32>
    %c24_104 = arith.constant 24 : index
    %c32_105 = arith.constant 32 : index
    %276 = vector.load %arg14[%c24_104, %c32_105] : memref<32x64xf32, #tpu.memory_space<vmem>>, vector<8x16xf32>
    tpu.vector_store %arg14[%c24_104, %c32_105], %275 {strides = array<i32>} : memref<32x64xf32, #tpu.memory_space<vmem>>, vector<8x16xf32>,
    %277 = vector.extract_strided_slice %6 {offsets = [24, 48], sizes = [8, 16], strides = [1, 1]} : vector<32x192xf32> to vector<8x16xf32>
    %278 = vector.extract_strided_slice %6 {offsets = [24, 112], sizes = [8, 16], strides = [1, 1]} : vector<32x192xf32> to vector<8x16xf32>
    %279 = vector.extract_strided_slice %6 {offsets = [24, 176], sizes = [8, 16], strides = [1, 1]} : vector<32x192xf32> to vector<8x16xf32>
    %cst_106 = arith.constant dense<0.000000e+00> : vector<8x8xf32>
    %280 = tpu.matmul %277, %278, %cst_106 {dimension_numbers = #tpu.dot_dimension_numbers<[1], [1], [0], [0], [0, 0, 1, 0], [], []>} : vector<8x16xf32>, vector<8x16xf32>, vector<8x8xf32> -> vector<8x8xf32>
    %cst_107 = arith.constant 2.500000e-01 : f32
    %281 = vector.broadcast %cst_107 : f32 to vector<8x8xf32>
    %282 = arith.mulf %280, %281 : vector<8x8xf32>
    %cst_108 = arith.constant dense<0xFF800000> : vector<8xf32>
    %283 = vector.multi_reduction <maximumf>, %282, %cst_108 [1] : vector<8x8xf32> to vector<8xf32>
    %284 = vector.shape_cast %283 : vector<8xf32> to vector<8x1xf32>
    %285 = vector.broadcast %284 : vector<8x1xf32> to vector<8x8xf32>
    %286 = arith.subf %282, %285 : vector<8x8xf32>
    %287 = math.exp %286 : vector<8x8xf32>
    %cst_109 = arith.constant dense<0.000000e+00> : vector<8xf32>
    %288 = vector.multi_reduction <add>, %287, %cst_109 [1] : vector<8x8xf32> to vector<8xf32>
    %289 = vector.shape_cast %288 : vector<8xf32> to vector<8x1xf32>
    %290 = tpu.reciprocal %289 {approx = true} : vector<8x1xf32> -> vector<8x1xf32>
    %291 = vector.broadcast %290 : vector<8x1xf32> to vector<8x8xf32>
    %292 = arith.mulf %287, %291 : vector<8x8xf32>
    %cst_110 = arith.constant dense<0.000000e+00> : vector<8x16xf32>
    %293 = tpu.matmul %292, %279, %cst_110 {dimension_numbers = #tpu.dot_dimension_numbers<[1], [0], [0], [1], [0, 0, 1, 1], [], []>} : vector<8x8xf32>, vector<8x16xf32>, vector<8x16xf32> -> vector<8x16xf32>
    %c24_111 = arith.constant 24 : index
    %c48_112 = arith.constant 48 : index
    %294 = vector.load %arg14[%c24_111, %c48_112] : memref<32x64xf32, #tpu.memory_space<vmem>>, vector<8x16xf32>
    tpu.vector_store %arg14[%c24_111, %c48_112], %293 {strides = array<i32>} : memref<32x64xf32, #tpu.memory_space<vmem>>, vector<8x16xf32>,
    %c0_113 = arith.constant 0 : index
    %c0_114 = arith.constant 0 : index
    %c0_115 = arith.constant 0 : index
    %295 = vector.load %arg2[%c0_113, %c0_114, %c0_115] : memref<4x8x8xf32, #tpu.memory_space<vmem>>, vector<1x8x8xf32>
    %296 = vector.shape_cast %295 : vector<1x8x8xf32> to vector<8x8xf32>
    %c0_116 = arith.constant 0 : index
    %c0_117 = arith.constant 0 : index
    %297 = vector.load %arg14[%c0_116, %c0_117] : memref<32x64xf32, #tpu.memory_space<vmem>>, vector<8x64xf32>
    %c0_118 = arith.constant 0 : index
    %298 = memref.load %arg11[%c0_118] : memref<4xf32, #tpu.memory_space<smem>>
    %299 = vector.broadcast %298 : f32 to vector<8x64xf32>
    %300 = arith.mulf %299, %297 : vector<8x64xf32>
    %cst_119 = arith.constant dense<0.000000e+00> : vector<8x64xf32>
    %301 = tpu.matmul %296, %297, %cst_119 {dimension_numbers = #tpu.dot_dimension_numbers<[1], [0], [0], [1], [0, 0, 1, 1], [], []>} : vector<8x8xf32>, vector<8x64xf32>, vector<8x64xf32> -> vector<8x64xf32>
    %c1 = arith.constant 1 : index
    %302 = memref.load %arg11[%c1] : memref<4xf32, #tpu.memory_space<smem>>
    %303 = vector.broadcast %302 : f32 to vector<8x64xf32>
    %304 = arith.mulf %303, %301 : vector<8x64xf32>
    %305 = arith.addf %300, %304 : vector<8x64xf32>
    %cst_120 = arith.constant dense<0.000000e+00> : vector<8x64xf32>
    %306 = tpu.matmul %296, %301, %cst_120 {dimension_numbers = #tpu.dot_dimension_numbers<[1], [0], [0], [1], [0, 0, 1, 1], [], []>} : vector<8x8xf32>, vector<8x64xf32>, vector<8x64xf32> -> vector<8x64xf32>
    %c2 = arith.constant 2 : index
    %307 = memref.load %arg11[%c2] : memref<4xf32, #tpu.memory_space<smem>>
    %308 = vector.broadcast %307 : f32 to vector<8x64xf32>
    %309 = arith.mulf %308, %306 : vector<8x64xf32>
    %310 = arith.addf %305, %309 : vector<8x64xf32>
    %cst_121 = arith.constant dense<0.000000e+00> : vector<8x64xf32>
    %311 = tpu.matmul %296, %306, %cst_121 {dimension_numbers = #tpu.dot_dimension_numbers<[1], [0], [0], [1], [0, 0, 1, 1], [], []>} : vector<8x8xf32>, vector<8x64xf32>, vector<8x64xf32> -> vector<8x64xf32>
    %c3 = arith.constant 3 : index
    %312 = memref.load %arg11[%c3] : memref<4xf32, #tpu.memory_space<smem>>
    %313 = vector.broadcast %312 : f32 to vector<8x64xf32>
    %314 = arith.mulf %313, %311 : vector<8x64xf32>
    %315 = arith.addf %310, %314 : vector<8x64xf32>
    %c0_122 = arith.constant 0 : index
    %c0_123 = arith.constant 0 : index
    %316 = vector.load %arg14[%c0_122, %c0_123] : memref<32x64xf32, #tpu.memory_space<vmem>>, vector<8x64xf32>
    tpu.vector_store %arg14[%c0_122, %c0_123], %315 {strides = array<i32>} : memref<32x64xf32, #tpu.memory_space<vmem>>, vector<8x64xf32>,
    %c1_124 = arith.constant 1 : index
    %c0_125 = arith.constant 0 : index
    %c0_126 = arith.constant 0 : index
    %317 = vector.load %arg2[%c1_124, %c0_125, %c0_126] : memref<4x8x8xf32, #tpu.memory_space<vmem>>, vector<1x8x8xf32>
    %318 = vector.shape_cast %317 : vector<1x8x8xf32> to vector<8x8xf32>
    %c8_127 = arith.constant 8 : index
    %c0_128 = arith.constant 0 : index
    %319 = vector.load %arg14[%c8_127, %c0_128] : memref<32x64xf32, #tpu.memory_space<vmem>>, vector<8x64xf32>
    %c0_129 = arith.constant 0 : index
    %320 = memref.load %arg11[%c0_129] : memref<4xf32, #tpu.memory_space<smem>>
    %321 = vector.broadcast %320 : f32 to vector<8x64xf32>
    %322 = arith.mulf %321, %319 : vector<8x64xf32>
    %cst_130 = arith.constant dense<0.000000e+00> : vector<8x64xf32>
    %323 = tpu.matmul %318, %319, %cst_130 {dimension_numbers = #tpu.dot_dimension_numbers<[1], [0], [0], [1], [0, 0, 1, 1], [], []>} : vector<8x8xf32>, vector<8x64xf32>, vector<8x64xf32> -> vector<8x64xf32>
    %c1_131 = arith.constant 1 : index
    %324 = memref.load %arg11[%c1_131] : memref<4xf32, #tpu.memory_space<smem>>
    %325 = vector.broadcast %324 : f32 to vector<8x64xf32>
    %326 = arith.mulf %325, %323 : vector<8x64xf32>
    %327 = arith.addf %322, %326 : vector<8x64xf32>
    %cst_132 = arith.constant dense<0.000000e+00> : vector<8x64xf32>
    %328 = tpu.matmul %318, %323, %cst_132 {dimension_numbers = #tpu.dot_dimension_numbers<[1], [0], [0], [1], [0, 0, 1, 1], [], []>} : vector<8x8xf32>, vector<8x64xf32>, vector<8x64xf32> -> vector<8x64xf32>
    %c2_133 = arith.constant 2 : index
    %329 = memref.load %arg11[%c2_133] : memref<4xf32, #tpu.memory_space<smem>>
    %330 = vector.broadcast %329 : f32 to vector<8x64xf32>
    %331 = arith.mulf %330, %328 : vector<8x64xf32>
    %332 = arith.addf %327, %331 : vector<8x64xf32>
    %cst_134 = arith.constant dense<0.000000e+00> : vector<8x64xf32>
    %333 = tpu.matmul %318, %328, %cst_134 {dimension_numbers = #tpu.dot_dimension_numbers<[1], [0], [0], [1], [0, 0, 1, 1], [], []>} : vector<8x8xf32>, vector<8x64xf32>, vector<8x64xf32> -> vector<8x64xf32>
    %c3_135 = arith.constant 3 : index
    %334 = memref.load %arg11[%c3_135] : memref<4xf32, #tpu.memory_space<smem>>
    %335 = vector.broadcast %334 : f32 to vector<8x64xf32>
    %336 = arith.mulf %335, %333 : vector<8x64xf32>
    %337 = arith.addf %332, %336 : vector<8x64xf32>
    %c8_136 = arith.constant 8 : index
    %c0_137 = arith.constant 0 : index
    %338 = vector.load %arg14[%c8_136, %c0_137] : memref<32x64xf32, #tpu.memory_space<vmem>>, vector<8x64xf32>
    tpu.vector_store %arg14[%c8_136, %c0_137], %337 {strides = array<i32>} : memref<32x64xf32, #tpu.memory_space<vmem>>, vector<8x64xf32>,
    %c2_138 = arith.constant 2 : index
    %c0_139 = arith.constant 0 : index
    %c0_140 = arith.constant 0 : index
    %339 = vector.load %arg2[%c2_138, %c0_139, %c0_140] : memref<4x8x8xf32, #tpu.memory_space<vmem>>, vector<1x8x8xf32>
    %340 = vector.shape_cast %339 : vector<1x8x8xf32> to vector<8x8xf32>
    %c16_141 = arith.constant 16 : index
    %c0_142 = arith.constant 0 : index
    %341 = vector.load %arg14[%c16_141, %c0_142] : memref<32x64xf32, #tpu.memory_space<vmem>>, vector<8x64xf32>
    %c0_143 = arith.constant 0 : index
    %342 = memref.load %arg11[%c0_143] : memref<4xf32, #tpu.memory_space<smem>>
    %343 = vector.broadcast %342 : f32 to vector<8x64xf32>
    %344 = arith.mulf %343, %341 : vector<8x64xf32>
    %cst_144 = arith.constant dense<0.000000e+00> : vector<8x64xf32>
    %345 = tpu.matmul %340, %341, %cst_144 {dimension_numbers = #tpu.dot_dimension_numbers<[1], [0], [0], [1], [0, 0, 1, 1], [], []>} : vector<8x8xf32>, vector<8x64xf32>, vector<8x64xf32> -> vector<8x64xf32>
    %c1_145 = arith.constant 1 : index
    %346 = memref.load %arg11[%c1_145] : memref<4xf32, #tpu.memory_space<smem>>
    %347 = vector.broadcast %346 : f32 to vector<8x64xf32>
    %348 = arith.mulf %347, %345 : vector<8x64xf32>
    %349 = arith.addf %344, %348 : vector<8x64xf32>
    %cst_146 = arith.constant dense<0.000000e+00> : vector<8x64xf32>
    %350 = tpu.matmul %340, %345, %cst_146 {dimension_numbers = #tpu.dot_dimension_numbers<[1], [0], [0], [1], [0, 0, 1, 1], [], []>} : vector<8x8xf32>, vector<8x64xf32>, vector<8x64xf32> -> vector<8x64xf32>
    %c2_147 = arith.constant 2 : index
    %351 = memref.load %arg11[%c2_147] : memref<4xf32, #tpu.memory_space<smem>>
    %352 = vector.broadcast %351 : f32 to vector<8x64xf32>
    %353 = arith.mulf %352, %350 : vector<8x64xf32>
    %354 = arith.addf %349, %353 : vector<8x64xf32>
    %cst_148 = arith.constant dense<0.000000e+00> : vector<8x64xf32>
    %355 = tpu.matmul %340, %350, %cst_148 {dimension_numbers = #tpu.dot_dimension_numbers<[1], [0], [0], [1], [0, 0, 1, 1], [], []>} : vector<8x8xf32>, vector<8x64xf32>, vector<8x64xf32> -> vector<8x64xf32>
    %c3_149 = arith.constant 3 : index
    %356 = memref.load %arg11[%c3_149] : memref<4xf32, #tpu.memory_space<smem>>
    %357 = vector.broadcast %356 : f32 to vector<8x64xf32>
    %358 = arith.mulf %357, %355 : vector<8x64xf32>
    %359 = arith.addf %354, %358 : vector<8x64xf32>
    %c16_150 = arith.constant 16 : index
    %c0_151 = arith.constant 0 : index
    %360 = vector.load %arg14[%c16_150, %c0_151] : memref<32x64xf32, #tpu.memory_space<vmem>>, vector<8x64xf32>
    tpu.vector_store %arg14[%c16_150, %c0_151], %359 {strides = array<i32>} : memref<32x64xf32, #tpu.memory_space<vmem>>, vector<8x64xf32>,
    %c3_152 = arith.constant 3 : index
    %c0_153 = arith.constant 0 : index
    %c0_154 = arith.constant 0 : index
    %361 = vector.load %arg2[%c3_152, %c0_153, %c0_154] : memref<4x8x8xf32, #tpu.memory_space<vmem>>, vector<1x8x8xf32>
    %362 = vector.shape_cast %361 : vector<1x8x8xf32> to vector<8x8xf32>
    %c24_155 = arith.constant 24 : index
    %c0_156 = arith.constant 0 : index
    %363 = vector.load %arg14[%c24_155, %c0_156] : memref<32x64xf32, #tpu.memory_space<vmem>>, vector<8x64xf32>
    %c0_157 = arith.constant 0 : index
    %364 = memref.load %arg11[%c0_157] : memref<4xf32, #tpu.memory_space<smem>>
    %365 = vector.broadcast %364 : f32 to vector<8x64xf32>
    %366 = arith.mulf %365, %363 : vector<8x64xf32>
    %cst_158 = arith.constant dense<0.000000e+00> : vector<8x64xf32>
    %367 = tpu.matmul %362, %363, %cst_158 {dimension_numbers = #tpu.dot_dimension_numbers<[1], [0], [0], [1], [0, 0, 1, 1], [], []>} : vector<8x8xf32>, vector<8x64xf32>, vector<8x64xf32> -> vector<8x64xf32>
    %c1_159 = arith.constant 1 : index
    %368 = memref.load %arg11[%c1_159] : memref<4xf32, #tpu.memory_space<smem>>
    %369 = vector.broadcast %368 : f32 to vector<8x64xf32>
    %370 = arith.mulf %369, %367 : vector<8x64xf32>
    %371 = arith.addf %366, %370 : vector<8x64xf32>
    %cst_160 = arith.constant dense<0.000000e+00> : vector<8x64xf32>
    %372 = tpu.matmul %362, %367, %cst_160 {dimension_numbers = #tpu.dot_dimension_numbers<[1], [0], [0], [1], [0, 0, 1, 1], [], []>} : vector<8x8xf32>, vector<8x64xf32>, vector<8x64xf32> -> vector<8x64xf32>
    %c2_161 = arith.constant 2 : index
    %373 = memref.load %arg11[%c2_161] : memref<4xf32, #tpu.memory_space<smem>>
    %374 = vector.broadcast %373 : f32 to vector<8x64xf32>
    %375 = arith.mulf %374, %372 : vector<8x64xf32>
    %376 = arith.addf %371, %375 : vector<8x64xf32>
    %cst_162 = arith.constant dense<0.000000e+00> : vector<8x64xf32>
    %377 = tpu.matmul %362, %372, %cst_162 {dimension_numbers = #tpu.dot_dimension_numbers<[1], [0], [0], [1], [0, 0, 1, 1], [], []>} : vector<8x8xf32>, vector<8x64xf32>, vector<8x64xf32> -> vector<8x64xf32>
    %c3_163 = arith.constant 3 : index
    %378 = memref.load %arg11[%c3_163] : memref<4xf32, #tpu.memory_space<smem>>
    %379 = vector.broadcast %378 : f32 to vector<8x64xf32>
    %380 = arith.mulf %379, %377 : vector<8x64xf32>
    %381 = arith.addf %376, %380 : vector<8x64xf32>
    %c24_164 = arith.constant 24 : index
    %c0_165 = arith.constant 0 : index
    %382 = vector.load %arg14[%c24_164, %c0_165] : memref<32x64xf32, #tpu.memory_space<vmem>>, vector<8x64xf32>
    tpu.vector_store %arg14[%c24_164, %c0_165], %381 {strides = array<i32>} : memref<32x64xf32, #tpu.memory_space<vmem>>, vector<8x64xf32>,
    %c0_166 = arith.constant 0 : index
    %c0_167 = arith.constant 0 : index
    %383 = vector.load %arg14[%c0_166, %c0_167] : memref<32x64xf32, #tpu.memory_space<vmem>>, vector<32x64xf32>
    %c0_168 = arith.constant 0 : index
    %c0_169 = arith.constant 0 : index
    %384 = vector.load %arg5[%c0_168, %c0_169] : memref<64x32xf32, #tpu.memory_space<vmem>>, vector<64x32xf32>
    %cst_170 = arith.constant dense<0.000000e+00> : vector<32x32xf32>
    %385 = tpu.matmul %383, %384, %cst_170 {dimension_numbers = #tpu.dot_dimension_numbers<[1], [0], [0], [1], [0, 0, 1, 1], [], []>} : vector<32x64xf32>, vector<64x32xf32>, vector<32x32xf32> -> vector<32x32xf32>
    %c0_171 = arith.constant 0 : index
    %c0_172 = arith.constant 0 : index
    %386 = vector.load %arg6[%c0_171, %c0_172] : memref<1x32xf32, #tpu.memory_space<vmem>>, vector<1x32xf32>
    %387 = vector.broadcast %386 : vector<1x32xf32> to vector<32x32xf32>
    %388 = arith.addf %385, %387 : vector<32x32xf32>
    %389 = arith.addf %388, %1 : vector<32x32xf32>
    %cst_173 = arith.constant dense<0.000000e+00> : vector<32xf32>
    %390 = vector.multi_reduction <add>, %389, %cst_173 [1] : vector<32x32xf32> to vector<32xf32>
    %391 = vector.shape_cast %390 : vector<32xf32> to vector<32x1xf32>
    %cst_174 = arith.constant 3.200000e+01 : f32
    %392 = vector.broadcast %cst_174 : f32 to vector<32x1xf32>
    %393 = arith.divf %391, %392 : vector<32x1xf32>
    %394 = vector.broadcast %393 : vector<32x1xf32> to vector<32x32xf32>
    %395 = arith.subf %389, %394 : vector<32x32xf32>
    %396 = arith.mulf %395, %395 : vector<32x32xf32>
    %cst_175 = arith.constant dense<0.000000e+00> : vector<32xf32>
    %397 = vector.multi_reduction <add>, %396, %cst_175 [1] : vector<32x32xf32> to vector<32xf32>
    %398 = vector.shape_cast %397 : vector<32xf32> to vector<32x1xf32>
    %cst_176 = arith.constant 3.200000e+01 : f32
    %399 = vector.broadcast %cst_176 : f32 to vector<32x1xf32>
    %400 = arith.divf %398, %399 : vector<32x1xf32>
    %401 = vector.broadcast %393 : vector<32x1xf32> to vector<32x32xf32>
    %402 = arith.subf %389, %401 : vector<32x32xf32>
    %cst_177 = arith.constant 9.99999974E-6 : f32
    %403 = vector.broadcast %cst_177 : f32 to vector<32x1xf32>
    %404 = arith.addf %400, %403 : vector<32x1xf32>
    %405 = math.rsqrt %404 : vector<32x1xf32>
    %406 = vector.broadcast %405 : vector<32x1xf32> to vector<32x32xf32>
    %407 = arith.mulf %402, %406 : vector<32x32xf32>
    %c0_178 = arith.constant 0 : index
    %c0_179 = arith.constant 0 : index
    %408 = vector.load %arg7[%c0_178, %c0_179] : memref<1x32xf32, #tpu.memory_space<vmem>>, vector<1x32xf32>
    %409 = vector.broadcast %408 : vector<1x32xf32> to vector<32x32xf32>
    %410 = arith.mulf %407, %409 : vector<32x32xf32>
    %c0_180 = arith.constant 0 : index
    %c0_181 = arith.constant 0 : index
    %411 = vector.load %arg8[%c0_180, %c0_181] : memref<1x32xf32, #tpu.memory_space<vmem>>, vector<1x32xf32>
    %412 = vector.broadcast %411 : vector<1x32xf32> to vector<32x32xf32>
    %413 = arith.addf %410, %412 : vector<32x32xf32>
    %414 = vector.shape_cast %413 : vector<32x32xf32> to vector<4x8x32xf32>
    %c0_182 = arith.constant 0 : index
    %c0_183 = arith.constant 0 : index
    %c0_184 = arith.constant 0 : index
    %415 = vector.load %arg12[%c0_182, %c0_183, %c0_184] : memref<4x8x32xf32, #tpu.memory_space<vmem>>, vector<4x8x32xf32>
    tpu.vector_store %arg12[%c0_182, %c0_183, %c0_184], %414 {strides = array<i32>} : memref<4x8x32xf32, #tpu.memory_space<vmem>>, vector<4x8x32xf32>,
    %c0_185 = arith.constant 0 : index
    %c0_186 = arith.constant 0 : index
    %416 = vector.load %arg9[%c0_185, %c0_186] : memref<32x64xf32, #tpu.memory_space<vmem>>, vector<32x64xf32>
    %cst_187 = arith.constant dense<0.000000e+00> : vector<32x64xf32>
    %417 = tpu.matmul %413, %416, %cst_187 {dimension_numbers = #tpu.dot_dimension_numbers<[1], [0], [0], [1], [0, 0, 1, 1], [], []>} : vector<32x32xf32>, vector<32x64xf32>, vector<32x64xf32> -> vector<32x64xf32>
    %c0_188 = arith.constant 0 : index
    %c0_189 = arith.constant 0 : index
    %418 = vector.load %arg10[%c0_188, %c0_189] : memref<1x64xf32, #tpu.memory_space<vmem>>, vector<1x64xf32>
    %419 = vector.broadcast %418 : vector<1x64xf32> to vector<32x64xf32>
    %420 = arith.addf %417, %419 : vector<32x64xf32>
    %c0_190 = arith.constant 0 : index
    %c0_191 = arith.constant 0 : index
    %c0_192 = arith.constant 0 : index
    %421 = vector.load %arg2[%c0_190, %c0_191, %c0_192] : memref<4x8x8xf32, #tpu.memory_space<vmem>>, vector<1x8x8xf32>
    %422 = vector.shape_cast %421 : vector<1x8x8xf32> to vector<8x8xf32>
    %cst_193 = arith.constant 0.000000e+00 : f32
    %423 = vector.broadcast %cst_193 : f32 to vector<8x8xf32>
    %424 = vector.extract_strided_slice %420 {offsets = [0, 0], sizes = [8, 16], strides = [1, 1]} : vector<32x64xf32> to vector<8x16xf32>
    %425 = vector.extract_strided_slice %420 {offsets = [0, 32], sizes = [8, 16], strides = [1, 1]} : vector<32x64xf32> to vector<8x16xf32>
    %cst_194 = arith.constant dense<0.000000e+00> : vector<8x8xf32>
    %426 = tpu.matmul %424, %425, %cst_194 {dimension_numbers = #tpu.dot_dimension_numbers<[1], [1], [0], [0], [0, 0, 1, 0], [], []>} : vector<8x16xf32>, vector<8x16xf32>, vector<8x8xf32> -> vector<8x8xf32>
    %cst_195 = arith.constant 2.500000e-01 : f32
    %427 = vector.broadcast %cst_195 : f32 to vector<8x8xf32>
    %428 = arith.mulf %426, %427 : vector<8x8xf32>
    %429 = arith.addf %428, %422 : vector<8x8xf32>
    %cst_196 = arith.constant dense<0xFF800000> : vector<8xf32>
    %430 = vector.multi_reduction <maximumf>, %429, %cst_196 [1] : vector<8x8xf32> to vector<8xf32>
    %431 = vector.shape_cast %430 : vector<8xf32> to vector<8x1xf32>
    %432 = vector.broadcast %431 : vector<8x1xf32> to vector<8x8xf32>
    %433 = arith.subf %429, %432 : vector<8x8xf32>
    %434 = math.exp %433 : vector<8x8xf32>
    %cst_197 = arith.constant dense<0.000000e+00> : vector<8xf32>
    %435 = vector.multi_reduction <add>, %434, %cst_197 [1] : vector<8x8xf32> to vector<8xf32>
    %436 = vector.shape_cast %435 : vector<8xf32> to vector<8x1xf32>
    %437 = vector.broadcast %436 : vector<8x1xf32> to vector<8x8xf32>
    %438 = arith.divf %434, %437 : vector<8x8xf32>
    %439 = arith.addf %423, %438 : vector<8x8xf32>
    %440 = vector.extract_strided_slice %420 {offsets = [0, 16], sizes = [8, 16], strides = [1, 1]} : vector<32x64xf32> to vector<8x16xf32>
    %441 = vector.extract_strided_slice %420 {offsets = [0, 48], sizes = [8, 16], strides = [1, 1]} : vector<32x64xf32> to vector<8x16xf32>
    %cst_198 = arith.constant dense<0.000000e+00> : vector<8x8xf32>
    %442 = tpu.matmul %440, %441, %cst_198 {dimension_numbers = #tpu.dot_dimension_numbers<[1], [1], [0], [0], [0, 0, 1, 0], [], []>} : vector<8x16xf32>, vector<8x16xf32>, vector<8x8xf32> -> vector<8x8xf32>
    %cst_199 = arith.constant 2.500000e-01 : f32
    %443 = vector.broadcast %cst_199 : f32 to vector<8x8xf32>
    %444 = arith.mulf %442, %443 : vector<8x8xf32>
    %445 = arith.addf %444, %422 : vector<8x8xf32>
    %cst_200 = arith.constant dense<0xFF800000> : vector<8xf32>
    %446 = vector.multi_reduction <maximumf>, %445, %cst_200 [1] : vector<8x8xf32> to vector<8xf32>
    %447 = vector.shape_cast %446 : vector<8xf32> to vector<8x1xf32>
    %448 = vector.broadcast %447 : vector<8x1xf32> to vector<8x8xf32>
    %449 = arith.subf %445, %448 : vector<8x8xf32>
    %450 = math.exp %449 : vector<8x8xf32>
    %cst_201 = arith.constant dense<0.000000e+00> : vector<8xf32>
    %451 = vector.multi_reduction <add>, %450, %cst_201 [1] : vector<8x8xf32> to vector<8xf32>
    %452 = vector.shape_cast %451 : vector<8xf32> to vector<8x1xf32>
    %453 = vector.broadcast %452 : vector<8x1xf32> to vector<8x8xf32>
    %454 = arith.divf %450, %453 : vector<8x8xf32>
    %455 = arith.addf %439, %454 : vector<8x8xf32>
    %cst_202 = arith.constant 5.000000e-01 : f32
    %456 = vector.broadcast %cst_202 : f32 to vector<8x8xf32>
    %457 = arith.mulf %455, %456 : vector<8x8xf32>
    %c0_203 = arith.constant 0 : index
    %c0_204 = arith.constant 0 : index
    %c0_205 = arith.constant 0 : index
    %458 = vector.load %arg13[%c0_203, %c0_204, %c0_205] : memref<4x8x8xf32, #tpu.memory_space<vmem>>, vector<1x8x8xf32>
    %459 = vector.shape_cast %458 : vector<1x8x8xf32> to vector<8x8xf32>
    %460 = vector.shape_cast %457 : vector<8x8xf32> to vector<1x8x8xf32>
    tpu.vector_store %arg13[%c0_203, %c0_204, %c0_205], %460 {strides = array<i32>} : memref<4x8x8xf32, #tpu.memory_space<vmem>>, vector<1x8x8xf32>,
    %c1_206 = arith.constant 1 : index
    %c0_207 = arith.constant 0 : index
    %c0_208 = arith.constant 0 : index
    %461 = vector.load %arg2[%c1_206, %c0_207, %c0_208] : memref<4x8x8xf32, #tpu.memory_space<vmem>>, vector<1x8x8xf32>
    %462 = vector.shape_cast %461 : vector<1x8x8xf32> to vector<8x8xf32>
    %cst_209 = arith.constant 0.000000e+00 : f32
    %463 = vector.broadcast %cst_209 : f32 to vector<8x8xf32>
    %464 = vector.extract_strided_slice %420 {offsets = [8, 0], sizes = [8, 16], strides = [1, 1]} : vector<32x64xf32> to vector<8x16xf32>
    %465 = vector.extract_strided_slice %420 {offsets = [8, 32], sizes = [8, 16], strides = [1, 1]} : vector<32x64xf32> to vector<8x16xf32>
    %cst_210 = arith.constant dense<0.000000e+00> : vector<8x8xf32>
    %466 = tpu.matmul %464, %465, %cst_210 {dimension_numbers = #tpu.dot_dimension_numbers<[1], [1], [0], [0], [0, 0, 1, 0], [], []>} : vector<8x16xf32>, vector<8x16xf32>, vector<8x8xf32> -> vector<8x8xf32>
    %cst_211 = arith.constant 2.500000e-01 : f32
    %467 = vector.broadcast %cst_211 : f32 to vector<8x8xf32>
    %468 = arith.mulf %466, %467 : vector<8x8xf32>
    %469 = arith.addf %468, %462 : vector<8x8xf32>
    %cst_212 = arith.constant dense<0xFF800000> : vector<8xf32>
    %470 = vector.multi_reduction <maximumf>, %469, %cst_212 [1] : vector<8x8xf32> to vector<8xf32>
    %471 = vector.shape_cast %470 : vector<8xf32> to vector<8x1xf32>
    %472 = vector.broadcast %471 : vector<8x1xf32> to vector<8x8xf32>
    %473 = arith.subf %469, %472 : vector<8x8xf32>
    %474 = math.exp %473 : vector<8x8xf32>
    %cst_213 = arith.constant dense<0.000000e+00> : vector<8xf32>
    %475 = vector.multi_reduction <add>, %474, %cst_213 [1] : vector<8x8xf32> to vector<8xf32>
    %476 = vector.shape_cast %475 : vector<8xf32> to vector<8x1xf32>
    %477 = vector.broadcast %476 : vector<8x1xf32> to vector<8x8xf32>
    %478 = arith.divf %474, %477 : vector<8x8xf32>
    %479 = arith.addf %463, %478 : vector<8x8xf32>
    %480 = vector.extract_strided_slice %420 {offsets = [8, 16], sizes = [8, 16], strides = [1, 1]} : vector<32x64xf32> to vector<8x16xf32>
    %481 = vector.extract_strided_slice %420 {offsets = [8, 48], sizes = [8, 16], strides = [1, 1]} : vector<32x64xf32> to vector<8x16xf32>
    %cst_214 = arith.constant dense<0.000000e+00> : vector<8x8xf32>
    %482 = tpu.matmul %480, %481, %cst_214 {dimension_numbers = #tpu.dot_dimension_numbers<[1], [1], [0], [0], [0, 0, 1, 0], [], []>} : vector<8x16xf32>, vector<8x16xf32>, vector<8x8xf32> -> vector<8x8xf32>
    %cst_215 = arith.constant 2.500000e-01 : f32
    %483 = vector.broadcast %cst_215 : f32 to vector<8x8xf32>
    %484 = arith.mulf %482, %483 : vector<8x8xf32>
    %485 = arith.addf %484, %462 : vector<8x8xf32>
    %cst_216 = arith.constant dense<0xFF800000> : vector<8xf32>
    %486 = vector.multi_reduction <maximumf>, %485, %cst_216 [1] : vector<8x8xf32> to vector<8xf32>
    %487 = vector.shape_cast %486 : vector<8xf32> to vector<8x1xf32>
    %488 = vector.broadcast %487 : vector<8x1xf32> to vector<8x8xf32>
    %489 = arith.subf %485, %488 : vector<8x8xf32>
    %490 = math.exp %489 : vector<8x8xf32>
    %cst_217 = arith.constant dense<0.000000e+00> : vector<8xf32>
    %491 = vector.multi_reduction <add>, %490, %cst_217 [1] : vector<8x8xf32> to vector<8xf32>
    %492 = vector.shape_cast %491 : vector<8xf32> to vector<8x1xf32>
    %493 = vector.broadcast %492 : vector<8x1xf32> to vector<8x8xf32>
    %494 = arith.divf %490, %493 : vector<8x8xf32>
    %495 = arith.addf %479, %494 : vector<8x8xf32>
    %cst_218 = arith.constant 5.000000e-01 : f32
    %496 = vector.broadcast %cst_218 : f32 to vector<8x8xf32>
    %497 = arith.mulf %495, %496 : vector<8x8xf32>
    %c1_219 = arith.constant 1 : index
    %c0_220 = arith.constant 0 : index
    %c0_221 = arith.constant 0 : index
    %498 = vector.load %arg13[%c1_219, %c0_220, %c0_221] : memref<4x8x8xf32, #tpu.memory_space<vmem>>, vector<1x8x8xf32>
    %499 = vector.shape_cast %498 : vector<1x8x8xf32> to vector<8x8xf32>
    %500 = vector.shape_cast %497 : vector<8x8xf32> to vector<1x8x8xf32>
    tpu.vector_store %arg13[%c1_219, %c0_220, %c0_221], %500 {strides = array<i32>} : memref<4x8x8xf32, #tpu.memory_space<vmem>>, vector<1x8x8xf32>,
    %c2_222 = arith.constant 2 : index
    %c0_223 = arith.constant 0 : index
    %c0_224 = arith.constant 0 : index
    %501 = vector.load %arg2[%c2_222, %c0_223, %c0_224] : memref<4x8x8xf32, #tpu.memory_space<vmem>>, vector<1x8x8xf32>
    %502 = vector.shape_cast %501 : vector<1x8x8xf32> to vector<8x8xf32>
    %cst_225 = arith.constant 0.000000e+00 : f32
    %503 = vector.broadcast %cst_225 : f32 to vector<8x8xf32>
    %504 = vector.extract_strided_slice %420 {offsets = [16, 0], sizes = [8, 16], strides = [1, 1]} : vector<32x64xf32> to vector<8x16xf32>
    %505 = vector.extract_strided_slice %420 {offsets = [16, 32], sizes = [8, 16], strides = [1, 1]} : vector<32x64xf32> to vector<8x16xf32>
    %cst_226 = arith.constant dense<0.000000e+00> : vector<8x8xf32>
    %506 = tpu.matmul %504, %505, %cst_226 {dimension_numbers = #tpu.dot_dimension_numbers<[1], [1], [0], [0], [0, 0, 1, 0], [], []>} : vector<8x16xf32>, vector<8x16xf32>, vector<8x8xf32> -> vector<8x8xf32>
    %cst_227 = arith.constant 2.500000e-01 : f32
    %507 = vector.broadcast %cst_227 : f32 to vector<8x8xf32>
    %508 = arith.mulf %506, %507 : vector<8x8xf32>
    %509 = arith.addf %508, %502 : vector<8x8xf32>
    %cst_228 = arith.constant dense<0xFF800000> : vector<8xf32>
    %510 = vector.multi_reduction <maximumf>, %509, %cst_228 [1] : vector<8x8xf32> to vector<8xf32>
    %511 = vector.shape_cast %510 : vector<8xf32> to vector<8x1xf32>
    %512 = vector.broadcast %511 : vector<8x1xf32> to vector<8x8xf32>
    %513 = arith.subf %509, %512 : vector<8x8xf32>
    %514 = math.exp %513 : vector<8x8xf32>
    %cst_229 = arith.constant dense<0.000000e+00> : vector<8xf32>
    %515 = vector.multi_reduction <add>, %514, %cst_229 [1] : vector<8x8xf32> to vector<8xf32>
    %516 = vector.shape_cast %515 : vector<8xf32> to vector<8x1xf32>
    %517 = vector.broadcast %516 : vector<8x1xf32> to vector<8x8xf32>
    %518 = arith.divf %514, %517 : vector<8x8xf32>
    %519 = arith.addf %503, %518 : vector<8x8xf32>
    %520 = vector.extract_strided_slice %420 {offsets = [16, 16], sizes = [8, 16], strides = [1, 1]} : vector<32x64xf32> to vector<8x16xf32>
    %521 = vector.extract_strided_slice %420 {offsets = [16, 48], sizes = [8, 16], strides = [1, 1]} : vector<32x64xf32> to vector<8x16xf32>
    %cst_230 = arith.constant dense<0.000000e+00> : vector<8x8xf32>
    %522 = tpu.matmul %520, %521, %cst_230 {dimension_numbers = #tpu.dot_dimension_numbers<[1], [1], [0], [0], [0, 0, 1, 0], [], []>} : vector<8x16xf32>, vector<8x16xf32>, vector<8x8xf32> -> vector<8x8xf32>
    %cst_231 = arith.constant 2.500000e-01 : f32
    %523 = vector.broadcast %cst_231 : f32 to vector<8x8xf32>
    %524 = arith.mulf %522, %523 : vector<8x8xf32>
    %525 = arith.addf %524, %502 : vector<8x8xf32>
    %cst_232 = arith.constant dense<0xFF800000> : vector<8xf32>
    %526 = vector.multi_reduction <maximumf>, %525, %cst_232 [1] : vector<8x8xf32> to vector<8xf32>
    %527 = vector.shape_cast %526 : vector<8xf32> to vector<8x1xf32>
    %528 = vector.broadcast %527 : vector<8x1xf32> to vector<8x8xf32>
    %529 = arith.subf %525, %528 : vector<8x8xf32>
    %530 = math.exp %529 : vector<8x8xf32>
    %cst_233 = arith.constant dense<0.000000e+00> : vector<8xf32>
    %531 = vector.multi_reduction <add>, %530, %cst_233 [1] : vector<8x8xf32> to vector<8xf32>
    %532 = vector.shape_cast %531 : vector<8xf32> to vector<8x1xf32>
    %533 = vector.broadcast %532 : vector<8x1xf32> to vector<8x8xf32>
    %534 = arith.divf %530, %533 : vector<8x8xf32>
    %535 = arith.addf %519, %534 : vector<8x8xf32>
    %cst_234 = arith.constant 5.000000e-01 : f32
    %536 = vector.broadcast %cst_234 : f32 to vector<8x8xf32>
    %537 = arith.mulf %535, %536 : vector<8x8xf32>
    %c2_235 = arith.constant 2 : index
    %c0_236 = arith.constant 0 : index
    %c0_237 = arith.constant 0 : index
    %538 = vector.load %arg13[%c2_235, %c0_236, %c0_237] : memref<4x8x8xf32, #tpu.memory_space<vmem>>, vector<1x8x8xf32>
    %539 = vector.shape_cast %538 : vector<1x8x8xf32> to vector<8x8xf32>
    %540 = vector.shape_cast %537 : vector<8x8xf32> to vector<1x8x8xf32>
    tpu.vector_store %arg13[%c2_235, %c0_236, %c0_237], %540 {strides = array<i32>} : memref<4x8x8xf32, #tpu.memory_space<vmem>>, vector<1x8x8xf32>,
    %c3_238 = arith.constant 3 : index
    %c0_239 = arith.constant 0 : index
    %c0_240 = arith.constant 0 : index
    %541 = vector.load %arg2[%c3_238, %c0_239, %c0_240] : memref<4x8x8xf32, #tpu.memory_space<vmem>>, vector<1x8x8xf32>
    %542 = vector.shape_cast %541 : vector<1x8x8xf32> to vector<8x8xf32>
    %cst_241 = arith.constant 0.000000e+00 : f32
    %543 = vector.broadcast %cst_241 : f32 to vector<8x8xf32>
    %544 = vector.extract_strided_slice %420 {offsets = [24, 0], sizes = [8, 16], strides = [1, 1]} : vector<32x64xf32> to vector<8x16xf32>
    %545 = vector.extract_strided_slice %420 {offsets = [24, 32], sizes = [8, 16], strides = [1, 1]} : vector<32x64xf32> to vector<8x16xf32>
    %cst_242 = arith.constant dense<0.000000e+00> : vector<8x8xf32>
    %546 = tpu.matmul %544, %545, %cst_242 {dimension_numbers = #tpu.dot_dimension_numbers<[1], [1], [0], [0], [0, 0, 1, 0], [], []>} : vector<8x16xf32>, vector<8x16xf32>, vector<8x8xf32> -> vector<8x8xf32>
    %cst_243 = arith.constant 2.500000e-01 : f32
    %547 = vector.broadcast %cst_243 : f32 to vector<8x8xf32>
    %548 = arith.mulf %546, %547 : vector<8x8xf32>
    %549 = arith.addf %548, %542 : vector<8x8xf32>
    %cst_244 = arith.constant dense<0xFF800000> : vector<8xf32>
    %550 = vector.multi_reduction <maximumf>, %549, %cst_244 [1] : vector<8x8xf32> to vector<8xf32>
    %551 = vector.shape_cast %550 : vector<8xf32> to vector<8x1xf32>
    %552 = vector.broadcast %551 : vector<8x1xf32> to vector<8x8xf32>
    %553 = arith.subf %549, %552 : vector<8x8xf32>
    %554 = math.exp %553 : vector<8x8xf32>
    %cst_245 = arith.constant dense<0.000000e+00> : vector<8xf32>
    %555 = vector.multi_reduction <add>, %554, %cst_245 [1] : vector<8x8xf32> to vector<8xf32>
    %556 = vector.shape_cast %555 : vector<8xf32> to vector<8x1xf32>
    %557 = vector.broadcast %556 : vector<8x1xf32> to vector<8x8xf32>
    %558 = arith.divf %554, %557 : vector<8x8xf32>
    %559 = arith.addf %543, %558 : vector<8x8xf32>
    %560 = vector.extract_strided_slice %420 {offsets = [24, 16], sizes = [8, 16], strides = [1, 1]} : vector<32x64xf32> to vector<8x16xf32>
    %561 = vector.extract_strided_slice %420 {offsets = [24, 48], sizes = [8, 16], strides = [1, 1]} : vector<32x64xf32> to vector<8x16xf32>
    %cst_246 = arith.constant dense<0.000000e+00> : vector<8x8xf32>
    %562 = tpu.matmul %560, %561, %cst_246 {dimension_numbers = #tpu.dot_dimension_numbers<[1], [1], [0], [0], [0, 0, 1, 0], [], []>} : vector<8x16xf32>, vector<8x16xf32>, vector<8x8xf32> -> vector<8x8xf32>
    %cst_247 = arith.constant 2.500000e-01 : f32
    %563 = vector.broadcast %cst_247 : f32 to vector<8x8xf32>
    %564 = arith.mulf %562, %563 : vector<8x8xf32>
    %565 = arith.addf %564, %542 : vector<8x8xf32>
    %cst_248 = arith.constant dense<0xFF800000> : vector<8xf32>
    %566 = vector.multi_reduction <maximumf>, %565, %cst_248 [1] : vector<8x8xf32> to vector<8xf32>
    %567 = vector.shape_cast %566 : vector<8xf32> to vector<8x1xf32>
    %568 = vector.broadcast %567 : vector<8x1xf32> to vector<8x8xf32>
    %569 = arith.subf %565, %568 : vector<8x8xf32>
    %570 = math.exp %569 : vector<8x8xf32>
    %cst_249 = arith.constant dense<0.000000e+00> : vector<8xf32>
    %571 = vector.multi_reduction <add>, %570, %cst_249 [1] : vector<8x8xf32> to vector<8xf32>
    %572 = vector.shape_cast %571 : vector<8xf32> to vector<8x1xf32>
    %573 = vector.broadcast %572 : vector<8x1xf32> to vector<8x8xf32>
    %574 = arith.divf %570, %573 : vector<8x8xf32>
    %575 = arith.addf %559, %574 : vector<8x8xf32>
    %cst_250 = arith.constant 5.000000e-01 : f32
    %576 = vector.broadcast %cst_250 : f32 to vector<8x8xf32>
    %577 = arith.mulf %575, %576 : vector<8x8xf32>
    %c3_251 = arith.constant 3 : index
    %c0_252 = arith.constant 0 : index
    %c0_253 = arith.constant 0 : index
    %578 = vector.load %arg13[%c3_251, %c0_252, %c0_253] : memref<4x8x8xf32, #tpu.memory_space<vmem>>, vector<1x8x8xf32>
    %579 = vector.shape_cast %578 : vector<1x8x8xf32> to vector<8x8xf32>
    %580 = vector.shape_cast %577 : vector<8x8xf32> to vector<1x8x8xf32>
    tpu.vector_store %arg13[%c3_251, %c0_252, %c0_253], %580 {strides = array<i32>} : memref<4x8x8xf32, #tpu.memory_space<vmem>>, vector<1x8x8xf32>,
    return
  }
  func.func @transform_0(%arg0: i32) -> (i32, i32, i32) {
    %c0_i32 = arith.constant 0 : i32
    %c0_i32_0 = arith.constant 0 : i32
    %c0_i32_1 = arith.constant 0 : i32
    return %arg0, %c0_i32, %c0_i32_0 : i32, i32, i32
  }
  func.func @transform_1(%arg0: i32) -> (i32, i32, i32) {
    %c0_i32 = arith.constant 0 : i32
    %c0_i32_0 = arith.constant 0 : i32
    %c0_i32_1 = arith.constant 0 : i32
    return %arg0, %c0_i32, %c0_i32_0 : i32, i32, i32
  }
  func.func @transform_2(%arg0: i32) -> (i32, i32) {
    %c0_i32 = arith.constant 0 : i32
    %c0_i32_0 = arith.constant 0 : i32
    %c0_i32_1 = arith.constant 0 : i32
    return %c0_i32, %c0_i32_0 : i32, i32
  }
  func.func @transform_3(%arg0: i32) -> (i32, i32) {
    %c0_i32 = arith.constant 0 : i32
    %c0_i32_0 = arith.constant 0 : i32
    %c0_i32_1 = arith.constant 0 : i32
    return %c0_i32, %c0_i32_0 : i32, i32
  }
  func.func @transform_4(%arg0: i32) -> (i32, i32) {
    %c0_i32 = arith.constant 0 : i32
    %c0_i32_0 = arith.constant 0 : i32
    %c0_i32_1 = arith.constant 0 : i32
    return %c0_i32, %c0_i32_0 : i32, i32
  }
  func.func @transform_5(%arg0: i32) -> (i32, i32) {
    %c0_i32 = arith.constant 0 : i32
    %c0_i32_0 = arith.constant 0 : i32
    %c0_i32_1 = arith.constant 0 : i32
    return %c0_i32, %c0_i32_0 : i32, i32
  }
  func.func @transform_6(%arg0: i32) -> (i32, i32) {
    %c0_i32 = arith.constant 0 : i32
    %c0_i32_0 = arith.constant 0 : i32
    %c0_i32_1 = arith.constant 0 : i32
    return %c0_i32, %c0_i32_0 : i32, i32
  }
  func.func @transform_7(%arg0: i32) -> (i32, i32) {
    %c0_i32 = arith.constant 0 : i32
    %c0_i32_0 = arith.constant 0 : i32
    %c0_i32_1 = arith.constant 0 : i32
    return %c0_i32, %c0_i32_0 : i32, i32
  }
  func.func @transform_8(%arg0: i32) -> (i32, i32) {
    %c0_i32 = arith.constant 0 : i32
    %c0_i32_0 = arith.constant 0 : i32
    %c0_i32_1 = arith.constant 0 : i32
    return %c0_i32, %c0_i32_0 : i32, i32
  }
  func.func @transform_9(%arg0: i32) -> (i32, i32) {
    %c0_i32 = arith.constant 0 : i32
    %c0_i32_0 = arith.constant 0 : i32
    %c0_i32_1 = arith.constant 0 : i32
    return %c0_i32, %c0_i32_0 : i32, i32
  }
  func.func @transform_10(%arg0: i32) -> i32 {
    %c0_i32 = arith.constant 0 : i32
    %c0_i32_0 = arith.constant 0 : i32
    return %c0_i32 : i32
  }
  func.func @transform_11(%arg0: i32) -> (i32, i32, i32) {
    %c0_i32 = arith.constant 0 : i32
    %c0_i32_0 = arith.constant 0 : i32
    %c0_i32_1 = arith.constant 0 : i32
    return %arg0, %c0_i32, %c0_i32_0 : i32, i32, i32
  }
  func.func @transform_12(%arg0: i32) -> (i32, i32, i32) {
    %c0_i32 = arith.constant 0 : i32
    %c0_i32_0 = arith.constant 0 : i32
    %c0_i32_1 = arith.constant 0 : i32
    return %arg0, %c0_i32, %c0_i32_0 : i32, i32, i32
  }
}

</mosaic_0001>

<bundles_post_ra>
// kernel: encoder_layer_forward.1
= control target key start
LH: loop header
LB: loop body
LE: loop exit
PB: predicated region body
PF: predicated region fallthrough
CT: control target
= control target key end

     0   :  { %18 = vsyncpa [#allocation4], 0  ;;  %s3353_s0 = inlined_call_operand.vmem [shape: f32[4,8,32], index: 0, kind: input, shape index: {}]   ;;  %s3354_s1 = inlined_call_operand.hbm [shape: f32[4,8,8], index: 1, kind: input, shape index: {}]   ;;  %s3355_s2 = inlined_call_operand.vmem [shape: f32[32,192], index: 2, kind: input, shape index: {}]   ;;  %s3356_s3 = inlined_call_operand.vmem [shape: f32[1,192], index: 3, kind: input, shape index: {}]   ;;  %s3357_s4 = inlined_call_operand.vmem [shape: f32[64,32], index: 4, kind: input, shape index: {}]   ;;  %s3358_s5 = inlined_call_operand.vmem [shape: f32[1,32], index: 5, kind: input, shape index: {}]   ;;  %s3359_s6 = inlined_call_operand.vmem [shape: f32[1,32], index: 6, kind: input, shape index: {}]   ;;  %s3360_s7 = inlined_call_operand.vmem [shape: f32[1,32], index: 7, kind: input, shape index: {}]   ;;  %s3361_s8 = inlined_call_operand.hbm [shape: f32[32,64], index: 8, kind: input, shape index: {}]   ;;  %s3362_s9 = inlined_call_operand.vmem [shape: f32[1,64], index: 9, kind: input, shape index: {}]   ;;  %s3363_s10 = inlined_call_operand.vmem [shape: f32[4], index: 10, kind: input, shape index: {}]   ;;  %s3364_s11 = inlined_call_operand.hbm [shape: f32[4,8,32], index: 11, kind: output, shape index: {0}]   ;;  %s3365_s12 = inlined_call_operand.hbm [shape: f32[4,8,8], index: 12, kind: output, shape index: {1}]  }
   0x1   :  { %19 = vsyncpa [#allocation8], 0 }
   0x2   :  { %20 = vsyncpa [#allocation6], 0 }
   0x3   :  { %21 = vsyncpa [#allocation5], 0 }
   0x4   :  { %22 = vsyncpa [#allocation12], 0  ;;  %s29_s23 = sshll.u32 %s3354_s1, 4  ;;  %s2683_s24 = smov [#allocation3]   ;;  %s30_s23 = int_to_ptr.hbm [resolvable:$true] %s29_s23 }
   0x5   :  { %s31_s25 = sshll.u32 %s2683_s24, 4  ;;  %s54_s28 = sshll.u32 %s3361_s8, 4  ;;  %s32_s25 = int_to_ptr.vmem [resolvable:$true] %s31_s25  ;;  %s55_s28 = int_to_ptr.hbm [resolvable:$true] %s54_s28 }
   0x6   :  { %s2684_s29 = smov 128   ;;  %s2685_s30 = smov 8  }
   0x7   :  { %37 = dma.hbm_to_vmem [thread:$0]  %s30_s23, 512, %s32_s25, [#allocation4], %s2684_s29, %s2684_s29, %s2685_s30  }
   0x8   :  { %s2686_s13 = smov [#allocation7]   ;;  %s70_s1 = sshll.u32 %s3363_s10, 4  ;;  %s71_s1 = int_to_ptr.vmem [resolvable:$true] %s70_s1 }
   0x9   :  { %s56_s14 = sshll.u32 %s2686_s13, 4  ;;  %s2687_s8 = smov [#allocation9]   ;;  %s57_s14 = int_to_ptr.vmem [resolvable:$true] %s56_s14 }
   0xa   :  { %62 = dma.hbm_to_vmem [thread:$0]  %s55_s28, 512, %s57_s14, [#allocation8], %s2684_s29, %s2684_s29, %s2685_s30  }
   0xb   :  { %73 = dma.vmem_to_smem %s71_s1, 16, %s2687_s8, [#allocation6]  }
   0xc   :  { %2673 = dma.done.wait [#allocation4], 512  }
   0xd   :  { %2674 = vsyncadd [#allocation4], 4294966784 }
   0xe   :  { %2675 = dma.done.wait [#allocation8], 512  }
   0xf   :  { %2676 = vsyncadd [#allocation8], 4294966784 }
  0x10   :  { %2677 = dma.done.wait [#allocation6], 16  }
  0x11   :  { %2678 = vsyncadd [#allocation6], 4294967280 }
  0x12   :  { %86 = sfence }
  0x13   :  { %v97_v0 = vld [vmem:[%s3355_s2 + $0x30] sm:$0xff]  ;;  %v95_v1 = vld [vmem:[%s3355_s2 + $0x20] sm:$0xff]  ;;  %v98_v2 = vld [vmem:[%s3355_s2 + $0x38] sm:$0xff]  ;;  %vm105_vm0 = vcmask 261120   ;;  %s2688_s18 = smov 112   ;;  %s2690_s10 = smov 64  }
  0x14   :  { %130 = vmatpush.msra.mxu0 %v97_v0  ;;  %v93_v3 = vld [vmem:[%s3355_s2 + $0x10] sm:$0xff]  ;;  %159 = vmatpush.msra.mxu1 %v98_v2  ;;  %v96_v4 = vld [vmem:[%s3355_s2 + $0x28] sm:$0xff]  ;;  %v94_v5 = vld [vmem:[%s3355_s2 + $0x18] sm:$0xff]  ;;  %s2691_s19 = smov 32   ;;  %s2692_s20 = smov 96   ;;  %vm179_vm1 = vcmask 130048  }
  0x15   :  { %v91_v6 = vld [vmem:[%s3355_s2] sm:$0xff]  ;;  %v92_v8 = vld [vmem:[%s3355_s2 + $0x8] sm:$0xff]  ;;  %s2689_s2 = smov 48   ;;  %s2694_s21 = smov 80   ;;  %vm205_vm2 = vcmask 64512   ;;  %v89_v29 = vld [vmem:[%s3353_s0 + $0x10] sm:$0xff] }
  0x16   :  { %131 = vmatpush.msra.mxu0 %v95_v1  ;;  %160 = vmatpush.msra.mxu1 %v96_v4  ;;  %v87_v7 = vld [vmem:[%s3353_s0] sm:$0xff]  ;;  %v88_v18 = vld [vmem:[%s3353_s0 + $0x8] sm:$0xff]  ;;  %v90_v31 = vld [vmem:[%s3353_s0 + $0x18] sm:$0xff]  ;;  %vm312_vm3 = vcmask 261248   ;;  %vm384_vm4 = vcmask 392448   ;;  %vm456_vm5 = vcmask 523648  }
  0x17   :  { %v99_v9 = vld [vmem:[%s3356_s3] sm:$0x3]  ;;  %s2693_s3 = smov 16   ;;  %s2389_s28 = sld [smem:[#allocation9 + $0x1]]  ;;  %vm1369_vm6 = vcmask 523264  }
  0x18   :  { %132 = vmatpush.msra.mxu0 %v93_v3  ;;  %161 = vmatpush.msra.mxu1 %v94_v5  ;;  %v2810_v10 = vperm.slane %v99_v9, 0  ;;  %v2820_v13 = vperm.slane %v99_v9, 1  ;;  %s2397_s13 = sld [smem:[#allocation9 + $0x2]]  ;;  %s2312_s27 = sshll.u32 %s3365_s12, 4  ;;  %s2313_s27 = int_to_ptr.hbm [resolvable:$true] %s2312_s27 }
  0x19   :  { %s1291_s14 = sld [smem:[#allocation9]] }
  0x1a   :  { %133 = vmatpush.msra.mxu0 %v91_v6  ;;  %162 = vmatpush.msra.mxu1 %v92_v8  ;;  %s2399_s15 = sld [smem:[#allocation9 + $0x3]] }
  0x1b   :  { %2332 = vmatmul.msk.f32.vlgmr.msra.gmra.mxu0 %vm105_vm0, %v87_v7  ;;  %2336 = vmatmul.msk.f32.vlgmr.msra.gmra.mxu1 %vm105_vm0, %v87_v7 }
  0x23   :  { %2333 = vmatmul.msk.f32.gmra.mxu0 %vm105_vm0, %v88_v18  ;;  %2337 = vmatmul.msk.f32.gmra.mxu1 %vm105_vm0, %v88_v18 }
  0x2b   :  { %2334 = vmatmul.msk.f32.gmra.mxu0 %vm105_vm0, %v89_v29  ;;  %2338 = vmatmul.msk.f32.gmra.mxu1 %vm105_vm0, %v89_v29 }
  0x33   :  { %2335 = vmatmul.msk.f32.gmra.mxu0 %vm105_vm0, %v90_v31  ;;  %2339 = vmatmul.msk.f32.gmra.mxu1 %vm105_vm0, %v90_v31 }
  0x98   :  { %v135_v11 = vpop.f32.mrf.mxu0  ;;  %v164_v14 = vpop.f32.mrf.mxu1 }
  0x99   :  { %v136_v12 = vadd.f32 %v135_v11, %v2810_v10  ;;  %v2823_v15 = vadd.f32 %v164_v14, %v2820_v13 }
  0x9b   :  { %241 = vrot.lane.b32.xlu2 %v136_v12, %s2688_s18  ;;  %243 = vrot.lane.b32.xlu1 %v136_v12, %s2689_s2 }
  0x9c   :  { %177 = vrot.lane.b32.xlu0 %v136_v12, %s2690_s10  ;;  %235 = vmatpush.msra.mxu3 %v2823_v15 }
  0xa0   :  { %v138_v22 = vpop.f32.mrf.mxu0 }
  0xa1   :  { %v139_v23 = vadd.f32 %v138_v22, %v2810_v10 }
  0xa3   :  { %316 = vrot.lane.b32.xlu2 %v136_v12, %s2691_s19 }
  0xa8   :  { %v141_v42 = vpop.f32.mrf.mxu0 }
  0xa9   :  { %v2861_v43 = vadd.f32 %v141_v42, %v2810_v10 }
  0xab   :  { %314 = vrot.lane.b32.xlu2 %v136_v12, %s2692_s20 }
  0xb0   :  { %v144_v45 = vpop.f32.mrf.mxu0 }
  0xb1   :  { %v2872_v46 = vadd.f32 %v144_v45, %v2810_v10 }
  0xb3   :  { %388 = vrot.lane.b32.xlu2 %v136_v12, %s2693_s3 }
  0xbb   :  { %386 = vrot.lane.b32.xlu2 %v136_v12, %s2694_s21 }
  0xc3   :  { %595 = vrot.lane.b32.xlu2 %v139_v23, %s2691_s19 }
  0xcb   :  { %523 = vrot.lane.b32.xlu2 %v139_v23, %s2689_s2 }
  0xd3   :  { %664 = vrot.lane.b32.xlu2 %v139_v23, %s2694_s21 }
  0xdb   :  { %941 = vrot.lane.b32.xlu2 %v2861_v43, %s2694_s21 }
  0xe3   :  { %1075 = vrot.lane.b32.xlu2 %v2872_v46, %s2688_s18 }
  0xf5   :  { %v242_v30 = vpop.permute.xlu2 %241 }
  0xfd   :  { %v317_v32 = vpop.permute.xlu2 %316 }
 0x105   :  { %v315_v33 = vpop.permute.xlu2 %314 }
 0x10d   :  { %v244_v16 = vpop.permute.xlu1 %243  ;;  %v389_v34 = vpop.permute.xlu2 %388 }
 0x10e   :  { %v178_v17 = vpop.permute.xlu0 %177  ;;  %2343 = vmatpush.xpose.msk.msrb.mxu3 %vm179_vm1, %v244_v16 }
 0x10f   :  { %2340 = vmatpush.xpose.msk.msra.mxu2 %vm179_vm1, %v178_v17 }
 0x112   :  { %2341 = vmatmul.msk.f32.vlgmr.msra.gmra.mxu2 %vm179_vm1, %v136_v12 }
 0x115   :  { %v387_v35 = vpop.permute.xlu2 %386 }
 0x11d   :  { %v596_v36 = vpop.permute.xlu2 %595 }
 0x125   :  { %v524_v37 = vpop.permute.xlu2 %523 }
 0x126   :  { %2355 = vmatpush.xpose.msk.msrb.mxu0 %vm179_vm1, %v524_v37 }
 0x12d   :  { %v665_v49 = vpop.permute.xlu2 %664 }
 0x135   :  { %v942_v58 = vpop.permute.xlu2 %941 }
 0x13d   :  { %v1076_v10 = vpop.permute.xlu2 %1075 }
 0x195   :  { %v201_v19 = vpop.f32.mrf.mxu2 }
 0x196   :  { %v204_v20 = vmul.f32 0.25, %v201_v19 }
 0x198   :  { %v206_v21 = vsel %vm205_vm2, %v204_v20, -inf }
 0x199   :  { %207 = vmax.xlane.f32.xlu0 %v206_v21 }
 0x1ad   :  { %666 = vrot.lane.b32.xlu0 %v139_v23, %s2693_s3 }
 0x1b5   :  { %800 = vrot.lane.b32.xlu0 %v2861_v43, %s2689_s2 }
 0x1bd   :  { %798 = vrot.lane.b32.xlu0 %v2861_v43, %s2688_s18 }
 0x1c5   :  { %1077 = vrot.lane.b32.xlu0 %v2872_v46, %s2689_s2 }
 0x20c   :  { %v208_v24 = vpop.xlane.xlu0 %207 }
 0x20d   :  { %v209_v25 = vsub.f32 %v204_v20, %v208_v24 }
 0x20f   :  { %v210_v26 = vmul.f32 1.442695, %v209_v25 }
 0x211   :  { %2455 = vpow2.f32 %v210_v26 }
 0x217   :  { %v2456_v27 = vpop.eup %2455 }
 0x218   :  { %v212_v28 = vsel %vm205_vm2, %v2456_v27, 0.0 }
 0x219   :  { %213 = vadd.xlane.f32.xlu1 %v212_v28 }
 0x21f   :  { %v667_v38 = vpop.permute.xlu0 %666 }
 0x220   :  { %2361 = vmatpush.xpose.msk.msra.mxu0 %vm179_vm1, %v667_v38 }
 0x227   :  { %v801_v53 = vpop.permute.xlu0 %800 }
 0x22f   :  { %v799_v57 = vpop.permute.xlu0 %798 }
 0x232   :  { %459 = vrot.lane.b32.xlu1 %v139_v23, %s2690_s10 }
 0x237   :  { %v1078_v9 = vpop.permute.xlu0 %1077 }
 0x23a   :  { %593 = vrot.lane.b32.xlu1 %v139_v23, %s2692_s20 }
 0x242   :  { %521 = vrot.lane.b32.xlu1 %v139_v23, %s2688_s18 }
 0x24a   :  { %943 = vrot.lane.b32.xlu1 %v2861_v43, %s2693_s3 }
 0x28c   :  { %v214_v39 = vpop.xlane.xlu1 %213 }
 0x28d   :  { %2457 = vrcp.f32 %v214_v39 }
 0x293   :  { %v2458_v40 = vpop.eup %2457 }
 0x294   :  { %v216_v41 = vmul.f32 %v2458_v40, %v2456_v27  ;;  %v167_v27 = vpop.f32.mrf.mxu1 }
 0x295   :  { %v2927_v29 = vadd.f32 %v167_v27, %v2820_v13 }
 0x296   :  { %2342 = vmatmul.msk.f32.vlgmr.msra.gmra.mxu3 %vm205_vm2, %v216_v41 }
 0x297   :  { %2346 = vmatpush.xpose.msk.msra.mxu3 %vm179_vm1, %v317_v32 }
 0x29e   :  { %2344 = vmatmul.msk.f32.vlgmr.msrb.gmra.mxu3 %vm179_vm1, %v242_v30 }
 0x29f   :  { %2349 = vmatpush.xpose.msk.msrb.mxu3 %vm179_vm1, %v389_v34 }
 0x2a4   :  { %v460_v44 = vpop.permute.xlu1 %459 }
 0x2a6   :  { %2347 = vmatmul.msk.f32.vlgmr.msra.gmra.mxu3 %vm179_vm1, %v315_v33 }
 0x2a7   :  { %2352 = vmatpush.xpose.msk.msra.mxu3 %vm179_vm1, %v460_v44 }
 0x2ac   :  { %v594_v47 = vpop.permute.xlu1 %593 }
 0x2ae   :  { %2350 = vmatmul.msk.f32.vlgmr.msrb.gmra.mxu3 %vm179_vm1, %v387_v35 }
 0x2af   :  { %2358 = vmatpush.xpose.msk.msrb.mxu3 %vm179_vm1, %v596_v36 }
 0x2b4   :  { %v522_v48 = vpop.permute.xlu1 %521 }
 0x2b5   :  { %2356 = vmatmul.msk.f32.vlgmr.msrb.gmra.mxu0 %vm179_vm1, %v522_v48 }
 0x2b6   :  { %2353 = vmatmul.msk.f32.vlgmr.msra.gmra.mxu3 %vm179_vm1, %v139_v23  ;;  %2367 = vmatpush.xpose.msk.msrb.mxu0 %vm179_vm1, %v801_v53 }
 0x2bc   :  { %v944_v54 = vpop.permute.xlu1 %943 }
 0x2bd   :  { %2362 = vmatmul.msk.f32.vlgmr.msra.gmra.mxu0 %vm179_vm1, %v665_v49 }
 0x2be   :  { %2359 = vmatmul.msk.f32.vlgmr.msrb.gmra.mxu3 %vm179_vm1, %v594_v47  ;;  %2373 = vmatpush.xpose.msk.msra.mxu0 %vm179_vm1, %v944_v54 }
 0x2c5   :  { %2368 = vmatmul.msk.f32.vlgmr.msrb.gmra.mxu0 %vm179_vm1, %v799_v57 }
 0x2c6   :  { %2379 = vmatpush.xpose.msk.msrb.mxu0 %vm179_vm1, %v1078_v9 }
 0x2cd   :  { %2374 = vmatmul.msk.f32.vlgmr.msra.gmra.mxu0 %vm179_vm1, %v942_v58 }
 0x2d5   :  { %2380 = vmatmul.msk.f32.vlgmr.msrb.gmra.mxu0 %vm179_vm1, %v1076_v10 }
 0x319   :  { %v237_v50 = vpop.f32.mrf.mxu3 }
 0x31a   :  { %240 = vst.msk [vmem:[#allocation2] sm:$0xff] %vm179_vm1, %v237_v50 }
 0x321   :  { %v266_v51 = vpop.f32.mrf.mxu3 }
 0x322   :  { %v269_v52 = vmul.f32 0.25, %v266_v51 }
 0x324   :  { %v270_v55 = vsel %vm205_vm2, %v269_v52, -inf }
 0x325   :  { %271 = vmax.xlane.f32.xlu1 %v270_v55 }
 0x329   :  { %v339_v56 = vpop.f32.mrf.mxu3 }
 0x32a   :  { %v2897_v1 = vmul.f32 0.25, %v339_v56 }
 0x32c   :  { %v343_v7 = vsel %vm205_vm2, %v2897_v1, -inf }
 0x331   :  { %v411_v59 = vpop.f32.mrf.mxu3 }
 0x332   :  { %v2891_v60 = vmul.f32 0.25, %v411_v59  ;;  %v546_v61 = vpop.f32.mrf.mxu0 }
 0x333   :  { %v549_v62 = vmul.f32 0.25, %v546_v61 }
 0x334   :  { %v415_v63 = vsel %vm205_vm2, %v2891_v60, -inf }
 0x335   :  { %416 = vmax.xlane.f32.xlu0 %v415_v63  ;;  %v550_v0 = vsel %vm205_vm2, %v549_v62, -inf }
 0x336   :  { %551 = vmax.xlane.f32.xlu2 %v550_v0 }
 0x339   :  { %v482_v2 = vpop.f32.mrf.mxu3 }
 0x33a   :  { %v2899_v3 = vmul.f32 0.25, %v482_v2  ;;  %v689_v4 = vpop.f32.mrf.mxu0 }
 0x33b   :  { %v692_v5 = vmul.f32 0.25, %v689_v4 }
 0x33c   :  { %v486_v6 = vsel %vm205_vm2, %v2899_v3, -inf }
 0x33d   :  { %487 = vmax.xlane.f32.xlu1 %v486_v6  ;;  %v693_v8 = vsel %vm205_vm2, %v692_v5, -inf }
 0x33e   :  { %344 = vmax.xlane.f32.xlu2 %v343_v7  ;;  %694 = vmax.xlane.f32.xlu0 %v693_v8 }
 0x341   :  { %v618_v32 = vpop.f32.mrf.mxu3 }
 0x342   :  { %v621_v35 = vmul.f32 0.25, %v618_v32  ;;  %v823_v39 = vpop.f32.mrf.mxu0 }
 0x344   :  { %v622_v36 = vsel %vm205_vm2, %v621_v35, -inf }
 0x34a   :  { %v966_v40 = vpop.f32.mrf.mxu0 }
 0x34b   :  { %v2949_v42 = vmul.f32 0.25, %v966_v40 }
 0x34d   :  { %v970_v45 = vsel %vm205_vm2, %v2949_v42, -inf }
 0x356   :  { %1220 = vrot.lane.b32.xlu1 %v2872_v46, %s2693_s3  ;;  %1218 = vrot.lane.b32.xlu2 %v2872_v46, %s2694_s21 }
 0x35e   :  { %282 = vrot.lane.b32.xlu2 %v2823_v15, %s2688_s18 }
 0x366   :  { %354 = vrot.lane.b32.xlu2 %v2823_v15, %s2692_s20 }
 0x36e   :  { %426 = vrot.lane.b32.xlu2 %v2823_v15, %s2694_s21 }
 0x398   :  { %v272_v11 = vpop.xlane.xlu1 %271 }
 0x399   :  { %v273_v12 = vsub.f32 %v269_v52, %v272_v11 }
 0x39b   :  { %v274_v14 = vmul.f32 1.442695, %v273_v12  ;;  %v1100_v12 = vpop.f32.mrf.mxu0 }
 0x39d   :  { %2459 = vpow2.f32 %v274_v14  ;;  %v826_v14 = vmul.f32 0.25, %v823_v39 }
 0x3a3   :  { %v2918_v16 = vpop.eup %2459 }
 0x3a4   :  { %v276_v17 = vsel %vm205_vm2, %v2918_v16, 0.0 }
 0x3a5   :  { %277 = vadd.xlane.f32.xlu1 %v276_v17  ;;  %v827_v17 = vsel %vm205_vm2, %v826_v14, -inf }
 0x3a8   :  { %v417_v18 = vpop.xlane.xlu0 %416 }
 0x3a9   :  { %v552_v19 = vpop.xlane.xlu2 %551  ;;  %v418_v47 = vsub.f32 %v2891_v60, %v417_v18 }
 0x3aa   :  { %v553_v20 = vsub.f32 %v549_v62, %v552_v19 }
 0x3ab   :  { %v419_v48 = vmul.f32 1.442695, %v418_v47 }
 0x3ac   :  { %v554_v21 = vmul.f32 1.442695, %v553_v20 }
 0x3ae   :  { %2461 = vpow2.f32 %v554_v21 }
 0x3b0   :  { %v488_v33 = vpop.xlane.xlu1 %487 }
 0x3b1   :  { %v345_v22 = vpop.xlane.xlu2 %344  ;;  %v695_v23 = vpop.xlane.xlu0 %694  ;;  %v489_v50 = vsub.f32 %v2899_v3, %v488_v33 }
 0x3b2   :  { %v696_v24 = vsub.f32 %v692_v5, %v695_v23  ;;  %v346_v41 = vsub.f32 %v2897_v1, %v345_v22 }
 0x3b3   :  { %v490_v52 = vmul.f32 1.442695, %v489_v50 }
 0x3b4   :  { %v2922_v25 = vpop.eup %2461  ;;  %v697_v15 = vmul.f32 1.442695, %v696_v24  ;;  %v347_v44 = vmul.f32 1.442695, %v346_v41 }
 0x3b5   :  { %v556_v26 = vsel %vm205_vm2, %v2922_v25, 0.0 }
 0x3b6   :  { %557 = vadd.xlane.f32.xlu0 %v556_v26  ;;  %2463 = vpow2.f32 %v697_v15  ;;  %v1103_v26 = vmul.f32 0.25, %v1100_v12 }
 0x3b7   :  { %2465 = vpow2.f32 %v347_v44 }
 0x3b8   :  { %2467 = vpow2.f32 %v419_v48 }
 0x3b9   :  { %v1219_v28 = vpop.permute.xlu2 %1218  ;;  %2469 = vpow2.f32 %v490_v52 }
 0x3bc   :  { %v2929_v30 = vpop.eup %2463 }
 0x3bd   :  { %v699_v31 = vsel %vm205_vm2, %v2929_v30, 0.0  ;;  %v2954_v49 = vpop.eup %2465 }
 0x3be   :  { %562 = vrot.lane.b32.xlu1 %v2927_v29, %s2688_s18  ;;  %700 = vadd.xlane.f32.xlu0 %v699_v31  ;;  %v349_v51 = vsel %vm205_vm2, %v2954_v49, 0.0  ;;  %v2959_v53 = vpop.eup %2467 }
 0x3bf   :  { %v421_v54 = vsel %vm205_vm2, %v2959_v53, 0.0  ;;  %v2963_v56 = vpop.eup %2469 }
 0x3c0   :  { %v492_v57 = vsel %vm205_vm2, %v2963_v56, 0.0 }
 0x3c1   :  { %v283_v34 = vpop.permute.xlu2 %282 }
 0x3c2   :  { %303 = vmatpush.msrb.mxu2 %v283_v34 }
 0x3c6   :  { %704 = vrot.lane.b32.xlu1 %v2927_v29, %s2694_s21  ;;  %623 = vmax.xlane.f32.xlu0 %v622_v36 }
 0x3c8   :  { %v1221_v37 = vpop.permute.xlu1 %1220 }
 0x3c9   :  { %v355_v38 = vpop.permute.xlu2 %354  ;;  %2385 = vmatpush.xpose.msk.msra.mxu0 %vm179_vm1, %v1221_v37  ;;  %v170_v37 = vpop.f32.mrf.mxu1 }
 0x3ca   :  { %375 = vmatpush.msra.mxu2 %v355_v38  ;;  %v3001_v38 = vadd.f32 %v170_v37, %v2820_v13 }
 0x3cc   :  { %2386 = vmatmul.msk.f32.vlgmr.msra.gmra.mxu0 %vm179_vm1, %v1219_v28  ;;  %v1104_v28 = vsel %vm205_vm2, %v1103_v26, -inf }
 0x3ce   :  { %870 = vrot.lane.b32.xlu1 %v2861_v43, %s2692_s20 }
 0x3d1   :  { %v427_v60 = vpop.permute.xlu2 %426  ;;  %v173_v39 = vpop.f32.mrf.mxu1 }
 0x3d6   :  { %1147 = vrot.lane.b32.xlu1 %v2872_v46, %s2692_s20 }
 0x3da   :  { %633 = vrot.lane.b32.xlu0 %v2927_v29, %s2692_s20 }
 0x3e2   :  { %736 = vrot.lane.b32.xlu0 %v2861_v43, %s2690_s10 }
 0x400   :  { %971 = vmax.xlane.f32.xlu1 %v970_v45 }
 0x40c   :  { %350 = vadd.xlane.f32.xlu0 %v349_v51 }
 0x414   :  { %422 = vadd.xlane.f32.xlu0 %v421_v54 }
 0x418   :  { %v278_v55 = vpop.xlane.xlu1 %277 }
 0x419   :  { %2471 = vrcp.f32 %v278_v55 }
 0x41c   :  { %493 = vadd.xlane.f32.xlu0 %v492_v57  ;;  %v3019_v57 = vadd.f32 %v173_v39, %v2820_v13 }
 0x41f   :  { %v2472_v58 = vpop.eup %2471 }
 0x420   :  { %v280_v59 = vmul.f32 %v2472_v58, %v2918_v16 }
 0x422   :  { %2345 = vmatmul.msk.f32.vlgmr.msrb.gmra.mxu2 %vm205_vm2, %v280_v59 }
 0x423   :  { %447 = vmatpush.msrb.mxu2 %v427_v60 }
 0x429   :  { %v558_v61 = vpop.xlane.xlu0 %557 }
 0x42a   :  { %2473 = vrcp.f32 %v558_v61 }
 0x430   :  { %v2474_v62 = vpop.eup %2473  ;;  %v563_v63 = vpop.permute.xlu1 %562  ;;  %872 = vrot.lane.b32.xlu0 %v2861_v43, %s2691_s19 }
 0x431   :  { %583 = vmatpush.msrb.mxu1 %v563_v63  ;;  %v560_v0 = vmul.f32 %v2474_v62, %v2922_v25  ;;  %v701_v1 = vpop.xlane.xlu0 %700 }
 0x432   :  { %2475 = vrcp.f32 %v701_v1 }
 0x433   :  { %2357 = vmatmul.msk.f32.vlgmr.msrb.gmra.mxu1 %vm205_vm2, %v560_v0 }
 0x438   :  { %v705_v2 = vpop.permute.xlu1 %704  ;;  %v2476_v3 = vpop.eup %2475  ;;  %1149 = vrot.lane.b32.xlu0 %v2872_v46, %s2691_s19 }
 0x439   :  { %725 = vmatpush.msra.mxu1 %v705_v2  ;;  %v703_v4 = vmul.f32 %v2476_v3, %v2929_v30  ;;  %v624_v5 = vpop.xlane.xlu0 %623 }
 0x43a   :  { %v625_v6 = vsub.f32 %v621_v35, %v624_v5 }
 0x43b   :  { %2363 = vmatmul.msk.f32.vlgmr.msra.gmra.mxu1 %vm205_vm2, %v703_v4 }
 0x43c   :  { %v626_v7 = vmul.f32 1.442695, %v625_v6 }
 0x43e   :  { %2477 = vpow2.f32 %v626_v7 }
 0x440   :  { %v871_v16 = vpop.permute.xlu1 %870 }
 0x444   :  { %v2478_v8 = vpop.eup %2477 }
 0x445   :  { %v628_v9 = vsel %vm205_vm2, %v2478_v8, 0.0 }
 0x446   :  { %629 = vadd.xlane.f32.xlu2 %v628_v9 }
 0x448   :  { %v1148_v21 = vpop.permute.xlu1 %1147 }
 0x449   :  { %v1243_v18 = vpop.f32.mrf.mxu0 }
 0x44a   :  { %v2984_v19 = vmul.f32 0.25, %v1243_v18 }
 0x44c   :  { %v634_v10 = vpop.permute.xlu0 %633  ;;  %v1247_v20 = vsel %vm205_vm2, %v2984_v19, -inf }
 0x454   :  { %v737_v11 = vpop.permute.xlu0 %736 }
 0x455   :  { %2364 = vmatpush.xpose.msk.msra.mxu3 %vm179_vm1, %v737_v11 }
 0x458   :  { %2365 = vmatmul.msk.f32.vlgmr.msra.gmra.mxu3 %vm179_vm1, %v2861_v43 }
 0x45e   :  { %1013 = vrot.lane.b32.xlu2 %v2872_v46, %s2690_s10 }
 0x462   :  { %828 = vmax.xlane.f32.xlu0 %v827_v17 }
 0x46a   :  { %1248 = vmax.xlane.f32.xlu0 %v1247_v20 }
 0x473   :  { %v972_v22 = vpop.xlane.xlu1 %971 }
 0x474   :  { %v973_v43 = vsub.f32 %v2949_v42, %v972_v22 }
 0x476   :  { %v974_v23 = vmul.f32 1.442695, %v973_v43 }
 0x478   :  { %2479 = vpow2.f32 %v974_v23 }
 0x47e   :  { %v2989_v24 = vpop.eup %2479 }
 0x47f   :  { %v976_v25 = vsel %vm205_vm2, %v2989_v24, 0.0  ;;  %v351_v15 = vpop.xlane.xlu0 %350 }
 0x480   :  { %977 = vadd.xlane.f32.xlu0 %v976_v25  ;;  %2481 = vrcp.f32 %v351_v15 }
 0x486   :  { %v2482_v27 = vpop.eup %2481 }
 0x487   :  { %v353_v30 = vmul.f32 %v2482_v27, %v2954_v49  ;;  %1105 = vmax.xlane.f32.xlu2 %v1104_v28  ;;  %v423_v31 = vpop.xlane.xlu0 %422 }
 0x488   :  { %2483 = vrcp.f32 %v423_v31 }
 0x489   :  { %2348 = vmatmul.msk.f32.vlgmr.msra.gmra.mxu2 %vm205_vm2, %v353_v30 }
 0x48a   :  { %515 = vmatpush.msra.mxu2 %v2927_v29 }
 0x48e   :  { %v2484_v32 = vpop.eup %2483 }
 0x48f   :  { %v425_v33 = vmul.f32 %v2484_v32, %v2959_v53  ;;  %v494_v34 = vpop.xlane.xlu0 %493 }
 0x490   :  { %2485 = vrcp.f32 %v494_v34 }
 0x491   :  { %2351 = vmatmul.msk.f32.vlgmr.msrb.gmra.mxu2 %vm205_vm2, %v425_v33 }
 0x492   :  { %654 = vmatpush.msrb.mxu2 %v634_v10 }
 0x496   :  { %v2486_v35 = vpop.eup %2485 }
 0x497   :  { %v496_v36 = vmul.f32 %v2486_v35, %v2963_v56 }
 0x499   :  { %2354 = vmatmul.msk.f32.vlgmr.msra.gmra.mxu2 %vm205_vm2, %v496_v36 }
 0x49a   :  { %792 = vmatpush.msra.mxu2 %v3001_v38 }
 0x4a2   :  { %v873_v29 = vpop.permute.xlu0 %872 }
 0x4a3   :  { %2370 = vmatpush.xpose.msk.msrb.mxu3 %vm179_vm1, %v873_v29 }
 0x4a5   :  { %v305_v41 = vpop.f32.mrf.mxu2 }
 0x4a6   :  { %2371 = vmatmul.msk.f32.vlgmr.msrb.gmra.mxu3 %vm179_vm1, %v871_v16 }
 0x4aa   :  { %v1150_v48 = vpop.permute.xlu0 %1149 }
 0x4b0   :  { %v585_v40 = vpop.f32.mrf.mxu1 }
 0x4b1   :  { %589 = vrot.lane.b32.xlu0 %v585_v40, %s2693_s3 }
 0x4b8   :  { %v727_v62 = vpop.f32.mrf.mxu1 }
 0x4b9   :  { %309 = vrot.lane.b32.xlu0 %v305_v41, %s2693_s3  ;;  %v630_v42 = vpop.xlane.xlu2 %629 }
 0x4ba   :  { %2487 = vrcp.f32 %v630_v42 }
 0x4c0   :  { %v2488_v44 = vpop.eup %2487 }
 0x4c1   :  { %v632_v45 = vmul.f32 %v2488_v44, %v2478_v8  ;;  %v1014_v47 = vpop.permute.xlu2 %1013 }
 0x4c2   :  { %2376 = vmatpush.xpose.msk.msra.mxu3 %vm179_vm1, %v1014_v47 }
 0x4c3   :  { %2360 = vmatmul.msk.f32.vlgmr.msrb.gmra.mxu2 %vm205_vm2, %v632_v45 }
 0x4c5   :  { %2377 = vmatmul.msk.f32.vlgmr.msra.gmra.mxu3 %vm179_vm1, %v2872_v46 }
 0x4c6   :  { %2382 = vmatpush.xpose.msk.msrb.mxu3 %vm179_vm1, %v1150_v48 }
 0x4cd   :  { %2383 = vmatmul.msk.f32.vlgmr.msrb.gmra.mxu3 %vm179_vm1, %v1148_v21 }
 0x4d5   :  { %v829_v49 = vpop.xlane.xlu0 %828 }
 0x4d6   :  { %v830_v50 = vsub.f32 %v826_v14, %v829_v49 }
 0x4d8   :  { %v831_v51 = vmul.f32 1.442695, %v830_v50 }
 0x4da   :  { %2489 = vpow2.f32 %v831_v51  ;;  %v3077_v51 = vld [vmem:[#allocation3 + $0x8] sm:$0xff] }
 0x4db   :  { %v759_v3 = vpop.f32.mrf.mxu3 }
 0x4dc   :  { %v762_v6 = vmul.f32 0.25, %v759_v3 }
 0x4dd   :  { %v1249_v60 = vpop.xlane.xlu0 %1248 }
 0x4de   :  { %v1250_v2 = vsub.f32 %v2984_v19, %v1249_v60  ;;  %v763_v9 = vsel %vm205_vm2, %v762_v6, -inf }
 0x4e0   :  { %v2490_v52 = vpop.eup %2489  ;;  %v1251_v4 = vmul.f32 1.442695, %v1250_v2 }
 0x4e1   :  { %v833_v53 = vsel %vm205_vm2, %v2490_v52, 0.0 }
 0x4e2   :  { %834 = vadd.xlane.f32.xlu1 %v833_v53 }
 0x4f3   :  { %v978_v13 = vpop.xlane.xlu0 %977 }
 0x4fa   :  { %v1106_v54 = vpop.xlane.xlu2 %1105 }
 0x4fb   :  { %v1107_v55 = vsub.f32 %v1103_v26, %v1106_v54  ;;  %839 = vrot.lane.b32.xlu1 %v3001_v38, %s2688_s18 }
 0x4fd   :  { %v1108_v56 = vmul.f32 1.442695, %v1107_v55 }
 0x4ff   :  { %2491 = vpow2.f32 %v1108_v56 }
 0x500   :  { %2493 = vpow2.f32 %v1251_v4 }
 0x503   :  { %1116 = vrot.lane.b32.xlu1 %v3019_v57, %s2688_s18 }
 0x505   :  { %v3023_v46 = vpop.eup %2491 }
 0x506   :  { %v1110_v58 = vsel %vm205_vm2, %v3023_v46, 0.0  ;;  %v3038_v7 = vpop.eup %2493 }
 0x507   :  { %1111 = vadd.xlane.f32.xlu2 %v1110_v58  ;;  %v1253_v10 = vsel %vm205_vm2, %v3038_v7, 0.0 }
 0x50c   :  { %v377_v59 = vpop.f32.mrf.mxu2 }
 0x50d   :  { %381 = vrot.lane.b32.xlu1 %v377_v59, %s2691_s19 }
 0x514   :  { %v449_v61 = vpop.f32.mrf.mxu2 }
 0x515   :  { %453 = vrot.lane.b32.xlu0 %v449_v61, %s2689_s2  ;;  %1258 = vrot.lane.b32.xlu1 %v3019_v57, %s2694_s21 }
 0x51c   :  { %v517_v63 = vpop.f32.mrf.mxu2 }
 0x51d   :  { %520 = vst.msk [vmem:[#allocation2 + $0x8] sm:$0xff] %vm179_vm1, %v517_v63  ;;  %731 = vrot.lane.b32.xlu0 %v727_v62, %s2689_s2 }
 0x51f   :  { %981 = vrot.lane.b32.xlu2 %v3001_v38, %s2694_s21 }
 0x523   :  { %v590_v0 = vpop.permute.xlu0 %589 }
 0x524   :  { %592 = vst.msk [vmem:[#allocation2 + $0x8] sm:$0xff] %vm312_vm3, %v590_v0 }
 0x529   :  { %v895_v5 = vpop.f32.mrf.mxu3 }
 0x52a   :  { %v3049_v21 = vmul.f32 0.25, %v895_v5 }
 0x52b   :  { %v310_v1 = vpop.permute.xlu0 %309 }
 0x52c   :  { %313 = vst.msk [vmem:[#allocation2] sm:$0xff] %vm312_vm3, %v310_v1  ;;  %v899_v23 = vsel %vm205_vm2, %v3049_v21, -inf }
 0x546   :  { %v656_v8 = vpop.f32.mrf.mxu2 }
 0x547   :  { %764 = vmax.xlane.f32.xlu0 %v763_v9  ;;  %660 = vrot.lane.b32.xlu1 %v656_v8, %s2691_s19 }
 0x548   :  { %v1036_v11 = vpop.f32.mrf.mxu3  ;;  %1254 = vadd.xlane.f32.xlu2 %v1253_v10 }
 0x549   :  { %v1039_v12 = vmul.f32 0.25, %v1036_v11 }
 0x54b   :  { %v1040_v14 = vsel %vm205_vm2, %v1039_v12, -inf }
 0x550   :  { %v1172_v16 = vpop.f32.mrf.mxu3  ;;  %1041 = vmax.xlane.f32.xlu2 %v1040_v14 }
 0x551   :  { %v3045_v17 = vmul.f32 0.25, %v1172_v16 }
 0x553   :  { %v1176_v18 = vsel %vm205_vm2, %v3045_v17, -inf }
 0x555   :  { %v835_v19 = vpop.xlane.xlu1 %834 }
 0x556   :  { %2495 = vrcp.f32 %v835_v19 }
 0x557   :  { %2497 = vrcp.f32 %v978_v13 }
 0x558   :  { %1177 = vmax.xlane.f32.xlu2 %v1176_v18 }
 0x55c   :  { %v2496_v20 = vpop.eup %2495 }
 0x55d   :  { %v837_v22 = vmul.f32 %v2496_v20, %v2490_v52  ;;  %v2498_v26 = vpop.eup %2497 }
 0x55e   :  { %v980_v28 = vmul.f32 %v2498_v26, %v2989_v24  ;;  %v3062_v24 = vld [vmem:[#allocation3] sm:$0xff] }
 0x56d   :  { %v840_v43 = vpop.permute.xlu1 %839 }
 0x56e   :  { %860 = vmatpush.msrb.mxu1 %v840_v43 }
 0x56f   :  { %2369 = vmatmul.msk.f32.vlgmr.msrb.gmra.mxu1 %vm205_vm2, %v837_v22 }
 0x571   :  { %900 = vmax.xlane.f32.xlu1 %v899_v23 }
 0x575   :  { %v1117_v25 = vpop.permute.xlu1 %1116 }
 0x57a   :  { %v1112_v15 = vpop.xlane.xlu2 %1111 }
 0x57b   :  { %2499 = vrcp.f32 %v1112_v15 }
 0x57f   :  { %v382_v27 = vpop.permute.xlu1 %381 }
 0x580   :  { %385 = vst.msk [vmem:[#allocation2] sm:$0xff] %vm384_vm4, %v382_v27  ;;  %v3111_v27 = vstv %s2389_s28 }
 0x581   :  { %v2500_v31 = vpop.eup %2499 }
 0x582   :  { %v982_v30 = vpop.permute.xlu2 %981  ;;  %v1114_v34 = vmul.f32 %v2500_v31, %v3023_v46  ;;  %v3116_v31 = vstv %s1291_s14 }
 0x583   :  { %1002 = vmatpush.msra.mxu1 %v982_v30 }
 0x584   :  { %2375 = vmatmul.msk.f32.vlgmr.msra.gmra.mxu1 %vm205_vm2, %v980_v28  ;;  %v3113_v28 = vstv %s2397_s13 }
 0x585   :  { %1137 = vmatpush.msrb.mxu1 %v1117_v25 }
 0x587   :  { %v454_v32 = vpop.permute.xlu0 %453  ;;  %v1259_v33 = vpop.permute.xlu1 %1258 }
 0x588   :  { %457 = vst.msk [vmem:[#allocation2] sm:$0xff] %vm456_vm5, %v454_v32  ;;  %1279 = vmatpush.msra.mxu1 %v1259_v33 }
 0x58a   :  { %910 = vrot.lane.b32.xlu1 %v3001_v38, %s2692_s20 }
 0x58c   :  { %2381 = vmatmul.msk.f32.vlgmr.msrb.gmra.mxu1 %vm205_vm2, %v1114_v34  ;;  %v3121_v34 = vstv %s2399_s15 }
 0x58f   :  { %v3064_v35 = vld [vmem:[#allocation2] sm:$0xff]  ;;  %v732_v36 = vpop.permute.xlu0 %731 }
 0x590   :  { %1312 = vmatpush.msra.mxu3 %v3064_v35 }
 0x591   :  { %2388 = vmatmul.msk.f32.vlgmr.msra.gmra.mxu3 %vm205_vm2, %v3062_v24 }
 0x5b9   :  { %v661_v37 = vpop.permute.xlu1 %660 }
 0x5ba   :  { %663 = vst.msk [vmem:[#allocation2 + $0x8] sm:$0xff] %vm384_vm4, %v661_v37  ;;  %v765_v29 = vpop.xlane.xlu0 %764 }
 0x5bb   :  { %734 = vst.msk [vmem:[#allocation2 + $0x8] sm:$0xff] %vm456_vm5, %v732_v36  ;;  %v766_v39 = vsub.f32 %v762_v6, %v765_v29  ;;  %v1255_v38 = vpop.xlane.xlu2 %1254 }
 0x5bc   :  { %2501 = vrcp.f32 %v1255_v38 }
 0x5bd   :  { %v767_v40 = vmul.f32 1.442695, %v766_v39 }
 0x5bf   :  { %2503 = vpow2.f32 %v767_v40 }
 0x5c2   :  { %v2502_v41 = vpop.eup %2501  ;;  %v3071_v42 = vld [vmem:[#allocation2 + $0x8] sm:$0xff] }
 0x5c3   :  { %v1257_v44 = vmul.f32 %v2502_v41, %v3038_v7  ;;  %v1042_v45 = vpop.xlane.xlu2 %1041  ;;  %1395 = vmatpush.msrb.mxu1 %v3071_v42  ;;  %v1376_v32 = vmul.f32 %v3071_v42, %v3116_v31  ;;  %v3127_v42 = vld [vmem:[#allocation3 + $0x10] sm:$0xff] }
 0x5c4   :  { %v1043_v47 = vsub.f32 %v1039_v12, %v1042_v45 }
 0x5c5   :  { %v2504_v48 = vpop.eup %2503  ;;  %2387 = vmatmul.msk.f32.vlgmr.msra.gmra.mxu1 %vm205_vm2, %v1257_v44 }
 0x5c6   :  { %v1044_v49 = vmul.f32 1.442695, %v1043_v47  ;;  %v769_v50 = vsel %vm205_vm2, %v2504_v48, 0.0 }
 0x5c7   :  { %770 = vadd.xlane.f32.xlu2 %v769_v50 }
 0x5c8   :  { %2505 = vpow2.f32 %v1044_v49 }
 0x5cb   :  { %v1178_v54 = vpop.xlane.xlu2 %1177 }
 0x5cc   :  { %v1179_v46 = vsub.f32 %v3045_v17, %v1178_v54 }
 0x5cd   :  { %2394 = vmatmul.msk.f32.vlgmr.msrb.gmra.mxu1 %vm205_vm2, %v3077_v51 }
 0x5ce   :  { %v2506_v52 = vpop.eup %2505  ;;  %v1180_v59 = vmul.f32 1.442695, %v1179_v46 }
 0x5cf   :  { %v1046_v53 = vsel %vm205_vm2, %v2506_v52, 0.0 }
 0x5d0   :  { %1047 = vadd.xlane.f32.xlu2 %v1046_v53 }
 0x5e4   :  { %v901_v55 = vpop.xlane.xlu1 %900 }
 0x5e5   :  { %v902_v56 = vsub.f32 %v3049_v21, %v901_v55 }
 0x5e7   :  { %v903_v58 = vmul.f32 1.442695, %v902_v56 }
 0x5e8   :  { %1187 = vrot.lane.b32.xlu2 %v3019_v57, %s2692_s20 }
 0x5e9   :  { %2507 = vpow2.f32 %v903_v58 }
 0x5ea   :  { %2509 = vpow2.f32 %v1180_v59 }
 0x5ec   :  { %v862_v63 = vpop.f32.mrf.mxu1 }
 0x5ef   :  { %v2508_v60 = vpop.eup %2507 }
 0x5f0   :  { %v905_v61 = vsel %vm205_vm2, %v2508_v60, 0.0  ;;  %v2510_v13 = vpop.eup %2509 }
 0x5f1   :  { %906 = vadd.xlane.f32.xlu0 %v905_v61  ;;  %v1182_v62 = vsel %vm205_vm2, %v2510_v13, 0.0  ;;  %v1628_v61 = vld [vmem:[%s3357_s4 + $0x38] sm:$0xff] }
 0x5f9   :  { %1183 = vadd.xlane.f32.xlu0 %v1182_v62  ;;  %v1626_v62 = vld [vmem:[%s3357_s4 + $0x28] sm:$0xff] }
 0x5fc   :  { %v911_v0 = vpop.permute.xlu1 %910 }
 0x5fd   :  { %931 = vmatpush.msrb.mxu2 %v911_v0  ;;  %v1624_v0 = vld [vmem:[%s3357_s4 + $0x18] sm:$0xff] }
 0x601   :  { %v1004_v1 = vpop.f32.mrf.mxu1 }
 0x602   :  { %1008 = vrot.lane.b32.xlu2 %v1004_v1, %s2689_s2  ;;  %v1623_v1 = vld [vmem:[%s3357_s4 + $0x10] sm:$0xff] }
 0x609   :  { %v1139_v2 = vpop.f32.mrf.mxu1 }
 0x60d   :  { %866 = vrot.lane.b32.xlu0 %v862_v63, %s2693_s3  ;;  %v1625_v63 = vld [vmem:[%s3357_s4 + $0x20] sm:$0xff] }
 0x615   :  { %1143 = vrot.lane.b32.xlu0 %v1139_v2, %s2693_s3  ;;  %v1622_v2 = vld [vmem:[%s3357_s4 + $0x8] sm:$0xff] }
 0x63a   :  { %v771_v3 = vpop.xlane.xlu2 %770 }
 0x63b   :  { %2511 = vrcp.f32 %v771_v3  ;;  %v1621_v3 = vld [vmem:[%s3357_s4] sm:$0xff] }
 0x641   :  { %v2512_v4 = vpop.eup %2511 }
 0x642   :  { %v773_v5 = vmul.f32 %v2512_v4, %v2504_v48  ;;  %v1281_v6 = vpop.f32.mrf.mxu1  ;;  %v3133_v48 = vld [vmem:[#allocation3 + $0x18] sm:$0xff] }
 0x643   :  { %1285 = vrot.lane.b32.xlu2 %v1281_v6, %s2689_s2  ;;  %v1048_v8 = vpop.xlane.xlu2 %1047 }
 0x644   :  { %2366 = vmatmul.msk.f32.vlgmr.msra.gmra.mxu2 %vm205_vm2, %v773_v5 }
 0x645   :  { %1069 = vmatpush.msra.mxu2 %v3019_v57  ;;  %v1314_v57 = vpop.f32.mrf.mxu3 }
 0x646   :  { %v1319_v50 = vmul.f32 %v3111_v27, %v1314_v57 }
 0x64a   :  { %v1397_v7 = vpop.f32.mrf.mxu1 }
 0x64b   :  { %1419 = vmatpush.msrb.mxu3 %v1397_v7  ;;  %v1188_v12 = vpop.permute.xlu2 %1187  ;;  %v1402_v30 = vmul.f32 %v1397_v7, %v3111_v27 }
 0x64c   :  { %2396 = vmatmul.msk.f32.vlgmr.msrb.gmra.mxu3 %vm205_vm2, %v3077_v51 }
 0x64d   :  { %v1403_v36 = vadd.f32 %v1402_v30, %v1376_v32 }
 0x65c   :  { %v1009_v41 = vpop.permute.xlu2 %1008 }
 0x664   :  { %v907_v9 = vpop.xlane.xlu0 %906 }
 0x665   :  { %2513 = vrcp.f32 %v907_v9 }
 0x666   :  { %2515 = vrcp.f32 %v1048_v8 }
 0x66b   :  { %v2514_v10 = vpop.eup %2513 }
 0x66c   :  { %v909_v11 = vmul.f32 %v2514_v10, %v2508_v60  ;;  %v1184_v14 = vpop.xlane.xlu0 %1183  ;;  %v2516_v16 = vpop.eup %2515 }
 0x66d   :  { %2517 = vrcp.f32 %v1184_v14  ;;  %v1050_v17 = vmul.f32 %v2516_v16, %v2506_v52  ;;  %v1293_v52 = vmul.f32 %v3116_v31, %v3064_v35 }
 0x66e   :  { %2372 = vmatmul.msk.f32.vlgmr.msrb.gmra.mxu2 %vm205_vm2, %v909_v11 }
 0x66f   :  { %1208 = vmatpush.msrb.mxu2 %v1188_v12  ;;  %v1320_v54 = vadd.f32 %v1319_v50, %v1293_v52 }
 0x673   :  { %v2518_v18 = vpop.eup %2517 }
 0x674   :  { %v1186_v19 = vmul.f32 %v2518_v18, %v2510_v13  ;;  %v1627_v13 = vld [vmem:[%s3357_s4 + $0x30] sm:$0xff] }
 0x676   :  { %2378 = vmatmul.msk.f32.vlgmr.msra.gmra.mxu2 %vm205_vm2, %v1050_v17 }
 0x677   :  { %1336 = vmatpush.msra.mxu2 %v1314_v57 }
 0x67e   :  { %2384 = vmatmul.msk.f32.vlgmr.msrb.gmra.mxu2 %vm205_vm2, %v1186_v19 }
 0x67f   :  { %v867_v21 = vpop.permute.xlu0 %866 }
 0x686   :  { %2390 = vmatmul.msk.f32.vlgmr.msra.gmra.mxu2 %vm205_vm2, %v3062_v24 }
 0x687   :  { %v1144_v25 = vpop.permute.xlu0 %1143 }
 0x69d   :  { %v1286_v47 = vpop.permute.xlu2 %1285 }
 0x6c7   :  { %v794_v20 = vpop.f32.mrf.mxu2 }
 0x6c8   :  { %797 = vst.msk [vmem:[#allocation2 + $0x10] sm:$0xff] %vm179_vm1, %v794_v20  ;;  %v2451_v20 = vld [vmem:[%s3358_s5] ss:$0 sm:$0xff] }
 0x6c9   :  { %869 = vst.msk [vmem:[#allocation2 + $0x10] sm:$0xff] %vm312_vm3, %v867_v21 }
 0x6cf   :  { %v1421_v22 = vpop.f32.mrf.mxu3 }
 0x6d0   :  { %1443 = vmatpush.msrb.mxu2 %v1421_v22  ;;  %v1426_v33 = vmul.f32 %v3113_v28, %v1421_v22 }
 0x6d1   :  { %2398 = vmatmul.msk.f32.vlgmr.msrb.gmra.mxu2 %vm205_vm2, %v3077_v51 }
 0x6d2   :  { %v1427_v29 = vadd.f32 %v1426_v33, %v1403_v36  ;;  %v2562_v33 = vld [vmem:[%s3353_s0 + $0x8] sm:$0xff] }
 0x6f1   :  { %v933_v43 = vpop.f32.mrf.mxu2 }
 0x6f2   :  { %937 = vrot.lane.b32.xlu1 %v933_v43, %s2691_s19 }
 0x6f9   :  { %v1071_v23 = vpop.f32.mrf.mxu2 }
 0x6fa   :  { %1074 = vst.msk [vmem:[#allocation2 + $0x18] sm:$0xff] %vm179_vm1, %v1071_v23 }
 0x6fb   :  { %1146 = vst.msk [vmem:[#allocation2 + $0x18] sm:$0xff] %vm312_vm3, %v1144_v25 }
 0x701   :  { %v1210_v15 = vpop.f32.mrf.mxu2 }
 0x702   :  { %1214 = vrot.lane.b32.xlu1 %v1210_v15, %s2691_s19 }
 0x709   :  { %v1338_v26 = vpop.f32.mrf.mxu2 }
 0x70a   :  { %1360 = vmatpush.msrb.mxu0 %v1338_v26  ;;  %v1343_v53 = vmul.f32 %v3113_v28, %v1338_v26 }
 0x70b   :  { %2392 = vmatmul.msk.f32.vlgmr.msrb.gmra.mxu0 %vm205_vm2, %v3062_v24 }
 0x70c   :  { %v1344_v56 = vadd.f32 %v1343_v53, %v1320_v54 }
 0x754   :  { %v1445_v37 = vpop.f32.mrf.mxu2 }
 0x755   :  { %v1450_v39 = vmul.f32 %v3121_v34, %v1445_v37 }
 0x757   :  { %v1451_v38 = vadd.f32 %v1450_v39, %v1427_v29  ;;  %v2695_v29 = vmov 32.0  }
 0x758   :  { %2519 = vrcp.f32 %v2695_v29 }
 0x759   :  { %1452 = vst.msk [vmem:[#allocation2 + $0x8] sm:$0xff] %vm1369_vm6, %v1451_v38 }
 0x75e   :  { %v2520_v39 = vpop.eup %2519 }
 0x75f   :  { %v1691_v38 = vmul.f32 32.0, %v2520_v39  ;;  %vm1695_vm7 = vweird.f32 %v2520_v39 }
 0x760   :  { %v1618_v6 = vld [vmem:[#allocation2 + $0x8] sm:$0xff] }
 0x764   :  { %v938_v40 = vpop.permute.xlu1 %937 }
 0x765   :  { %940 = vst.msk [vmem:[#allocation2 + $0x10] sm:$0xff] %vm384_vm4, %v938_v40  ;;  %v1692_v40 = vsub.f32 1.0, %v1691_v38 }
 0x766   :  { %1011 = vst.msk [vmem:[#allocation2 + $0x10] sm:$0xff] %vm456_vm5, %v1009_v41 }
 0x767   :  { %v1693_v41 = vmul.f32 %v2520_v39, %v1692_v40 }
 0x76d   :  { %v1455_v44 = vld [vmem:[#allocation2 + $0x10] sm:$0xff] }
 0x76e   :  { %1477 = vmatpush.msra.mxu0 %v1455_v44  ;;  %v1458_v8 = vmul.f32 %v1455_v44, %v3116_v31  ;;  %v1694_v44 = vadd.f32 %v2520_v39, %v1693_v41 }
 0x76f   :  { %2400 = vmatmul.msk.f32.vlgmr.msra.gmra.mxu0 %vm205_vm2, %v3127_v42 }
 0x774   :  { %v1215_v45 = vpop.permute.xlu1 %1214 }
 0x775   :  { %1217 = vst.msk [vmem:[#allocation2 + $0x18] sm:$0xff] %vm384_vm4, %v1215_v45  ;;  %v3200_v45 = vsel %vm1695_vm7, %v2520_v39, %v1694_v44 }
 0x776   :  { %1288 = vst.msk [vmem:[#allocation2 + $0x18] sm:$0xff] %vm456_vm5, %v1286_v47 }
 0x77d   :  { %v1537_v49 = vld [vmem:[#allocation2 + $0x18] sm:$0xff] }
 0x77e   :  { %1559 = vmatpush.msra.mxu2 %v1537_v49  ;;  %v1540_v18 = vmul.f32 %v1537_v49, %v3116_v31 }
 0x77f   :  { %2406 = vmatmul.msk.f32.vlgmr.msra.gmra.mxu2 %vm205_vm2, %v3133_v48 }
 0x788   :  { %v1362_v55 = vpop.f32.mrf.mxu0 }
 0x789   :  { %v1367_v46 = vmul.f32 %v3121_v34, %v1362_v55 }
 0x78b   :  { %v1368_v58 = vadd.f32 %v1367_v46, %v1344_v56 }
 0x78d   :  { %1370 = vst.msk [vmem:[#allocation2] sm:$0xff] %vm1369_vm6, %v1368_v58  ;;  %v2563_v58 = vld [vmem:[%s3353_s0 + $0x10] sm:$0xff] }
 0x794   :  { %v1617_v4 = vld [vmem:[#allocation2] sm:$0xff] }
 0x7ec   :  { %v1479_v59 = vpop.f32.mrf.mxu0 }
 0x7ed   :  { %1501 = vmatpush.msra.mxu1 %v1479_v59  ;;  %v1484_v7 = vmul.f32 %v1479_v59, %v3111_v27 }
 0x7ee   :  { %2402 = vmatmul.msk.f32.vlgmr.msra.gmra.mxu1 %vm205_vm2, %v3127_v42 }
 0x7ef   :  { %v1485_v10 = vadd.f32 %v1484_v7, %v1458_v8 }
 0x802   :  { %v1561_v60 = vpop.f32.mrf.mxu2 }
 0x803   :  { %1583 = vmatpush.msrb.mxu0 %v1561_v60  ;;  %v1566_v17 = vmul.f32 %v1561_v60, %v3111_v27  ;;  %v2561_v27 = vld [vmem:[%s3353_s0] sm:$0xff] }
 0x804   :  { %2408 = vmatmul.msk.f32.vlgmr.msrb.gmra.mxu0 %vm205_vm2, %v3133_v48 }
 0x805   :  { %v1567_v21 = vadd.f32 %v1566_v17, %v1540_v18 }
 0x86b   :  { %v1503_v35 = vpop.f32.mrf.mxu1 }
 0x86c   :  { %1525 = vmatpush.msra.mxu3 %v1503_v35  ;;  %v1508_v9 = vmul.f32 %v1503_v35, %v3113_v28 }
 0x86d   :  { %2404 = vmatmul.msk.f32.vlgmr.msra.gmra.mxu3 %vm205_vm2, %v3127_v42 }
 0x86e   :  { %1653 = vmatpush.msrb.mxu3 %v1628_v61  ;;  %v1509_v12 = vadd.f32 %v1508_v9, %v1485_v10 }
 0x870   :  { %1654 = vmatpush.msrb.mxu3 %v1627_v13 }
 0x872   :  { %1655 = vmatpush.msrb.mxu3 %v1626_v62 }
 0x874   :  { %1656 = vmatpush.msrb.mxu3 %v1625_v63 }
 0x876   :  { %1657 = vmatpush.msrb.mxu3 %v1624_v0  ;;  %v2564_v0 = vld [vmem:[%s3353_s0 + $0x18] sm:$0xff] }
 0x878   :  { %1658 = vmatpush.msrb.mxu3 %v1623_v1 }
 0x87a   :  { %1659 = vmatpush.msrb.mxu3 %v1622_v2 }
 0x87c   :  { %1660 = vmatpush.msrb.mxu3 %v1621_v3  ;;  %v1796_v3 = vld [vmem:[#allocation7 + $0x18] sm:$0xff] }
 0x87d   :  { %2412 = vmatmul.msk.f32.vlgmr.msrb.gmra.mxu3 %vm1369_vm6, %v1617_v4  ;;  %1825 = vmatpush.msrb.mxu2 %v1796_v3  ;;  %v1795_v4 = vld [vmem:[#allocation7 + $0x10] sm:$0xff] }
 0x87f   :  { %1826 = vmatpush.msrb.mxu2 %v1795_v4 }
 0x881   :  { %v1585_v5 = vpop.f32.mrf.mxu0 }
 0x882   :  { %1607 = vmatpush.msrb.mxu1 %v1585_v5  ;;  %v1590_v19 = vmul.f32 %v1585_v5, %v3113_v28  ;;  %v1794_v5 = vld [vmem:[#allocation7 + $0x8] sm:$0xff] }
 0x883   :  { %2410 = vmatmul.msk.f32.vlgmr.msrb.gmra.mxu1 %vm205_vm2, %v3133_v48  ;;  %1827 = vmatpush.msrb.mxu2 %v1794_v5 }
 0x884   :  { %v1591_v23 = vadd.f32 %v1590_v19, %v1567_v21 }
 0x885   :  { %2413 = vmatmul.msk.f32.gmra.mxu3 %vm1369_vm6, %v1618_v6  ;;  %v1793_v6 = vld [vmem:[#allocation7] sm:$0xff] }
 0x886   :  { %1828 = vmatpush.msrb.mxu2 %v1793_v6 }
 0x8f0   :  { %v1527_v11 = vpop.f32.mrf.mxu3 }
 0x8f1   :  { %v1532_v14 = vmul.f32 %v1527_v11, %v3121_v34 }
 0x8f3   :  { %v1533_v16 = vadd.f32 %v1532_v14, %v1509_v12 }
 0x8f5   :  { %1534 = vst.msk [vmem:[#allocation2 + $0x10] sm:$0xff] %vm1369_vm6, %v1533_v16 }
 0x8fc   :  { %v1619_v57 = vld [vmem:[#allocation2 + $0x10] sm:$0xff] }
 0x8fd   :  { %2414 = vmatmul.msk.f32.gmra.mxu3 %vm1369_vm6, %v1619_v57 }
 0x900   :  { %v1662_v22 = vpop.f32.mrf.mxu3  ;;  %v1609_v43 = vpop.f32.mrf.mxu1 }
 0x901   :  { %v1663_v25 = vadd.f32 %v2451_v20, %v1662_v22  ;;  %v1614_v15 = vmul.f32 %v1609_v43, %v3121_v34 }
 0x903   :  { %v1615_v26 = vadd.f32 %v1614_v15, %v1591_v23  ;;  %v1674_v30 = vadd.f32 %v2561_v27, %v1663_v25  ;;  %v3229_v25 = vld [vmem:[%s3359_s6] ss:$0 sm:$0xff] }
 0x905   :  { %1616 = vst.msk [vmem:[#allocation2 + $0x18] sm:$0xff] %vm1369_vm6, %v1615_v26  ;;  %v1678_v28 = vsel %vm105_vm0, %v1674_v30, 0.0 }
 0x906   :  { %1679 = vadd.xlane.f32.xlu0 %v1678_v28  ;;  %v3235_v28 = vld [vmem:[%s3360_s7] ss:$0 sm:$0xff] }
 0x908   :  { %v1665_v31 = vpop.f32.mrf.mxu3 }
 0x909   :  { %v1666_v32 = vadd.f32 %v2451_v20, %v1665_v31 }
 0x90b   :  { %v1675_v36 = vadd.f32 %v2562_v33, %v1666_v32 }
 0x90c   :  { %v1620_v37 = vld [vmem:[#allocation2 + $0x18] sm:$0xff] }
 0x90d   :  { %v1681_v34 = vsel %vm105_vm0, %v1675_v36, 0.0  ;;  %2415 = vmatmul.msk.f32.gmra.mxu3 %vm1369_vm6, %v1620_v37 }
 0x90e   :  { %1682 = vadd.xlane.f32.xlu1 %v1681_v34 }
 0x979   :  { %v1680_v47 = vpop.xlane.xlu0 %1679 }
 0x97a   :  { %v1697_v49 = vmul.f32 %v3200_v45, %v1680_v47 }
 0x97c   :  { %v1701_v50 = vsub.f32 %v1674_v30, %v1697_v49 }
 0x97e   :  { %v1705_v52 = vmul.f32 %v1701_v50, %v1701_v50 }
 0x980   :  { %v1668_v53 = vpop.f32.mrf.mxu3  ;;  %v1709_v54 = vsel %vm105_vm0, %v1705_v52, 0.0 }
 0x981   :  { %v1683_v55 = vpop.xlane.xlu1 %1682  ;;  %v1669_v56 = vadd.f32 %v2451_v20, %v1668_v53  ;;  %1710 = vadd.xlane.f32.xlu1 %v1709_v54 }
 0x982   :  { %v1698_v46 = vmul.f32 %v3200_v45, %v1683_v55 }
 0x983   :  { %v1676_v59 = vadd.f32 %v2563_v58, %v1669_v56 }
 0x984   :  { %v3208_v60 = vsub.f32 %v1675_v36, %v1698_v46 }
 0x985   :  { %v1684_v35 = vsel %vm105_vm0, %v1676_v59, 0.0 }
 0x986   :  { %1685 = vadd.xlane.f32.xlu2 %v1684_v35  ;;  %v1706_v61 = vmul.f32 %v3208_v60, %v3208_v60 }
 0x988   :  { %v1712_v13 = vsel %vm105_vm0, %v1706_v61, 0.0 }
 0x98e   :  { %1713 = vadd.xlane.f32.xlu2 %v1712_v13 }
 0x990   :  { %v1671_v62 = vpop.f32.mrf.mxu3 }
 0x991   :  { %v1672_v63 = vadd.f32 %v2451_v20, %v1671_v62 }
 0x993   :  { %v1677_v1 = vadd.f32 %v2564_v0, %v1672_v63 }
 0x995   :  { %v1687_v2 = vsel %vm105_vm0, %v1677_v1, 0.0 }
 0x996   :  { %1688 = vadd.xlane.f32.xlu0 %v1687_v2 }
 0x9f4   :  { %v1711_v7 = vpop.xlane.xlu1 %1710 }
 0x9f5   :  { %v1721_v8 = vmul.f32 %v1711_v7, %v3200_v45 }
 0x9f7   :  { %v1725_v9 = vadd.f32 1e-05, %v1721_v8 }
 0x9f9   :  { %2521 = vrsqrt.f32 %v1725_v9  ;;  %v1686_v10 = vpop.xlane.xlu2 %1685  ;;  %vm1735_vm9 = vweird.f32 %v1725_v9 }
 0x9fa   :  { %v1699_v11 = vmul.f32 %v3200_v45, %v1686_v10 }
 0x9fc   :  { %v3220_v12 = vsub.f32 %v1676_v59, %v1699_v11 }
 0x9fe   :  { %v1707_v14 = vmul.f32 %v3220_v12, %v3220_v12 }
 0x9ff   :  { %v2522_v16 = vpop.eup %2521 }
 0xa00   :  { %v1730_v17 = vmul.f32 %v2522_v16, %v1725_v9  ;;  %v1715_v57 = vsel %vm105_vm0, %v1707_v14, 0.0  ;;  %vm1736_vm8 = vweird.f32 %v2522_v16 }
 0xa01   :  { %v1714_v18 = vpop.xlane.xlu2 %1713  ;;  %1716 = vadd.xlane.f32.xlu0 %v1715_v57  ;;  %vm1737_vm10 = vmor %vm1735_vm9, %vm1736_vm8 }
 0xa02   :  { %v1731_v19 = vmul.f32 %v2522_v16, %v1730_v17  ;;  %v1722_v20 = vmul.f32 %v1714_v18, %v3200_v45 }
 0xa04   :  { %v1732_v21 = vmul.f32 0.5, %v1731_v19  ;;  %v1726_v22 = vadd.f32 1e-05, %v1722_v20 }
 0xa06   :  { %v1733_v43 = vsub.f32 1.5, %v1732_v21  ;;  %2523 = vrsqrt.f32 %v1726_v22  ;;  %vm1745_vm12 = vweird.f32 %v1726_v22 }
 0xa08   :  { %v1734_v23 = vmul.f32 %v2522_v16, %v1733_v43 }
 0xa09   :  { %v1689_v15 = vpop.xlane.xlu0 %1688 }
 0xa0a   :  { %v1738_v26 = vsel %vm1737_vm10, %v2522_v16, %v1734_v23  ;;  %v1700_v27 = vmul.f32 %v3200_v45, %v1689_v15 }
 0xa0b   :  { %v1769_v30 = vmul.f32 %v1738_v26, %v1701_v50 }
 0xa0c   :  { %v2524_v31 = vpop.eup %2523  ;;  %v1704_v32 = vsub.f32 %v1677_v1, %v1700_v27 }
 0xa0d   :  { %v1777_v33 = vmul.f32 %v3229_v25, %v1769_v30  ;;  %v1740_v36 = vmul.f32 %v2524_v31, %v1726_v22  ;;  %vm1746_vm11 = vweird.f32 %v2524_v31 }
 0xa0e   :  { %v1708_v37 = vmul.f32 %v1704_v32, %v1704_v32  ;;  %vm1747_vm13 = vmor %vm1745_vm12, %vm1746_vm11 }
 0xa0f   :  { %v1741_v34 = vmul.f32 %v2524_v31, %v1740_v36  ;;  %v1785_v29 = vadd.f32 %v3235_v28, %v1777_v33 }
 0xa10   :  { %v1718_v39 = vsel %vm105_vm0, %v1708_v37, 0.0 }
 0xa11   :  { %v1742_v38 = vmul.f32 0.5, %v1741_v34  ;;  %2416 = vmatmul.msk.f32.vlgmr.msrb.gmra.mxu2 %vm105_vm0, %v1785_v29  ;;  %1789 = vst.msk [vmem:[#allocation10] sm:$0xff] %vm105_vm0, %v1785_v29  ;;  %1719 = vadd.xlane.f32.xlu1 %v1718_v39 }
 0xa13   :  { %v1743_v40 = vsub.f32 1.5, %v1742_v38 }
 0xa15   :  { %v1744_v41 = vmul.f32 %v2524_v31, %v1743_v40 }
 0xa17   :  { %v1748_v44 = vsel %vm1747_vm13, %v2524_v31, %v1744_v41 }
 0xa18   :  { %v1770_v47 = vmul.f32 %v1748_v44, %v3208_v60 }
 0xa1a   :  { %v1778_v49 = vmul.f32 %v3229_v25, %v1770_v47 }
 0xa1c   :  { %v1786_v50 = vadd.f32 %v3235_v28, %v1778_v49 }
 0xa1e   :  { %1790 = vst.msk [vmem:[#allocation10 + $0x8] sm:$0xff] %vm105_vm0, %v1786_v50  ;;  %2417 = vmatmul.msk.f32.gmra.mxu2 %vm105_vm0, %v1786_v50 }
 0xa74   :  { %v1717_v52 = vpop.xlane.xlu0 %1716 }
 0xa75   :  { %v1723_v53 = vmul.f32 %v1717_v52, %v3200_v45 }
 0xa77   :  { %v1727_v54 = vadd.f32 1e-05, %v1723_v53 }
 0xa79   :  { %2525 = vrsqrt.f32 %v1727_v54  ;;  %vm1755_vm15 = vweird.f32 %v1727_v54 }
 0xa7f   :  { %v2526_v55 = vpop.eup %2525 }
 0xa80   :  { %v1750_v56 = vmul.f32 %v2526_v55, %v1727_v54  ;;  %vm1756_vm14 = vweird.f32 %v2526_v55 }
 0xa81   :  { %vm1757_vm3 = vmor %vm1755_vm15, %vm1756_vm14 }
 0xa82   :  { %v1751_v46 = vmul.f32 %v2526_v55, %v1750_v56 }
 0xa84   :  { %v1752_v58 = vmul.f32 0.5, %v1751_v46  ;;  %v1720_v59 = vpop.xlane.xlu1 %1719 }
 0xa85   :  { %v1724_v60 = vmul.f32 %v1720_v59, %v3200_v45  ;;  %v2454_v45 = vld [vmem:[%s3362_s9] ss:$0 sm:$0xff] }
 0xa86   :  { %v1753_v35 = vsub.f32 1.5, %v1752_v58 }
 0xa87   :  { %v1728_v61 = vadd.f32 1e-05, %v1724_v60 }
 0xa88   :  { %v1754_v13 = vmul.f32 %v2526_v55, %v1753_v35 }
 0xa89   :  { %2527 = vrsqrt.f32 %v1728_v61  ;;  %vm1765_vm5 = vweird.f32 %v1728_v61 }
 0xa8a   :  { %v1758_v62 = vsel %vm1757_vm3, %v2526_v55, %v1754_v13 }
 0xa8b   :  { %v1771_v63 = vmul.f32 %v1758_v62, %v3220_v12 }
 0xa8d   :  { %v1779_v0 = vmul.f32 %v3229_v25, %v1771_v63 }
 0xa8f   :  { %v2528_v1 = vpop.eup %2527  ;;  %v1787_v2 = vadd.f32 %v3235_v28, %v1779_v0 }
 0xa90   :  { %v1760_v3 = vmul.f32 %v2528_v1, %v1728_v61  ;;  %vm1766_vm4 = vweird.f32 %v2528_v1 }
 0xa91   :  { %1791 = vst.msk [vmem:[#allocation10 + $0x10] sm:$0xff] %vm105_vm0, %v1787_v2  ;;  %2418 = vmatmul.msk.f32.gmra.mxu2 %vm105_vm0, %v1787_v2  ;;  %vm1767_vm6 = vmor %vm1765_vm5, %vm1766_vm4 }
 0xa92   :  { %v1761_v4 = vmul.f32 %v2528_v1, %v1760_v3 }
 0xa94   :  { %v1762_v5 = vmul.f32 0.5, %v1761_v4  ;;  %v1830_v6 = vpop.f32.mrf.mxu2 }
 0xa95   :  { %v1831_v7 = vadd.f32 %v2454_v45, %v1830_v6 }
 0xa96   :  { %v1763_v8 = vsub.f32 1.5, %v1762_v5 }
 0xa97   :  { %1899 = vrot.lane.b32.xlu0 %v1831_v7, %s2694_s21  ;;  %1844 = vrot.lane.b32.xlu2 %v1831_v7, %s2692_s20 }
 0xa98   :  { %v1764_v9 = vmul.f32 %v2528_v1, %v1763_v8  ;;  %1897 = vrot.lane.b32.xlu1 %v1831_v7, %s2688_s18 }
 0xa9a   :  { %v1768_v10 = vsel %vm1767_vm6, %v2528_v1, %v1764_v9 }
 0xa9b   :  { %v1772_v11 = vmul.f32 %v1768_v10, %v1704_v32 }
 0xa9d   :  { %v1780_v12 = vmul.f32 %v3229_v25, %v1772_v11 }
 0xa9f   :  { %v1788_v14 = vadd.f32 %v3235_v28, %v1780_v12 }
 0xaa1   :  { %v1833_v16 = vpop.f32.mrf.mxu2  ;;  %1792 = vst.msk [vmem:[#allocation10 + $0x18] sm:$0xff] %vm105_vm0, %v1788_v14  ;;  %2419 = vmatmul.msk.f32.gmra.mxu2 %vm105_vm0, %v1788_v14 }
 0xaa2   :  { %v1834_v17 = vadd.f32 %v2454_v45, %v1833_v16 }
 0xaa4   :  { %1956 = vrot.lane.b32.xlu0 %v1834_v17, %s2692_s20  ;;  %2011 = vrot.lane.b32.xlu2 %v1834_v17, %s2694_s21 }
 0xaa5   :  { %2009 = vrot.lane.b32.xlu1 %v1834_v17, %s2688_s18 }
 0xaf1   :  { %v1845_v57 = vpop.permute.xlu2 %1844 }
 0xaf2   :  { %2420 = vmatpush.xpose.msk.msra.mxu0 %vm179_vm1, %v1845_v57 }
 0xaf5   :  { %2421 = vmatmul.msk.f32.vlgmr.msra.gmra.mxu0 %vm179_vm1, %v1831_v7 }
 0xafe   :  { %v2012_v19 = vpop.permute.xlu2 %2011 }
 0xb09   :  { %v1900_v18 = vpop.permute.xlu0 %1899 }
 0xb0a   :  { %2422 = vmatpush.xpose.msk.msra.mxu1 %vm179_vm1, %v1900_v18  ;;  %v1898_v20 = vpop.permute.xlu1 %1897 }
 0xb0d   :  { %2423 = vmatmul.msk.f32.vlgmr.msra.gmra.mxu1 %vm179_vm1, %v1898_v20 }
 0xb0e   :  { %2426 = vmatpush.xpose.msk.msrb.mxu1 %vm179_vm1, %v2012_v19 }
 0xb14   :  { %v1836_v21 = vpop.f32.mrf.mxu2 }
 0xb15   :  { %v1837_v22 = vadd.f32 %v2454_v45, %v1836_v21 }
 0xb16   :  { %v1957_v43 = vpop.permute.xlu0 %1956 }
 0xb17   :  { %v2010_v23 = vpop.permute.xlu1 %2009  ;;  %2122 = vrot.lane.b32.xlu1 %v1837_v22, %s2688_s18  ;;  %2124 = vrot.lane.b32.xlu2 %v1837_v22, %s2694_s21 }
 0xb18   :  { %2069 = vrot.lane.b32.xlu0 %v1837_v22, %s2692_s20  ;;  %2424 = vmatpush.xpose.msk.msrb.mxu0 %vm179_vm1, %v1957_v43 }
 0xb19   :  { %2427 = vmatmul.msk.f32.vlgmr.msrb.gmra.mxu1 %vm179_vm1, %v2010_v23 }
 0xb1b   :  { %2425 = vmatmul.msk.f32.vlgmr.msrb.gmra.mxu0 %vm179_vm1, %v1834_v17 }
 0xb24   :  { %v1839_v25 = vpop.f32.mrf.mxu2 }
 0xb25   :  { %v1840_v15 = vadd.f32 %v2454_v45, %v1839_v25 }
 0xb27   :  { %2235 = vrot.lane.b32.xlu1 %v1840_v15, %s2688_s18  ;;  %2237 = vrot.lane.b32.xlu2 %v1840_v15, %s2694_s21  ;;  %s2696_s21 = smov [#allocation10]  }
 0xb28   :  { %2182 = vrot.lane.b32.xlu0 %v1840_v15, %s2692_s20  ;;  %s2299_s20 = sshll.u32 %s3364_s11, 4  ;;  %s2297_s23 = sshll.u32 %s2696_s21, 4  ;;  %s2300_s20 = int_to_ptr.hbm [resolvable:$true] %s2299_s20  ;;  %s2298_s23 = int_to_ptr.vmem [resolvable:$true] %s2297_s23 }
 0xb29   :  { %2305 = dma.vmem_to_hbm [thread:$0]  %s2298_s23, 512, %s2300_s20, [#allocation5], %s2684_s29, %s2684_s29, %s2685_s30  }
 0xb2a   :  { %s2697_s11 = smov [#allocation11]  }
 0xb2b   :  { %s2310_s24 = sshll.u32 %s2697_s11, 4  ;;  %s2311_s24 = int_to_ptr.vmem [resolvable:$true] %s2310_s24 }
 0xb71   :  { %v2125_v26 = vpop.permute.xlu2 %2124 }
 0xb72   :  { %v1867_v27 = vpop.f32.mrf.mxu0  ;;  %2430 = vmatpush.xpose.msk.msra.mxu1 %vm179_vm1, %v2125_v26 }
 0xb73   :  { %v1870_v30 = vmul.f32 0.25, %v1867_v27 }
 0xb75   :  { %v1871_v28 = vadd.f32 %v1870_v30, %v3062_v24 }
 0xb77   :  { %v1872_v31 = vsel %vm205_vm2, %v1871_v28, -inf }
 0xb78   :  { %1873 = vmax.xlane.f32.xlu0 %v1872_v31 }
 0xb81   :  { %v2238_v32 = vpop.permute.xlu2 %2237 }
 0xb82   :  { %2434 = vmatpush.xpose.msk.msrb.mxu1 %vm179_vm1, %v2238_v32 }
 0xb89   :  { %v2123_v33 = vpop.permute.xlu1 %2122 }
 0xb8a   :  { %v1922_v36 = vpop.f32.mrf.mxu1  ;;  %v2070_v37 = vpop.permute.xlu0 %2069  ;;  %2431 = vmatmul.msk.f32.vlgmr.msra.gmra.mxu1 %vm179_vm1, %v2123_v33 }
 0xb8b   :  { %v1925_v34 = vmul.f32 0.25, %v1922_v36  ;;  %2428 = vmatpush.xpose.msk.msra.mxu0 %vm179_vm1, %v2070_v37 }
 0xb8d   :  { %v1926_v29 = vadd.f32 %v1925_v34, %v3062_v24 }
 0xb8e   :  { %2429 = vmatmul.msk.f32.vlgmr.msra.gmra.mxu0 %vm179_vm1, %v1837_v22 }
 0xb8f   :  { %v1927_v39 = vsel %vm205_vm2, %v1926_v29, -inf }
 0xb90   :  { %1928 = vmax.xlane.f32.xlu1 %v1927_v39 }
 0xb96   :  { %v2034_v38 = vpop.f32.mrf.mxu1 }
 0xb97   :  { %v2037_v40 = vmul.f32 0.25, %v2034_v38 }
 0xb98   :  { %v1979_v41 = vpop.f32.mrf.mxu0 }
 0xb99   :  { %v1982_v44 = vmul.f32 0.25, %v1979_v41  ;;  %v2236_v47 = vpop.permute.xlu1 %2235  ;;  %v2038_v49 = vadd.f32 %v2037_v40, %v3077_v51 }
 0xb9a   :  { %v2183_v50 = vpop.permute.xlu0 %2182  ;;  %2435 = vmatmul.msk.f32.vlgmr.msrb.gmra.mxu1 %vm179_vm1, %v2236_v47 }
 0xb9b   :  { %v2039_v52 = vsel %vm205_vm2, %v2038_v49, -inf  ;;  %2432 = vmatpush.xpose.msk.msrb.mxu0 %vm179_vm1, %v2183_v50  ;;  %v1983_v24 = vadd.f32 %v1982_v44, %v3077_v51 }
 0xb9c   :  { %2040 = vmax.xlane.f32.xlu0 %v2039_v52 }
 0xb9d   :  { %v1984_v53 = vsel %vm205_vm2, %v1983_v24, -inf }
 0xb9e   :  { %1985 = vmax.xlane.f32.xlu2 %v1984_v53  ;;  %2433 = vmatmul.msk.f32.vlgmr.msrb.gmra.mxu0 %vm179_vm1, %v1840_v15 }
 0xbeb   :  { %v1874_v54 = vpop.xlane.xlu0 %1873 }
 0xbec   :  { %v1875_v55 = vsub.f32 %v1871_v28, %v1874_v54 }
 0xbee   :  { %v1876_v56 = vmul.f32 1.442695, %v1875_v55 }
 0xbf0   :  { %2529 = vpow2.f32 %v1876_v56 }
 0xbf6   :  { %v3297_v46 = vpop.eup %2529 }
 0xbf7   :  { %v1878_v58 = vsel %vm205_vm2, %v3297_v46, 0.0 }
 0xbf8   :  { %1879 = vadd.xlane.f32.xlu2 %v1878_v58 }
 0xc03   :  { %v1929_v59 = vpop.xlane.xlu1 %1928 }
 0xc04   :  { %v1930_v60 = vsub.f32 %v1926_v29, %v1929_v59 }
 0xc06   :  { %v1931_v35 = vmul.f32 1.442695, %v1930_v60 }
 0xc07   :  { %v2147_v45 = vpop.f32.mrf.mxu1 }
 0xc08   :  { %2531 = vpow2.f32 %v1931_v35  ;;  %v2150_v5 = vmul.f32 0.25, %v2147_v45 }
 0xc0a   :  { %v2151_v14 = vadd.f32 %v2150_v5, %v3127_v42 }
 0xc0b   :  { %v2092_v2 = vpop.f32.mrf.mxu0 }
 0xc0c   :  { %v2095_v10 = vmul.f32 0.25, %v2092_v2  ;;  %v2152_v57 = vsel %vm205_vm2, %v2151_v14, -inf }
 0xc0e   :  { %v3301_v51 = vpop.eup %2531  ;;  %v3317_v17 = vadd.f32 %v2095_v10, %v3127_v42 }
 0xc0f   :  { %v2041_v61 = vpop.xlane.xlu0 %2040  ;;  %v1933_v13 = vsel %vm205_vm2, %v3301_v51, 0.0 }
 0xc10   :  { %v2042_v62 = vsub.f32 %v2038_v49, %v2041_v61  ;;  %1934 = vadd.xlane.f32.xlu0 %v1933_v13  ;;  %v2097_v18 = vsel %vm205_vm2, %v3317_v17, -inf }
 0xc11   :  { %v1986_v63 = vpop.xlane.xlu2 %1985 }
 0xc12   :  { %v2043_v0 = vmul.f32 1.442695, %v2042_v62  ;;  %v1987_v1 = vsub.f32 %v1983_v24, %v1986_v63 }
 0xc14   :  { %2533 = vpow2.f32 %v2043_v0  ;;  %v1988_v3 = vmul.f32 1.442695, %v1987_v1 }
 0xc16   :  { %2535 = vpow2.f32 %v1988_v3 }
 0xc1a   :  { %v3305_v4 = vpop.eup %2533 }
 0xc1b   :  { %v2205_v6 = vpop.f32.mrf.mxu0  ;;  %v2045_v7 = vsel %vm205_vm2, %v3305_v4, 0.0 }
 0xc1c   :  { %v3309_v8 = vpop.eup %2535  ;;  %v2208_v9 = vmul.f32 0.25, %v2205_v6  ;;  %2046 = vadd.xlane.f32.xlu2 %v2045_v7 }
 0xc1d   :  { %v1990_v11 = vsel %vm205_vm2, %v3309_v8, 0.0 }
 0xc1e   :  { %v2209_v12 = vadd.f32 %v2208_v9, %v3133_v48  ;;  %1991 = vadd.xlane.f32.xlu1 %v1990_v11  ;;  %v2260_v11 = vpop.f32.mrf.mxu1 }
 0xc20   :  { %v2210_v16 = vsel %vm205_vm2, %v2209_v12, -inf }
 0xc21   :  { %2211 = vmax.xlane.f32.xlu0 %v2210_v16 }
 0xc24   :  { %2153 = vmax.xlane.f32.xlu2 %v2152_v57 }
 0xc26   :  { %2098 = vmax.xlane.f32.xlu1 %v2097_v18 }
 0xc6b   :  { %v1880_v19 = vpop.xlane.xlu2 %1879 }
 0xc6c   :  { %2537 = vrcp.f32 %v1880_v19  ;;  %v1892_v26 = vand.u32 2147483648, %v1880_v19  ;;  %vm1886_vm1 = vweird.f32 %v1880_v19  ;;  %v1890_v27 = vand.u32 2147483647, %v1880_v19 }
 0xc6e   :  { %v1893_v37 = vor.u32 1.1754944e-38, %v1892_v26  ;;  %vm1891_vm9 = vcmp.eq.f32.partialorder %v1890_v27, 8.507059e+37 }
 0xc72   :  { %v2538_v20 = vpop.eup %2537 }
 0xc73   :  { %v1882_v21 = vmul.f32 %v2538_v20, %v1880_v19  ;;  %vm1887_vm0 = vweird.f32 %v2538_v20  ;;  %v2263_v19 = vmul.f32 0.25, %v2260_v11 }
 0xc74   :  { %vm1888_vm7 = vmor %vm1886_vm1, %vm1887_vm0 }
 0xc75   :  { %v1883_v22 = vsub.f32 1.0, %v1882_v21 }
 0xc77   :  { %v1884_v23 = vmul.f32 %v2538_v20, %v1883_v22 }
 0xc79   :  { %v1885_v15 = vadd.f32 %v2538_v20, %v1884_v23 }
 0xc7b   :  { %v1889_v31 = vsel %vm1888_vm7, %v2538_v20, %v1885_v15  ;;  %v2264_v15 = vadd.f32 %v2263_v19, %v3133_v48 }
 0xc7c   :  { %v1894_v39 = vsel %vm1891_vm9, %v1893_v37, %v1889_v31 }
 0xc7d   :  { %v1895_v47 = vmul.f32 %v3297_v46, %v1894_v39  ;;  %v2265_v26 = vsel %vm205_vm2, %v2264_v15, -inf }
 0xc83   :  { %v1935_v43 = vpop.xlane.xlu0 %1934 }
 0xc84   :  { %2539 = vrcp.f32 %v1935_v43  ;;  %v1947_v28 = vand.u32 2147483648, %v1935_v43  ;;  %v1945_v33 = vand.u32 2147483647, %v1935_v43  ;;  %vm1941_vm10 = vweird.f32 %v1935_v43 }
 0xc86   :  { %v1948_v38 = vor.u32 1.1754944e-38, %v1947_v28  ;;  %vm1946_vm12 = vcmp.eq.f32.partialorder %v1945_v33, 8.507059e+37 }
 0xc8a   :  { %v2540_v25 = vpop.eup %2539 }
 0xc8b   :  { %v1937_v42 = vmul.f32 %v2540_v25, %v1935_v43  ;;  %vm1942_vm8 = vweird.f32 %v2540_v25 }
 0xc8c   :  { %vm1943_vm11 = vmor %vm1941_vm10, %vm1942_vm8 }
 0xc8d   :  { %v1938_v30 = vsub.f32 1.0, %v1937_v42 }
 0xc8f   :  { %v1939_v32 = vmul.f32 %v2540_v25, %v1938_v30  ;;  %v2047_v36 = vpop.xlane.xlu2 %2046 }
 0xc90   :  { %2541 = vrcp.f32 %v2047_v36  ;;  %v2059_v61 = vand.u32 2147483648, %v2047_v36  ;;  %vm2053_vm14 = vweird.f32 %v2047_v36 }
 0xc91   :  { %v1940_v34 = vadd.f32 %v2540_v25, %v1939_v32  ;;  %v1992_v29 = vpop.xlane.xlu1 %1991 }
 0xc92   :  { %2543 = vrcp.f32 %v1992_v29  ;;  %v2004_v1 = vand.u32 2147483648, %v1992_v29  ;;  %v2002_v5 = vand.u32 2147483647, %v1992_v29  ;;  %v2060_v6 = vor.u32 1.1754944e-38, %v2059_v61 }
 0xc93   :  { %v1944_v40 = vsel %vm1943_vm11, %v2540_v25, %v1940_v34  ;;  %vm1998_vm5 = vweird.f32 %v1992_v29 }
 0xc94   :  { %v1949_v41 = vsel %vm1946_vm12, %v1948_v38, %v1944_v40  ;;  %v2212_v44 = vpop.xlane.xlu0 %2211  ;;  %vm2003_vm0 = vcmp.eq.f32.partialorder %v2002_v5, 8.507059e+37 }
 0xc95   :  { %v1950_v49 = vmul.f32 %v3301_v51, %v1949_v41  ;;  %v2213_v50 = vsub.f32 %v2209_v12, %v2212_v44  ;;  %v2057_v51 = vand.u32 2147483647, %v2047_v36 }
 0xc96   :  { %v2542_v52 = vpop.eup %2541 }
 0xc97   :  { %v2049_v24 = vmul.f32 %v2542_v52, %v2047_v36  ;;  %v2214_v53 = vmul.f32 1.442695, %v2213_v50  ;;  %v2154_v54 = vpop.xlane.xlu2 %2153  ;;  %v1951_v55 = vadd.f32 %v1950_v49, %v1895_v47  ;;  %vm2054_vm13 = vweird.f32 %v2542_v52 }
 0xc98   :  { %v2544_v56 = vpop.eup %2543  ;;  %v2155_v58 = vsub.f32 %v2151_v14, %v2154_v54  ;;  %vm2055_vm3 = vmor %vm2053_vm14, %vm2054_vm13  ;;  %vm2058_vm4 = vcmp.eq.f32.partialorder %v2057_v51, 8.507059e+37  ;;  %v2005_v14 = vor.u32 1.1754944e-38, %v2004_v1 }
 0xc99   :  { %v2050_v59 = vsub.f32 1.0, %v2049_v24  ;;  %v1994_v60 = vmul.f32 %v2544_v56, %v1992_v29  ;;  %2545 = vpow2.f32 %v2214_v53  ;;  %v2099_v35 = vpop.xlane.xlu1 %2098  ;;  %v1952_v63 = vmul.f32 0.5, %v1951_v55 }
 0xc9a   :  { %v2156_v13 = vmul.f32 1.442695, %v2155_v58  ;;  %v2100_v62 = vsub.f32 %v3317_v17, %v2099_v35  ;;  %vm1999_vm15 = vweird.f32 %v2544_v56 }
 0xc9b   :  { %v2051_v46 = vmul.f32 %v2542_v52, %v2050_v59  ;;  %v1995_v0 = vsub.f32 1.0, %v1994_v60  ;;  %1953 = vst.msk [vmem:[#allocation11] sm:$0xff] %vm205_vm2, %v1952_v63  ;;  %vm2000_vm6 = vmor %vm1998_vm5, %vm1999_vm15 }
 0xc9c   :  { %2547 = vpow2.f32 %v2156_v13  ;;  %v2101_v2 = vmul.f32 1.442695, %v2100_v62 }
 0xc9d   :  { %v2052_v3 = vadd.f32 %v2542_v52, %v2051_v46  ;;  %v1996_v45 = vmul.f32 %v2544_v56, %v1995_v0 }
 0xc9e   :  { %2549 = vpow2.f32 %v2101_v2 }
 0xc9f   :  { %v3326_v7 = vpop.eup %2545  ;;  %v2056_v9 = vsel %vm2055_vm3, %v2542_v52, %v2052_v3  ;;  %v1997_v10 = vadd.f32 %v2544_v56, %v1996_v45 }
 0xca0   :  { %v2061_v12 = vsel %vm2058_vm4, %v2060_v6, %v2056_v9  ;;  %v2216_v16 = vsel %vm205_vm2, %v3326_v7, 0.0 }
 0xca1   :  { %v2001_v17 = vsel %vm2000_vm6, %v2544_v56, %v1997_v10  ;;  %2217 = vadd.xlane.f32.xlu2 %v2216_v16  ;;  %v2062_v20 = vmul.f32 %v3305_v4, %v2061_v12 }
 0xca2   :  { %v2548_v57 = vpop.eup %2547  ;;  %v2006_v18 = vsel %vm2003_vm0, %v2005_v14, %v2001_v17 }
 0xca3   :  { %v2007_v21 = vmul.f32 %v3309_v8, %v2006_v18  ;;  %v2158_v22 = vsel %vm205_vm2, %v2548_v57, 0.0 }
 0xca4   :  { %v2550_v43 = vpop.eup %2549  ;;  %2159 = vadd.xlane.f32.xlu1 %v2158_v22 }
 0xca5   :  { %v2103_v23 = vsel %vm205_vm2, %v2550_v43, 0.0  ;;  %v2063_v25 = vadd.f32 %v2062_v20, %v2007_v21 }
 0xca6   :  { %2104 = vadd.xlane.f32.xlu0 %v2103_v23 }
 0xca7   :  { %v2064_v42 = vmul.f32 0.5, %v2063_v25 }
 0xca9   :  { %2066 = vst.msk [vmem:[#allocation11 + $0x8] sm:$0xff] %vm205_vm2, %v2064_v42 }
 0xcac   :  { %2266 = vmax.xlane.f32.xlu1 %v2265_v26 }
 0xd14   :  { %v2218_v61 = vpop.xlane.xlu2 %2217 }
 0xd15   :  { %v2230_v3 = vand.u32 2147483648, %v2218_v61  ;;  %vm2224_vm15 = vweird.f32 %v2218_v61  ;;  %v2228_v45 = vand.u32 2147483647, %v2218_v61 }
 0xd17   :  { %v2160_v27 = vpop.xlane.xlu1 %2159  ;;  %v2231_v12 = vor.u32 1.1754944e-38, %v2230_v3  ;;  %vm2229_vm5 = vcmp.eq.f32.partialorder %v2228_v45, 8.507059e+37 }
 0xd18   :  { %2551 = vrcp.f32 %v2160_v27  ;;  %v2172_v37 = vand.u32 2147483648, %v2160_v27  ;;  %v2170_v29 = vand.u32 2147483647, %v2160_v27  ;;  %vm2166_vm7 = vweird.f32 %v2160_v27 }
 0xd19   :  { %v2105_v4 = vpop.xlane.xlu0 %2104 }
 0xd1a   :  { %2553 = vrcp.f32 %v2105_v4  ;;  %v2117_v38 = vand.u32 2147483648, %v2105_v4  ;;  %v2115_v44 = vand.u32 2147483647, %v2105_v4  ;;  %v2173_v47 = vor.u32 1.1754944e-38, %v2172_v37 }
 0xd1b   :  { %vm2171_vm10 = vcmp.eq.f32.partialorder %v2170_v29, 8.507059e+37  ;;  %vm2111_vm11 = vweird.f32 %v2105_v4 }
 0xd1c   :  { %v2118_v24 = vor.u32 1.1754944e-38, %v2117_v38  ;;  %vm2116_vm13 = vcmp.eq.f32.partialorder %v2115_v44, 8.507059e+37 }
 0xd1e   :  { %v2552_v8 = vpop.eup %2551 }
 0xd1f   :  { %v2162_v30 = vmul.f32 %v2552_v8, %v2160_v27  ;;  %v2267_v28 = vpop.xlane.xlu1 %2266  ;;  %vm2167_vm1 = vweird.f32 %v2552_v8 }
 0xd20   :  { %v2554_v31 = vpop.eup %2553  ;;  %v2268_v32 = vsub.f32 %v2264_v15, %v2267_v28  ;;  %vm2168_vm9 = vmor %vm2166_vm7, %vm2167_vm1 }
 0xd21   :  { %v2163_v33 = vsub.f32 1.0, %v2162_v30  ;;  %v2107_v36 = vmul.f32 %v2554_v31, %v2105_v4  ;;  %vm2112_vm8 = vweird.f32 %v2554_v31 }
 0xd22   :  { %v2269_v34 = vmul.f32 1.442695, %v2268_v32  ;;  %vm2113_vm12 = vmor %vm2111_vm11, %vm2112_vm8 }
 0xd23   :  { %v2164_v48 = vmul.f32 %v2552_v8, %v2163_v33  ;;  %v2108_v39 = vsub.f32 1.0, %v2107_v36 }
 0xd24   :  { %2555 = vpow2.f32 %v2269_v34 }
 0xd25   :  { %v2165_v40 = vadd.f32 %v2552_v8, %v2164_v48  ;;  %v2109_v41 = vmul.f32 %v2554_v31, %v2108_v39  ;;  %2557 = vrcp.f32 %v2218_v61 }
 0xd27   :  { %v2169_v49 = vsel %vm2168_vm9, %v2552_v8, %v2165_v40  ;;  %v2110_v50 = vadd.f32 %v2554_v31, %v2109_v41 }
 0xd28   :  { %v2174_v52 = vsel %vm2171_vm10, %v2173_v47, %v2169_v49 }
 0xd29   :  { %v2114_v53 = vsel %vm2113_vm12, %v2554_v31, %v2110_v50  ;;  %v2175_v56 = vmul.f32 %v2548_v57, %v2174_v52 }
 0xd2a   :  { %v2556_v54 = vpop.eup %2555  ;;  %v2119_v55 = vsel %vm2116_vm13, %v2118_v24, %v2114_v53 }
 0xd2b   :  { %v2120_v58 = vmul.f32 %v2550_v43, %v2119_v55  ;;  %v2271_v59 = vsel %vm205_vm2, %v2556_v54, 0.0  ;;  %v2558_v13 = vpop.eup %2557 }
 0xd2c   :  { %2272 = vadd.xlane.f32.xlu0 %v2271_v59  ;;  %v2220_v62 = vmul.f32 %v2558_v13, %v2218_v61  ;;  %vm2225_vm14 = vweird.f32 %v2558_v13 }
 0xd2d   :  { %v2176_v60 = vadd.f32 %v2175_v56, %v2120_v58  ;;  %vm2226_vm3 = vmor %vm2224_vm15, %vm2225_vm14 }
 0xd2e   :  { %v2221_v63 = vsub.f32 1.0, %v2220_v62 }
 0xd2f   :  { %v2177_v35 = vmul.f32 0.5, %v2176_v60 }
 0xd30   :  { %v2222_v51 = vmul.f32 %v2558_v13, %v2221_v63 }
 0xd31   :  { %2179 = vst.msk [vmem:[#allocation11 + $0x10] sm:$0xff] %vm205_vm2, %v2177_v35 }
 0xd32   :  { %v2223_v1 = vadd.f32 %v2558_v13, %v2222_v51 }
 0xd34   :  { %v2227_v9 = vsel %vm2226_vm3, %v2558_v13, %v2223_v1 }
 0xd35   :  { %v2232_v16 = vsel %vm2229_vm5, %v2231_v12, %v2227_v9 }
 0xd36   :  { %v2233_v19 = vmul.f32 %v3326_v7, %v2232_v16 }
 0xd9f   :  { %v2273_v46 = vpop.xlane.xlu0 %2272 }
 0xda0   :  { %2559 = vrcp.f32 %v2273_v46  ;;  %v2285_v6 = vand.u32 2147483648, %v2273_v46  ;;  %v2283_v11 = vand.u32 2147483647, %v2273_v46  ;;  %vm2279_vm6 = vweird.f32 %v2273_v46 }
 0xda2   :  { %v2286_v17 = vor.u32 1.1754944e-38, %v2285_v6  ;;  %vm2284_vm1 = vcmp.eq.f32.partialorder %v2283_v11, 8.507059e+37 }
 0xda6   :  { %v2560_v0 = vpop.eup %2559 }
 0xda7   :  { %v2275_v2 = vmul.f32 %v2560_v0, %v2273_v46  ;;  %vm2280_vm4 = vweird.f32 %v2560_v0 }
 0xda8   :  { %vm2281_vm0 = vmor %vm2279_vm6, %vm2280_vm4 }
 0xda9   :  { %v2276_v5 = vsub.f32 1.0, %v2275_v2 }
 0xdab   :  { %v2277_v10 = vmul.f32 %v2560_v0, %v2276_v5 }
 0xdad   :  { %v2278_v14 = vadd.f32 %v2560_v0, %v2277_v10 }
 0xdaf   :  { %v2282_v57 = vsel %vm2281_vm0, %v2560_v0, %v2278_v14 }
 0xdb0   :  { %v2287_v18 = vsel %vm2284_vm1, %v2286_v17, %v2282_v57 }
 0xdb1   :  { %v2288_v20 = vmul.f32 %v2556_v54, %v2287_v18 }
 0xdb3   :  { %v2289_v21 = vadd.f32 %v2288_v20, %v2233_v19 }
 0xdb5   :  { %v2290_v22 = vmul.f32 0.5, %v2289_v21 }
 0xdb7   :  { %2292 = vst.msk [vmem:[#allocation11 + $0x18] sm:$0xff] %vm205_vm2, %v2290_v22 }
 0xdb8   :  { %2318 = dma.vmem_to_hbm [thread:$0]  %s2311_s24, 512, %s2313_s27, [#allocation12], %s2684_s29, %s2684_s29, %s2685_s30  }
 0xdb9   :  { %2679 = dma.done.wait [#allocation5], 512  }
 0xdba   :  { %2680 = vsyncadd [#allocation5], 4294966784 }
 0xdbb   :  { %2681 = dma.done.wait [#allocation12], 512  }
 0xdbc   :  { %2682 = vsyncadd [#allocation12], 4294966784 }
 0xdbd   :  { %2327 = vsyncpa [#allocation4], 1 }
 0xdbe   :  { %2328 = vsyncpa [#allocation8], 1 }
 0xdbf   :  { %2329 = vsyncpa [#allocation5], 1 }
 0xdc0   :  { %2330 = vsyncpa [#allocation12], 1 }
 0xdc1   :  { %2331 = vsyncpa [#allocation6], 1 }

</bundles_post_ra>
